<compile_context>
chip_gen: v7x
topology: tpu7x:2x2x1
jax: 0.10.0
libtpu: 0.0.40
codegen_flags: <defaults>
</compile_context>

<pallas_src>
import functools

import jax
import jax.numpy as jnp
from jax.experimental import pallas as pl
from jax.experimental.pallas import tpu as pltpu


def _temporal_decoder_kernel(h0_ref, wg_ref, br_ref, bz_ref, bnih_ref,
                             bnhh_ref, wfc_ref, bfc_ref, out_ref,
                             *, seq_len, gp):
    """GRU recurrence (zero inputs) + single fused Linear head.

    h0_ref  : (B, GP)        initial hidden state, zero-padded to GP lanes
    wg_ref  : (GP, 3*GP)     fused recurrent weights [W_hr.T | W_hz.T | W_hn.T],
                             each gate zero-padded to GP output lanes,
                             rows >= H zeroed
    br/bz   : (1, GP)        combined gate biases (b_ir+b_hr), (b_iz+b_hz), padded
    bnih    : (1, GP)        b_in  (input-path candidate bias), padded
    bnhh    : (1, GP)        b_hn  (hidden-path candidate bias), padded
    wfc_ref : (T*GP, T*D)    block-diagonal fc weight (fc.weight.T per time block)
    bfc_ref : (1, T*D)       fc bias tiled over time
    out_ref : (B, T*D)       decoded sequence, time-major along lanes
    """
    wg = wg_ref[...]
    b_r = br_ref[...]
    b_z = bz_ref[...]
    b_n_ih = bnih_ref[...]
    b_n_hh = bnhh_ref[...]

    # Statically unrolled recurrence.  Only one fused matmul + elementwise work
    # per step sits on the serial dependence chain; hidden states stay in vregs.
    # Padded lanes (>= H) of h remain exactly zero: the corresponding rows and
    # columns of wg are zero and the padded bias lanes are zero.
    h = h0_ref[...]
    hs = []
    for _ in range(seq_len):
        g = jnp.dot(h, wg, preferred_element_type=jnp.float32)   # (B, 3*GP)
        r = jax.nn.sigmoid(g[:, 0:gp] + b_r)                     # vreg-aligned slice
        z = jax.nn.sigmoid(g[:, gp:2 * gp] + b_z)
        n = jnp.tanh(b_n_ih + r * (g[:, 2 * gp:3 * gp] + b_n_hh))
        h = (1.0 - z) * n + z * h
        hs.append(h)

    # FC head, off the recurrence critical path: 128-aligned lane concat of the
    # T hidden states (free vreg relabeling), one matmul against the
    # block-diagonal fc weight, one lane-dense store of (B, T*D).
    h_wide = jnp.concatenate(hs, axis=1)                          # (B, T*GP)
    y = jnp.dot(h_wide, wfc_ref[...], preferred_element_type=jnp.float32)
    out_ref[...] = (y + bfc_ref[...]).astype(out_ref.dtype)


def prepare_params(params, seq_length):
    """One-time host-side weight prep: transpose, split+pad+fuse gates,
    combine biases, build block-diagonal fc weight."""
    H = params["w_hh"].shape[1]
    D = params["w_fc"].shape[0]
    GP = ((H + 127) // 128) * 128           # gate lane padding (vreg aligned)

    w_hh = params["w_hh"].astype(jnp.float32)
    b_ih = params["b_ih"].astype(jnp.float32)
    b_hh = params["b_hh"].astype(jnp.float32)

    def pad_gate(w_t):                      # (H, H) -> (GP, GP)
        return jnp.pad(w_t, ((0, GP - H), (0, GP - H)))

    def pad_bias(b):                        # (H,) -> (1, GP)
        return jnp.pad(b, (0, GP - H)).reshape(1, GP)

    w_gates = jnp.concatenate(
        [pad_gate(w_hh[0:H].T),             # W_hr.T
         pad_gate(w_hh[H:2 * H].T),         # W_hz.T
         pad_gate(w_hh[2 * H:3 * H].T)],    # W_hn.T
        axis=1)                             # (GP, 3*GP)

    # Block-diagonal fc weight: block t maps lanes [t*GP, t*GP+H) of the wide
    # hidden state to output lanes [t*D, (t+1)*D).
    w_fc_pad = jnp.pad(params["w_fc"].T.astype(jnp.float32),
                       ((0, GP - H), (0, 0)))                     # (GP, D)
    w_fc_big = jnp.kron(jnp.eye(seq_length, dtype=jnp.float32), w_fc_pad)
    b_fc_big = jnp.tile(params["b_fc"].astype(jnp.float32),
                        (seq_length,)).reshape(1, seq_length * D)

    return {
        "w_gates": w_gates,                                       # (GP, 3*GP)
        "b_r": pad_bias(b_ih[0:H] + b_hh[0:H]),
        "b_z": pad_bias(b_ih[H:2 * H] + b_hh[H:2 * H]),
        "b_n_ih": pad_bias(b_ih[2 * H:3 * H]),
        "b_n_hh": pad_bias(b_hh[2 * H:3 * H]),
        "w_fc_big": w_fc_big,                                     # (T*GP, T*D)
        "b_fc_big": b_fc_big,                                     # (1, T*D)
        "gp": GP,
        "hidden": H,
        "out_dim": D,
        "seq_len": seq_length,
    }


def temporal_decoder_pallas(latent_B, prepared):
    """Pallas wrapper.  latent_B: (B, H) float32 -> (B, seq_length, D)."""
    B, H = latent_B.shape
    gp = prepared["gp"]
    T = prepared["seq_len"]
    D = prepared["out_dim"]

    # Zero-pad the initial hidden state to GP lanes outside the kernel.
    h0 = jnp.pad(latent_B.astype(jnp.float32), ((0, 0), (0, gp - H)))

    vmem = pl.BlockSpec(memory_space=pltpu.MemorySpace.VMEM)
    kernel = functools.partial(_temporal_decoder_kernel, seq_len=T, gp=gp)
    out2d = pl.pallas_call(
        kernel,
        out_shape=jax.ShapeDtypeStruct((B, T * D), jnp.float32),
        in_specs=[vmem] * 8,
        out_specs=vmem,
    )(h0, prepared["w_gates"], prepared["b_r"], prepared["b_z"],
      prepared["b_n_ih"], prepared["b_n_hh"],
      prepared["w_fc_big"], prepared["b_fc_big"])

    # Free metadata reshape outside the kernel: (B, T*D) -> (B, T, D).
    return out2d.reshape(B, T, D)


def temporal_decoder_ref(latent_B, params, seq_length):
    """Pure-JAX reference (mirrors torch.nn.GRU + nn.Linear on zero inputs)."""
    H = latent_B.shape[1]
    w_hh, b_ih, b_hh = params["w_hh"], params["b_ih"], params["b_hh"]
    w_fc, b_fc = params["w_fc"], params["b_fc"]

    def step(h, _):
        gh = h @ w_hh.T                                      # (B, 3H)
        r = jax.nn.sigmoid(b_ih[0:H] + gh[:, 0:H] + b_hh[0:H])
        z = jax.nn.sigmoid(b_ih[H:2 * H] + gh[:, H:2 * H] + b_hh[H:2 * H])
        n = jnp.tanh(b_ih[2 * H:] + r * (gh[:, 2 * H:] + b_hh[2 * H:]))
        h_new = (1.0 - z) * n + z * h
        y = h_new @ w_fc.T + b_fc
        return h_new, y

    _, ys = jax.lax.scan(step, latent_B.astype(jnp.float32), None,
                         length=seq_length)
    return jnp.transpose(ys, (1, 0, 2))                      # (B, T, D)


def init_params(key, latent_dim_B, output_size):
    """Deterministic init matching PyTorch default shapes/ranges."""
    H, D = latent_dim_B, output_size
    k = 1.0 / (H ** 0.5)
    ks = jax.random.split(key, 6)
    return {
        # weight_ih_l0 exists in the module (GRU input_size == output_size) but
        # is multiplied by zero inputs, so it never influences the forward pass;
        # kept only for checkpoint-shape fidelity.
        "w_ih": jax.random.uniform(ks[0], (3 * H, D), jnp.float32, -k, k),
        "w_hh": jax.random.uniform(ks[1], (3 * H, H), jnp.float32, -k, k),
        "b_ih": jax.random.uniform(ks[2], (3 * H,), jnp.float32, -k, k),
        "b_hh": jax.random.uniform(ks[3], (3 * H,), jnp.float32, -k, k),
        "w_fc": jax.random.uniform(ks[4], (D, H), jnp.float32, -k, k),
        "b_fc": jax.random.uniform(ks[5], (D,), jnp.float32, -k, k),
    }


if __name__ == "__main__":
    # Small, module-consistent shapes: batch=2, latent_dim_B=8,
    # output_size=64, seq_length=8.
    BATCH, LATENT_B, OUTPUT_SIZE, SEQ_LEN = 2, 8, 64, 8

    root = jax.random.PRNGKey(0)
    k_params, k_input = jax.random.split(root)
    params = init_params(k_params, LATENT_B, OUTPUT_SIZE)
    prepared = prepare_params(params, SEQ_LEN)   # one-time host-side weight prep
    latent_B = jax.random.normal(k_input, (BATCH, LATENT_B), jnp.float32)

    out = temporal_decoder_pallas(latent_B, prepared)
    out = jax.block_until_ready(out)

    ref = temporal_decoder_ref(latent_B, params, SEQ_LEN)
    ref = jax.block_until_ready(ref)

    assert out.shape == (BATCH, SEQ_LEN, OUTPUT_SIZE), out.shape
    assert jnp.allclose(out, ref, atol=1e-5, rtol=1e-5), (
        float(jnp.max(jnp.abs(out - ref))))

    print("KERNEL_OK")
</pallas_src>

<mosaic_0001>
module attributes {stable_mosaic.version = 11 : i64} {
  func.func @_temporal_decoder_kernel(%arg0: memref<2x128xf32, #tpu.memory_space<vmem>>, %arg1: memref<128x384xf32, #tpu.memory_space<vmem>>, %arg2: memref<1x128xf32, #tpu.memory_space<vmem>>, %arg3: memref<1x128xf32, #tpu.memory_space<vmem>>, %arg4: memref<1x128xf32, #tpu.memory_space<vmem>>, %arg5: memref<1x128xf32, #tpu.memory_space<vmem>>, %arg6: memref<1024x512xf32, #tpu.memory_space<vmem>>, %arg7: memref<1x512xf32, #tpu.memory_space<vmem>>, %arg8: memref<2x512xf32, #tpu.memory_space<vmem>>) attributes {dimension_semantics = [], scalar_prefetch = 0 : i64, scratch_operands = 0 : i64, tpu.core_type = #tpu.core_type<tc>} {
    %c0 = arith.constant 0 : index
    %c0_0 = arith.constant 0 : index
    %0 = vector.load %arg1[%c0, %c0_0] : memref<128x384xf32, #tpu.memory_space<vmem>>, vector<128x384xf32>
    %c0_1 = arith.constant 0 : index
    %c0_2 = arith.constant 0 : index
    %1 = vector.load %arg2[%c0_1, %c0_2] : memref<1x128xf32, #tpu.memory_space<vmem>>, vector<1x128xf32>
    %c0_3 = arith.constant 0 : index
    %c0_4 = arith.constant 0 : index
    %2 = vector.load %arg3[%c0_3, %c0_4] : memref<1x128xf32, #tpu.memory_space<vmem>>, vector<1x128xf32>
    %c0_5 = arith.constant 0 : index
    %c0_6 = arith.constant 0 : index
    %3 = vector.load %arg4[%c0_5, %c0_6] : memref<1x128xf32, #tpu.memory_space<vmem>>, vector<1x128xf32>
    %c0_7 = arith.constant 0 : index
    %c0_8 = arith.constant 0 : index
    %4 = vector.load %arg5[%c0_7, %c0_8] : memref<1x128xf32, #tpu.memory_space<vmem>>, vector<1x128xf32>
    %c0_9 = arith.constant 0 : index
    %c0_10 = arith.constant 0 : index
    %5 = vector.load %arg0[%c0_9, %c0_10] : memref<2x128xf32, #tpu.memory_space<vmem>>, vector<2x128xf32>
    %cst = arith.constant dense<0.000000e+00> : vector<2x384xf32>
    %6 = tpu.matmul %5, %0, %cst {dimension_numbers = #tpu.dot_dimension_numbers<[1], [0], [0], [1], [0, 0, 1, 1], [], []>} : vector<2x128xf32>, vector<128x384xf32>, vector<2x384xf32> -> vector<2x384xf32>
    %7 = vector.extract_strided_slice %6 {offsets = [0, 0], sizes = [2, 128], strides = [1, 1]} : vector<2x384xf32> to vector<2x128xf32>
    %8 = vector.broadcast %1 : vector<1x128xf32> to vector<2x128xf32>
    %9 = arith.addf %7, %8 : vector<2x128xf32>
    %10 = arith.negf %9 : vector<2x128xf32>
    %11 = math.exp %10 : vector<2x128xf32>
    %cst_11 = arith.constant 1.000000e+00 : f32
    %12 = vector.broadcast %cst_11 : f32 to vector<2x128xf32>
    %13 = arith.addf %12, %11 : vector<2x128xf32>
    %14 = arith.divf %12, %13 : vector<2x128xf32>
    %15 = vector.extract_strided_slice %6 {offsets = [0, 128], sizes = [2, 128], strides = [1, 1]} : vector<2x384xf32> to vector<2x128xf32>
    %16 = vector.broadcast %2 : vector<1x128xf32> to vector<2x128xf32>
    %17 = arith.addf %15, %16 : vector<2x128xf32>
    %18 = arith.negf %17 : vector<2x128xf32>
    %19 = math.exp %18 : vector<2x128xf32>
    %cst_12 = arith.constant 1.000000e+00 : f32
    %20 = vector.broadcast %cst_12 : f32 to vector<2x128xf32>
    %21 = arith.addf %20, %19 : vector<2x128xf32>
    %22 = arith.divf %20, %21 : vector<2x128xf32>
    %23 = vector.extract_strided_slice %6 {offsets = [0, 256], sizes = [2, 128], strides = [1, 1]} : vector<2x384xf32> to vector<2x128xf32>
    %24 = vector.broadcast %4 : vector<1x128xf32> to vector<2x128xf32>
    %25 = arith.addf %23, %24 : vector<2x128xf32>
    %26 = arith.mulf %14, %25 : vector<2x128xf32>
    %27 = vector.broadcast %3 : vector<1x128xf32> to vector<2x128xf32>
    %28 = arith.addf %27, %26 : vector<2x128xf32>
    %29 = math.tanh %28 : vector<2x128xf32>
    %cst_13 = arith.constant 1.000000e+00 : f32
    %30 = vector.broadcast %cst_13 : f32 to vector<2x128xf32>
    %31 = arith.subf %30, %22 : vector<2x128xf32>
    %32 = arith.mulf %31, %29 : vector<2x128xf32>
    %33 = arith.mulf %22, %5 : vector<2x128xf32>
    %34 = arith.addf %32, %33 : vector<2x128xf32>
    %cst_14 = arith.constant dense<0.000000e+00> : vector<2x384xf32>
    %35 = tpu.matmul %34, %0, %cst_14 {dimension_numbers = #tpu.dot_dimension_numbers<[1], [0], [0], [1], [0, 0, 1, 1], [], []>} : vector<2x128xf32>, vector<128x384xf32>, vector<2x384xf32> -> vector<2x384xf32>
    %36 = vector.extract_strided_slice %35 {offsets = [0, 0], sizes = [2, 128], strides = [1, 1]} : vector<2x384xf32> to vector<2x128xf32>
    %37 = vector.broadcast %1 : vector<1x128xf32> to vector<2x128xf32>
    %38 = arith.addf %36, %37 : vector<2x128xf32>
    %39 = arith.negf %38 : vector<2x128xf32>
    %40 = math.exp %39 : vector<2x128xf32>
    %cst_15 = arith.constant 1.000000e+00 : f32
    %41 = vector.broadcast %cst_15 : f32 to vector<2x128xf32>
    %42 = arith.addf %41, %40 : vector<2x128xf32>
    %43 = arith.divf %41, %42 : vector<2x128xf32>
    %44 = vector.extract_strided_slice %35 {offsets = [0, 128], sizes = [2, 128], strides = [1, 1]} : vector<2x384xf32> to vector<2x128xf32>
    %45 = vector.broadcast %2 : vector<1x128xf32> to vector<2x128xf32>
    %46 = arith.addf %44, %45 : vector<2x128xf32>
    %47 = arith.negf %46 : vector<2x128xf32>
    %48 = math.exp %47 : vector<2x128xf32>
    %cst_16 = arith.constant 1.000000e+00 : f32
    %49 = vector.broadcast %cst_16 : f32 to vector<2x128xf32>
    %50 = arith.addf %49, %48 : vector<2x128xf32>
    %51 = arith.divf %49, %50 : vector<2x128xf32>
    %52 = vector.extract_strided_slice %35 {offsets = [0, 256], sizes = [2, 128], strides = [1, 1]} : vector<2x384xf32> to vector<2x128xf32>
    %53 = vector.broadcast %4 : vector<1x128xf32> to vector<2x128xf32>
    %54 = arith.addf %52, %53 : vector<2x128xf32>
    %55 = arith.mulf %43, %54 : vector<2x128xf32>
    %56 = vector.broadcast %3 : vector<1x128xf32> to vector<2x128xf32>
    %57 = arith.addf %56, %55 : vector<2x128xf32>
    %58 = math.tanh %57 : vector<2x128xf32>
    %cst_17 = arith.constant 1.000000e+00 : f32
    %59 = vector.broadcast %cst_17 : f32 to vector<2x128xf32>
    %60 = arith.subf %59, %51 : vector<2x128xf32>
    %61 = arith.mulf %60, %58 : vector<2x128xf32>
    %62 = arith.mulf %51, %34 : vector<2x128xf32>
    %63 = arith.addf %61, %62 : vector<2x128xf32>
    %cst_18 = arith.constant dense<0.000000e+00> : vector<2x384xf32>
    %64 = tpu.matmul %63, %0, %cst_18 {dimension_numbers = #tpu.dot_dimension_numbers<[1], [0], [0], [1], [0, 0, 1, 1], [], []>} : vector<2x128xf32>, vector<128x384xf32>, vector<2x384xf32> -> vector<2x384xf32>
    %65 = vector.extract_strided_slice %64 {offsets = [0, 0], sizes = [2, 128], strides = [1, 1]} : vector<2x384xf32> to vector<2x128xf32>
    %66 = vector.broadcast %1 : vector<1x128xf32> to vector<2x128xf32>
    %67 = arith.addf %65, %66 : vector<2x128xf32>
    %68 = arith.negf %67 : vector<2x128xf32>
    %69 = math.exp %68 : vector<2x128xf32>
    %cst_19 = arith.constant 1.000000e+00 : f32
    %70 = vector.broadcast %cst_19 : f32 to vector<2x128xf32>
    %71 = arith.addf %70, %69 : vector<2x128xf32>
    %72 = arith.divf %70, %71 : vector<2x128xf32>
    %73 = vector.extract_strided_slice %64 {offsets = [0, 128], sizes = [2, 128], strides = [1, 1]} : vector<2x384xf32> to vector<2x128xf32>
    %74 = vector.broadcast %2 : vector<1x128xf32> to vector<2x128xf32>
    %75 = arith.addf %73, %74 : vector<2x128xf32>
    %76 = arith.negf %75 : vector<2x128xf32>
    %77 = math.exp %76 : vector<2x128xf32>
    %cst_20 = arith.constant 1.000000e+00 : f32
    %78 = vector.broadcast %cst_20 : f32 to vector<2x128xf32>
    %79 = arith.addf %78, %77 : vector<2x128xf32>
    %80 = arith.divf %78, %79 : vector<2x128xf32>
    %81 = vector.extract_strided_slice %64 {offsets = [0, 256], sizes = [2, 128], strides = [1, 1]} : vector<2x384xf32> to vector<2x128xf32>
    %82 = vector.broadcast %4 : vector<1x128xf32> to vector<2x128xf32>
    %83 = arith.addf %81, %82 : vector<2x128xf32>
    %84 = arith.mulf %72, %83 : vector<2x128xf32>
    %85 = vector.broadcast %3 : vector<1x128xf32> to vector<2x128xf32>
    %86 = arith.addf %85, %84 : vector<2x128xf32>
    %87 = math.tanh %86 : vector<2x128xf32>
    %cst_21 = arith.constant 1.000000e+00 : f32
    %88 = vector.broadcast %cst_21 : f32 to vector<2x128xf32>
    %89 = arith.subf %88, %80 : vector<2x128xf32>
    %90 = arith.mulf %89, %87 : vector<2x128xf32>
    %91 = arith.mulf %80, %63 : vector<2x128xf32>
    %92 = arith.addf %90, %91 : vector<2x128xf32>
    %cst_22 = arith.constant dense<0.000000e+00> : vector<2x384xf32>
    %93 = tpu.matmul %92, %0, %cst_22 {dimension_numbers = #tpu.dot_dimension_numbers<[1], [0], [0], [1], [0, 0, 1, 1], [], []>} : vector<2x128xf32>, vector<128x384xf32>, vector<2x384xf32> -> vector<2x384xf32>
    %94 = vector.extract_strided_slice %93 {offsets = [0, 0], sizes = [2, 128], strides = [1, 1]} : vector<2x384xf32> to vector<2x128xf32>
    %95 = vector.broadcast %1 : vector<1x128xf32> to vector<2x128xf32>
    %96 = arith.addf %94, %95 : vector<2x128xf32>
    %97 = arith.negf %96 : vector<2x128xf32>
    %98 = math.exp %97 : vector<2x128xf32>
    %cst_23 = arith.constant 1.000000e+00 : f32
    %99 = vector.broadcast %cst_23 : f32 to vector<2x128xf32>
    %100 = arith.addf %99, %98 : vector<2x128xf32>
    %101 = arith.divf %99, %100 : vector<2x128xf32>
    %102 = vector.extract_strided_slice %93 {offsets = [0, 128], sizes = [2, 128], strides = [1, 1]} : vector<2x384xf32> to vector<2x128xf32>
    %103 = vector.broadcast %2 : vector<1x128xf32> to vector<2x128xf32>
    %104 = arith.addf %102, %103 : vector<2x128xf32>
    %105 = arith.negf %104 : vector<2x128xf32>
    %106 = math.exp %105 : vector<2x128xf32>
    %cst_24 = arith.constant 1.000000e+00 : f32
    %107 = vector.broadcast %cst_24 : f32 to vector<2x128xf32>
    %108 = arith.addf %107, %106 : vector<2x128xf32>
    %109 = arith.divf %107, %108 : vector<2x128xf32>
    %110 = vector.extract_strided_slice %93 {offsets = [0, 256], sizes = [2, 128], strides = [1, 1]} : vector<2x384xf32> to vector<2x128xf32>
    %111 = vector.broadcast %4 : vector<1x128xf32> to vector<2x128xf32>
    %112 = arith.addf %110, %111 : vector<2x128xf32>
    %113 = arith.mulf %101, %112 : vector<2x128xf32>
    %114 = vector.broadcast %3 : vector<1x128xf32> to vector<2x128xf32>
    %115 = arith.addf %114, %113 : vector<2x128xf32>
    %116 = math.tanh %115 : vector<2x128xf32>
    %cst_25 = arith.constant 1.000000e+00 : f32
    %117 = vector.broadcast %cst_25 : f32 to vector<2x128xf32>
    %118 = arith.subf %117, %109 : vector<2x128xf32>
    %119 = arith.mulf %118, %116 : vector<2x128xf32>
    %120 = arith.mulf %109, %92 : vector<2x128xf32>
    %121 = arith.addf %119, %120 : vector<2x128xf32>
    %cst_26 = arith.constant dense<0.000000e+00> : vector<2x384xf32>
    %122 = tpu.matmul %121, %0, %cst_26 {dimension_numbers = #tpu.dot_dimension_numbers<[1], [0], [0], [1], [0, 0, 1, 1], [], []>} : vector<2x128xf32>, vector<128x384xf32>, vector<2x384xf32> -> vector<2x384xf32>
    %123 = vector.extract_strided_slice %122 {offsets = [0, 0], sizes = [2, 128], strides = [1, 1]} : vector<2x384xf32> to vector<2x128xf32>
    %124 = vector.broadcast %1 : vector<1x128xf32> to vector<2x128xf32>
    %125 = arith.addf %123, %124 : vector<2x128xf32>
    %126 = arith.negf %125 : vector<2x128xf32>
    %127 = math.exp %126 : vector<2x128xf32>
    %cst_27 = arith.constant 1.000000e+00 : f32
    %128 = vector.broadcast %cst_27 : f32 to vector<2x128xf32>
    %129 = arith.addf %128, %127 : vector<2x128xf32>
    %130 = arith.divf %128, %129 : vector<2x128xf32>
    %131 = vector.extract_strided_slice %122 {offsets = [0, 128], sizes = [2, 128], strides = [1, 1]} : vector<2x384xf32> to vector<2x128xf32>
    %132 = vector.broadcast %2 : vector<1x128xf32> to vector<2x128xf32>
    %133 = arith.addf %131, %132 : vector<2x128xf32>
    %134 = arith.negf %133 : vector<2x128xf32>
    %135 = math.exp %134 : vector<2x128xf32>
    %cst_28 = arith.constant 1.000000e+00 : f32
    %136 = vector.broadcast %cst_28 : f32 to vector<2x128xf32>
    %137 = arith.addf %136, %135 : vector<2x128xf32>
    %138 = arith.divf %136, %137 : vector<2x128xf32>
    %139 = vector.extract_strided_slice %122 {offsets = [0, 256], sizes = [2, 128], strides = [1, 1]} : vector<2x384xf32> to vector<2x128xf32>
    %140 = vector.broadcast %4 : vector<1x128xf32> to vector<2x128xf32>
    %141 = arith.addf %139, %140 : vector<2x128xf32>
    %142 = arith.mulf %130, %141 : vector<2x128xf32>
    %143 = vector.broadcast %3 : vector<1x128xf32> to vector<2x128xf32>
    %144 = arith.addf %143, %142 : vector<2x128xf32>
    %145 = math.tanh %144 : vector<2x128xf32>
    %cst_29 = arith.constant 1.000000e+00 : f32
    %146 = vector.broadcast %cst_29 : f32 to vector<2x128xf32>
    %147 = arith.subf %146, %138 : vector<2x128xf32>
    %148 = arith.mulf %147, %145 : vector<2x128xf32>
    %149 = arith.mulf %138, %121 : vector<2x128xf32>
    %150 = arith.addf %148, %149 : vector<2x128xf32>
    %cst_30 = arith.constant dense<0.000000e+00> : vector<2x384xf32>
    %151 = tpu.matmul %150, %0, %cst_30 {dimension_numbers = #tpu.dot_dimension_numbers<[1], [0], [0], [1], [0, 0, 1, 1], [], []>} : vector<2x128xf32>, vector<128x384xf32>, vector<2x384xf32> -> vector<2x384xf32>
    %152 = vector.extract_strided_slice %151 {offsets = [0, 0], sizes = [2, 128], strides = [1, 1]} : vector<2x384xf32> to vector<2x128xf32>
    %153 = vector.broadcast %1 : vector<1x128xf32> to vector<2x128xf32>
    %154 = arith.addf %152, %153 : vector<2x128xf32>
    %155 = arith.negf %154 : vector<2x128xf32>
    %156 = math.exp %155 : vector<2x128xf32>
    %cst_31 = arith.constant 1.000000e+00 : f32
    %157 = vector.broadcast %cst_31 : f32 to vector<2x128xf32>
    %158 = arith.addf %157, %156 : vector<2x128xf32>
    %159 = arith.divf %157, %158 : vector<2x128xf32>
    %160 = vector.extract_strided_slice %151 {offsets = [0, 128], sizes = [2, 128], strides = [1, 1]} : vector<2x384xf32> to vector<2x128xf32>
    %161 = vector.broadcast %2 : vector<1x128xf32> to vector<2x128xf32>
    %162 = arith.addf %160, %161 : vector<2x128xf32>
    %163 = arith.negf %162 : vector<2x128xf32>
    %164 = math.exp %163 : vector<2x128xf32>
    %cst_32 = arith.constant 1.000000e+00 : f32
    %165 = vector.broadcast %cst_32 : f32 to vector<2x128xf32>
    %166 = arith.addf %165, %164 : vector<2x128xf32>
    %167 = arith.divf %165, %166 : vector<2x128xf32>
    %168 = vector.extract_strided_slice %151 {offsets = [0, 256], sizes = [2, 128], strides = [1, 1]} : vector<2x384xf32> to vector<2x128xf32>
    %169 = vector.broadcast %4 : vector<1x128xf32> to vector<2x128xf32>
    %170 = arith.addf %168, %169 : vector<2x128xf32>
    %171 = arith.mulf %159, %170 : vector<2x128xf32>
    %172 = vector.broadcast %3 : vector<1x128xf32> to vector<2x128xf32>
    %173 = arith.addf %172, %171 : vector<2x128xf32>
    %174 = math.tanh %173 : vector<2x128xf32>
    %cst_33 = arith.constant 1.000000e+00 : f32
    %175 = vector.broadcast %cst_33 : f32 to vector<2x128xf32>
    %176 = arith.subf %175, %167 : vector<2x128xf32>
    %177 = arith.mulf %176, %174 : vector<2x128xf32>
    %178 = arith.mulf %167, %150 : vector<2x128xf32>
    %179 = arith.addf %177, %178 : vector<2x128xf32>
    %cst_34 = arith.constant dense<0.000000e+00> : vector<2x384xf32>
    %180 = tpu.matmul %179, %0, %cst_34 {dimension_numbers = #tpu.dot_dimension_numbers<[1], [0], [0], [1], [0, 0, 1, 1], [], []>} : vector<2x128xf32>, vector<128x384xf32>, vector<2x384xf32> -> vector<2x384xf32>
    %181 = vector.extract_strided_slice %180 {offsets = [0, 0], sizes = [2, 128], strides = [1, 1]} : vector<2x384xf32> to vector<2x128xf32>
    %182 = vector.broadcast %1 : vector<1x128xf32> to vector<2x128xf32>
    %183 = arith.addf %181, %182 : vector<2x128xf32>
    %184 = arith.negf %183 : vector<2x128xf32>
    %185 = math.exp %184 : vector<2x128xf32>
    %cst_35 = arith.constant 1.000000e+00 : f32
    %186 = vector.broadcast %cst_35 : f32 to vector<2x128xf32>
    %187 = arith.addf %186, %185 : vector<2x128xf32>
    %188 = arith.divf %186, %187 : vector<2x128xf32>
    %189 = vector.extract_strided_slice %180 {offsets = [0, 128], sizes = [2, 128], strides = [1, 1]} : vector<2x384xf32> to vector<2x128xf32>
    %190 = vector.broadcast %2 : vector<1x128xf32> to vector<2x128xf32>
    %191 = arith.addf %189, %190 : vector<2x128xf32>
    %192 = arith.negf %191 : vector<2x128xf32>
    %193 = math.exp %192 : vector<2x128xf32>
    %cst_36 = arith.constant 1.000000e+00 : f32
    %194 = vector.broadcast %cst_36 : f32 to vector<2x128xf32>
    %195 = arith.addf %194, %193 : vector<2x128xf32>
    %196 = arith.divf %194, %195 : vector<2x128xf32>
    %197 = vector.extract_strided_slice %180 {offsets = [0, 256], sizes = [2, 128], strides = [1, 1]} : vector<2x384xf32> to vector<2x128xf32>
    %198 = vector.broadcast %4 : vector<1x128xf32> to vector<2x128xf32>
    %199 = arith.addf %197, %198 : vector<2x128xf32>
    %200 = arith.mulf %188, %199 : vector<2x128xf32>
    %201 = vector.broadcast %3 : vector<1x128xf32> to vector<2x128xf32>
    %202 = arith.addf %201, %200 : vector<2x128xf32>
    %203 = math.tanh %202 : vector<2x128xf32>
    %cst_37 = arith.constant 1.000000e+00 : f32
    %204 = vector.broadcast %cst_37 : f32 to vector<2x128xf32>
    %205 = arith.subf %204, %196 : vector<2x128xf32>
    %206 = arith.mulf %205, %203 : vector<2x128xf32>
    %207 = arith.mulf %196, %179 : vector<2x128xf32>
    %208 = arith.addf %206, %207 : vector<2x128xf32>
    %cst_38 = arith.constant dense<0.000000e+00> : vector<2x384xf32>
    %209 = tpu.matmul %208, %0, %cst_38 {dimension_numbers = #tpu.dot_dimension_numbers<[1], [0], [0], [1], [0, 0, 1, 1], [], []>} : vector<2x128xf32>, vector<128x384xf32>, vector<2x384xf32> -> vector<2x384xf32>
    %210 = vector.extract_strided_slice %209 {offsets = [0, 0], sizes = [2, 128], strides = [1, 1]} : vector<2x384xf32> to vector<2x128xf32>
    %211 = vector.broadcast %1 : vector<1x128xf32> to vector<2x128xf32>
    %212 = arith.addf %210, %211 : vector<2x128xf32>
    %213 = arith.negf %212 : vector<2x128xf32>
    %214 = math.exp %213 : vector<2x128xf32>
    %cst_39 = arith.constant 1.000000e+00 : f32
    %215 = vector.broadcast %cst_39 : f32 to vector<2x128xf32>
    %216 = arith.addf %215, %214 : vector<2x128xf32>
    %217 = arith.divf %215, %216 : vector<2x128xf32>
    %218 = vector.extract_strided_slice %209 {offsets = [0, 128], sizes = [2, 128], strides = [1, 1]} : vector<2x384xf32> to vector<2x128xf32>
    %219 = vector.broadcast %2 : vector<1x128xf32> to vector<2x128xf32>
    %220 = arith.addf %218, %219 : vector<2x128xf32>
    %221 = arith.negf %220 : vector<2x128xf32>
    %222 = math.exp %221 : vector<2x128xf32>
    %cst_40 = arith.constant 1.000000e+00 : f32
    %223 = vector.broadcast %cst_40 : f32 to vector<2x128xf32>
    %224 = arith.addf %223, %222 : vector<2x128xf32>
    %225 = arith.divf %223, %224 : vector<2x128xf32>
    %226 = vector.extract_strided_slice %209 {offsets = [0, 256], sizes = [2, 128], strides = [1, 1]} : vector<2x384xf32> to vector<2x128xf32>
    %227 = vector.broadcast %4 : vector<1x128xf32> to vector<2x128xf32>
    %228 = arith.addf %226, %227 : vector<2x128xf32>
    %229 = arith.mulf %217, %228 : vector<2x128xf32>
    %230 = vector.broadcast %3 : vector<1x128xf32> to vector<2x128xf32>
    %231 = arith.addf %230, %229 : vector<2x128xf32>
    %232 = math.tanh %231 : vector<2x128xf32>
    %cst_41 = arith.constant 1.000000e+00 : f32
    %233 = vector.broadcast %cst_41 : f32 to vector<2x128xf32>
    %234 = arith.subf %233, %225 : vector<2x128xf32>
    %235 = arith.mulf %234, %232 : vector<2x128xf32>
    %236 = arith.mulf %225, %208 : vector<2x128xf32>
    %237 = arith.addf %235, %236 : vector<2x128xf32>
    %238 = tpu.concatenate %34, %63, %92, %121, %150, %179, %208, %237 in 1 : vector<2x128xf32>, vector<2x128xf32>, vector<2x128xf32>, vector<2x128xf32>, vector<2x128xf32>, vector<2x128xf32>, vector<2x128xf32>, vector<2x128xf32> -> vector<2x1024xf32>
    %c0_42 = arith.constant 0 : index
    %c0_43 = arith.constant 0 : index
    %239 = vector.load %arg6[%c0_42, %c0_43] : memref<1024x512xf32, #tpu.memory_space<vmem>>, vector<1024x512xf32>
    %cst_44 = arith.constant dense<0.000000e+00> : vector<2x512xf32>
    %240 = tpu.matmul %238, %239, %cst_44 {dimension_numbers = #tpu.dot_dimension_numbers<[1], [0], [0], [1], [0, 0, 1, 1], [], []>} : vector<2x1024xf32>, vector<1024x512xf32>, vector<2x512xf32> -> vector<2x512xf32>
    %c0_45 = arith.constant 0 : index
    %c0_46 = arith.constant 0 : index
    %241 = vector.load %arg7[%c0_45, %c0_46] : memref<1x512xf32, #tpu.memory_space<vmem>>, vector<1x512xf32>
    %242 = vector.broadcast %241 : vector<1x512xf32> to vector<2x512xf32>
    %243 = arith.addf %240, %242 : vector<2x512xf32>
    %c0_47 = arith.constant 0 : index
    %c0_48 = arith.constant 0 : index
    %244 = vector.load %arg8[%c0_47, %c0_48] : memref<2x512xf32, #tpu.memory_space<vmem>>, vector<2x512xf32>
    tpu.vector_store %arg8[%c0_47, %c0_48], %243 {strides = array<i32>} : memref<2x512xf32, #tpu.memory_space<vmem>>, vector<2x512xf32>,
    return
  }
}

</mosaic_0001>

<bundles_post_ra>
// kernel: tpu_custom_call.1
= control target key start
LH: loop header
LB: loop body
LE: loop exit
PB: predicated region body
PF: predicated region fallthrough
CT: control target
= control target key end

     0   :  { %13 = vsyncpa [#allocation3], 0  ;;  %s4966_s0 = inlined_call_operand.hbm [shape: f32[2,128], index: 0, kind: input, shape index: {}]   ;;  %s4967_s1 = inlined_call_operand.hbm [shape: f32[128,384], index: 1, kind: input, shape index: {}]   ;;  %s4968_s2 = inlined_call_operand.hbm [shape: f32[1,128], index: 2, kind: input, shape index: {}]   ;;  %s4969_s3 = inlined_call_operand.hbm [shape: f32[1,128], index: 3, kind: input, shape index: {}]   ;;  %s4970_s4 = inlined_call_operand.hbm [shape: f32[1,128], index: 4, kind: input, shape index: {}]   ;;  %s4971_s5 = inlined_call_operand.hbm [shape: f32[1,128], index: 5, kind: input, shape index: {}]   ;;  %s4972_s6 = inlined_call_operand.hbm [shape: f32[1024,512], index: 6, kind: input, shape index: {}]   ;;  %s4973_s7 = inlined_call_operand.hbm [shape: f32[1,512], index: 7, kind: input, shape index: {}]   ;;  %s4974_s8 = inlined_call_operand.hbm [shape: f32[2,512], index: 8, kind: output, shape index: {}]  }
   0x1   :  { %14 = vsyncpa [#allocation6], 0 }
   0x2   :  { %15 = vsyncpa [#allocation9], 0 }
   0x3   :  { %16 = vsyncpa [#allocation12], 0 }
   0x4   :  { %17 = vsyncpa [#allocation15], 0 }
   0x5   :  { %18 = vsyncpa [#allocation4], 0  ;;  %s4375_s27 = smov [#allocation5]   ;;  %s4165_s9 = scalar_lea.hbm %s4967_s1, 6144 }
   0x6   :  { %s34_s28 = sshll.u32 %s4375_s27, 4  ;;  %p4166_p0 = scmp.ne.s32.totalorder %s4967_s1, %s4165_s9  ;;  %s35_s28 = int_to_ptr.vmem [resolvable:$true] %s34_s28 }
   0x7   :  { %p4169_p1 = scmp.lt.u32.totalorder %s4165_s9, %s4967_s1 }
   0x9   :  { %p4171_p2 = pnand %p4169_p1, %p4166_p0 }
   0xb   :  { %4174 = shalt.err (!%p4171_p2)
}
   0xc   :  { %s4175_s14 = scalar_lea.vmem %s35_s28, 6144  ;;  %p4180_p4 = scmp.lt.s32.totalorder %s35_s28, %s35_s28 }
   0xd   :  { %p4176_p3 = scmp.ne.s32.totalorder %s35_s28, %s4175_s14  ;;  %p4181_p5 = scmp.lt.s32.totalorder %s4175_s14, %s4175_s14 }
   0xf   :  { %p4182_p6 = por %p4181_p5, %p4180_p4 }
  0x11   :  { %p4183_p7 = pnand %p4182_p6, %p4176_p3 }
  0x13   :  { %4186 = shalt.err (!%p4183_p7)
}
  0x14   :  { %s4376_s15 = smov 384   ;;  %s4377_s16 = smov 24  }
  0x15   :  { %40 = dma.hbm_to_vmem [thread:$0]  %s4967_s1, 6144, %s35_s28, [#allocation6], %s4376_s15, %s4376_s15, %s4377_s16  }
  0x16   :  { %s4378_s19 = smov [#allocation8]   ;;  %s4379_s21 = smov [#allocation11]  }
  0x17   :  { %s57_s20 = sshll.u32 %s4378_s19, 4  ;;  %s77_s22 = sshll.u32 %s4379_s21, 4  ;;  %s58_s20 = int_to_ptr.vmem [resolvable:$true] %s57_s20  ;;  %s78_s22 = int_to_ptr.vmem [resolvable:$true] %s77_s22 }
  0x18   :  { %s4187_s25 = scalar_lea.hbm %s4969_s3, 16 }
  0x19   :  { %p4188_p8 = scmp.ne.s32.totalorder %s4969_s3, %s4187_s25  ;;  %p4191_p9 = scmp.lt.u32.totalorder %s4187_s25, %s4969_s3 }
  0x1b   :  { %p4193_p10 = pnand %p4191_p9, %p4188_p8 }
  0x1d   :  { %4196 = shalt.err (!%p4193_p10)
}
  0x1e   :  { %s4197_s1 = scalar_lea.vmem %s58_s20, 16  ;;  %s4201_s28 = scalar_lea.vmem %s58_s20, 32 }
  0x1f   :  { %p4198_p11 = scmp.ne.s32.totalorder %s58_s20, %s4197_s1  ;;  %p4202_p12 = scmp.lt.s32.totalorder %s58_s20, %s58_s20 }
  0x20   :  { %p4203_p13 = scmp.lt.s32.totalorder %s4201_s28, %s4197_s1 }
  0x22   :  { %p4204_p0 = por %p4203_p13, %p4202_p12 }
  0x24   :  { %p4205_p1 = pnand %p4204_p0, %p4198_p11 }
  0x26   :  { %4208 = shalt.err (!%p4205_p1)
}
  0x27   :  { %60 = dma.hbm_to_vmem [thread:$0]  %s4969_s3, 16, %s58_s20, [#allocation9]  }
  0x28   :  { %s4209_s13 = scalar_lea.hbm %s4971_s5, 16 }
  0x29   :  { %p4210_p2 = scmp.ne.s32.totalorder %s4971_s5, %s4209_s13  ;;  %p4213_p3 = scmp.lt.u32.totalorder %s4209_s13, %s4971_s5 }
  0x2b   :  { %p4215_p4 = pnand %p4213_p3, %p4210_p2 }
  0x2d   :  { %4218 = shalt.err (!%p4215_p4)
}
  0x2e   :  { %s4219_s18 = scalar_lea.vmem %s78_s22, 16  ;;  %s4223_s19 = scalar_lea.vmem %s78_s22, 32 }
  0x2f   :  { %p4220_p5 = scmp.ne.s32.totalorder %s78_s22, %s4219_s18  ;;  %p4224_p6 = scmp.lt.s32.totalorder %s78_s22, %s78_s22 }
  0x30   :  { %p4225_p7 = scmp.lt.s32.totalorder %s4223_s19, %s4219_s18 }
  0x32   :  { %p4226_p8 = por %p4225_p7, %p4224_p6 }
  0x34   :  { %p4227_p9 = pnand %p4226_p8, %p4220_p5 }
  0x36   :  { %4230 = shalt.err (!%p4227_p9)
}
  0x37   :  { %80 = dma.hbm_to_vmem [thread:$0]  %s4971_s5, 16, %s78_s22, [#allocation12]  }
  0x38   :  { %s4380_s21 = smov [#allocation2]   ;;  %s4381_s24 = smov [#allocation7]  }
  0x39   :  { %s25_s23 = sshll.u32 %s4380_s21, 4  ;;  %s47_s25 = sshll.u32 %s4381_s24, 4  ;;  %s26_s23 = int_to_ptr.vmem [resolvable:$true] %s25_s23  ;;  %s48_s25 = int_to_ptr.vmem [resolvable:$true] %s47_s25 }
  0x3a   :  { %s4231_s29 = scalar_lea.hbm %s4966_s0, 32 }
  0x3b   :  { %p4232_p10 = scmp.ne.s32.totalorder %s4966_s0, %s4231_s29  ;;  %p4235_p11 = scmp.lt.u32.totalorder %s4231_s29, %s4966_s0 }
  0x3d   :  { %p4237_p12 = pnand %p4235_p11, %p4232_p10 }
  0x3f   :  { %4240 = shalt.err (!%p4237_p12)
}
  0x40   :  { %s4241_s5 = scalar_lea.vmem %s26_s23, 32  ;;  %p4246_p0 = scmp.lt.s32.totalorder %s26_s23, %s26_s23 }
  0x41   :  { %p4242_p13 = scmp.ne.s32.totalorder %s26_s23, %s4241_s5  ;;  %p4247_p1 = scmp.lt.s32.totalorder %s4241_s5, %s4241_s5 }
  0x43   :  { %p4248_p2 = por %p4247_p1, %p4246_p0 }
  0x45   :  { %p4249_p3 = pnand %p4248_p2, %p4242_p13 }
  0x47   :  { %4252 = shalt.err (!%p4249_p3)
}
  0x48   :  { %28 = dma.hbm_to_vmem [thread:$0]  %s4966_s0, 32, %s26_s23, [#allocation3]  }
  0x49   :  { %s4253_s13 = scalar_lea.hbm %s4968_s2, 16 }
  0x4a   :  { %p4254_p4 = scmp.ne.s32.totalorder %s4968_s2, %s4253_s13  ;;  %p4257_p5 = scmp.lt.u32.totalorder %s4253_s13, %s4968_s2 }
  0x4c   :  { %p4259_p6 = pnand %p4257_p5, %p4254_p4 }
  0x4e   :  { %4262 = shalt.err (!%p4259_p6)
}
  0x4f   :  { %s4263_s18 = scalar_lea.vmem %s48_s25, 16  ;;  %s4267_s19 = scalar_lea.vmem %s48_s25, 32 }
  0x50   :  { %p4264_p7 = scmp.ne.s32.totalorder %s48_s25, %s4263_s18  ;;  %p4268_p8 = scmp.lt.s32.totalorder %s48_s25, %s48_s25 }
  0x51   :  { %p4269_p9 = scmp.lt.s32.totalorder %s4267_s19, %s4263_s18 }
  0x53   :  { %p4270_p10 = por %p4269_p9, %p4268_p8 }
  0x55   :  { %p4271_p11 = pnand %p4270_p10, %p4264_p7 }
  0x57   :  { %4274 = shalt.err (!%p4271_p11)
}
  0x58   :  { %50 = dma.hbm_to_vmem [thread:$0]  %s4968_s2, 16, %s48_s25, [#allocation6]  }
  0x59   :  { %s4382_s20 = smov [#allocation10]   ;;  %s4383_s23 = smov [#allocation13]  }
  0x5a   :  { %s67_s21 = sshll.u32 %s4382_s20, 4  ;;  %s86_s24 = sshll.u32 %s4383_s23, 4  ;;  %s68_s21 = int_to_ptr.vmem [resolvable:$true] %s67_s21  ;;  %s87_s24 = int_to_ptr.vmem [resolvable:$true] %s86_s24 }
  0x5b   :  { %s4275_s29 = scalar_lea.hbm %s4970_s4, 16 }
  0x5c   :  { %p4276_p12 = scmp.ne.s32.totalorder %s4970_s4, %s4275_s29  ;;  %p4279_p13 = scmp.lt.u32.totalorder %s4275_s29, %s4970_s4 }
  0x5e   :  { %p4281_p0 = pnand %p4279_p13, %p4276_p12 }
  0x60   :  { %4284 = shalt.err (!%p4281_p0)
}
  0x61   :  { %s4285_s2 = scalar_lea.vmem %s68_s21, 16  ;;  %s4289_s25 = scalar_lea.vmem %s68_s21, 32 }
  0x62   :  { %p4286_p1 = scmp.ne.s32.totalorder %s68_s21, %s4285_s2  ;;  %p4290_p2 = scmp.lt.s32.totalorder %s68_s21, %s68_s21 }
  0x63   :  { %p4291_p3 = scmp.lt.s32.totalorder %s4289_s25, %s4285_s2 }
  0x65   :  { %p4292_p4 = por %p4291_p3, %p4290_p2 }
  0x67   :  { %p4293_p5 = pnand %p4292_p4, %p4286_p1 }
  0x69   :  { %4296 = shalt.err (!%p4293_p5)
}
  0x6a   :  { %70 = dma.hbm_to_vmem [thread:$0]  %s4970_s4, 16, %s68_s21, [#allocation9]  }
  0x6b   :  { %s4297_s12 = scalar_lea.hbm %s4972_s6, 65536 }
  0x6c   :  { %p4298_p6 = scmp.ne.s32.totalorder %s4972_s6, %s4297_s12  ;;  %p4301_p7 = scmp.lt.u32.totalorder %s4297_s12, %s4972_s6 }
  0x6e   :  { %p4303_p8 = pnand %p4301_p7, %p4298_p6 }
  0x70   :  { %4306 = shalt.err (!%p4303_p8)
}
  0x71   :  { %s4307_s17 = scalar_lea.vmem %s87_s24, 65536  ;;  %p4312_p10 = scmp.lt.s32.totalorder %s87_s24, %s87_s24 }
  0x72   :  { %p4308_p9 = scmp.ne.s32.totalorder %s87_s24, %s4307_s17  ;;  %p4313_p11 = scmp.lt.s32.totalorder %s4307_s17, %s4307_s17 }
  0x74   :  { %p4314_p12 = por %p4313_p11, %p4312_p10 }
  0x76   :  { %p4315_p13 = pnand %p4314_p12, %p4308_p9 }
  0x78   :  { %4318 = shalt.err (!%p4315_p13)
}
  0x79   :  { %s4384_s4 = smov 512   ;;  %s4385_s18 = smov 32  }
  0x7a   :  { %92 = dma.hbm_to_vmem [thread:$0]  %s4972_s6, 65536, %s87_s24, [#allocation12], %s4384_s4, %s4384_s4, %s4385_s18  }
  0x7b   :  { %s4386_s3 = smov [#allocation14]   ;;  %s4319_s26 = scalar_lea.hbm %s4973_s7, 64 }
  0x7c   :  { %s99_s20 = sshll.u32 %s4386_s3, 4  ;;  %p4320_p0 = scmp.ne.s32.totalorder %s4973_s7, %s4319_s26  ;;  %s100_s20 = int_to_ptr.vmem [resolvable:$true] %s99_s20 }
  0x7d   :  { %p4323_p1 = scmp.lt.u32.totalorder %s4319_s26, %s4973_s7 }
  0x7f   :  { %p4325_p2 = pnand %p4323_p1, %p4320_p0 }
  0x81   :  { %4328 = shalt.err (!%p4325_p2)
}
  0x82   :  { %s4329_s28 = scalar_lea.vmem %s100_s20, 64  ;;  %p4334_p4 = scmp.lt.s32.totalorder %s100_s20, %s100_s20 }
  0x83   :  { %p4330_p3 = scmp.ne.s32.totalorder %s100_s20, %s4329_s28  ;;  %p4335_p5 = scmp.lt.s32.totalorder %s4329_s28, %s4329_s28 }
  0x85   :  { %p4336_p6 = por %p4335_p5, %p4334_p4 }
  0x87   :  { %p4337_p7 = pnand %p4336_p6, %p4330_p3 }
  0x89   :  { %4340 = shalt.err (!%p4337_p7)
}
  0x8a   :  { %102 = dma.hbm_to_vmem [thread:$0]  %s4973_s7, 64, %s100_s20, [#allocation15]  }
  0x8b   :  { %4363 = dma.done.wait [#allocation3], 32  }
  0x8c   :  { %4364 = vsyncadd [#allocation3], 4294967264 }
  0x8d   :  { %4365 = dma.done.wait [#allocation6], 6160  }
  0x8e   :  { %4366 = vsyncadd [#allocation6], 4294961136 }
  0x8f   :  { %4367 = dma.done.wait [#allocation9], 32  }
  0x90   :  { %4368 = vsyncadd [#allocation9], 4294967264 }
  0x91   :  { %4369 = dma.done.wait [#allocation12], 65552  }
  0x92   :  { %4370 = vsyncadd [#allocation12], 4294901744 }
  0x93   :  { %4371 = dma.done.wait [#allocation15], 64  }
  0x94   :  { %4372 = vsyncadd [#allocation15], 4294967232  ;;  %v4387_v0 = vmov 0.0|0.0   ;;  %v4388_v1 = vmov 0.0   ;;  %vm4389_vm0 = vmmov 0   ;;  %v128_v2 = vld [vmem:[#allocation5 + $0x8] sm:$0xff] }
  0x95   :  { %3120 = vmatprep.subr.bf16.mxu1 %v4387_v0  ;;  %244 = vmatprep.mubr.f32.mxu0 %v4388_v1  ;;  %v131_v3 = vld [vmem:[#allocation5 + $0x20] sm:$0xff]  ;;  %v130_v6 = vld [vmem:[#allocation5 + $0x18] sm:$0xff]  ;;  %v137_v8 = vld [vmem:[#allocation5 + $0x50] sm:$0xff]  ;;  %s4391_s7 = smov [#allocation16]  }
  0x96   :  { %2840 = vmatprep.mubr.msk.f32.mxu1 %vm4389_vm0, %v4388_v1  ;;  %v127_v4 = vld [vmem:[#allocation5] sm:$0xff]  ;;  %v4537_v5 = vpack.c.bf16 %v131_v3, %v128_v2  ;;  %v134_v7 = vld [vmem:[#allocation5 + $0x38] sm:$0xff]  ;;  %v133_v11 = vld [vmem:[#allocation5 + $0x30] sm:$0xff]  ;;  %s2639_s9 = sshll.u32 %s4391_s7, 4  ;;  %s2640_s9 = int_to_ptr.vmem [resolvable:$true] %s2639_s9 }
  0x97   :  { %v4539_v9 = vpack.c.bf16 %v130_v6, %v127_v4  ;;  %v4541_v10 = vpack.c.bf16 %v137_v8, %v134_v7  ;;  %v136_v12 = vld [vmem:[#allocation5 + $0x48] sm:$0xff]  ;;  %v143_v14 = vld [vmem:[#allocation5 + $0x80] sm:$0xff]  ;;  %v142_v18 = vld [vmem:[#allocation5 + $0x78] sm:$0xff]  ;;  %s4341_s2 = scalar_lea.vmem %s2640_s9, 128  ;;  %p4346_p9 = scmp.lt.s32.totalorder %s2640_s9, %s2640_s9 }
  0x98   :  { %v140_v13 = vld [vmem:[#allocation5 + $0x68] sm:$0xff]  ;;  %3089 = vmatprep.subr.bf16.mxu0 %v4537_v5  ;;  %v4545_v15 = vpack.c.bf16 %v136_v12, %v133_v11  ;;  %v139_v17 = vld [vmem:[#allocation5 + $0x60] sm:$0xff]  ;;  %v146_v19 = vld [vmem:[#allocation5 + $0x98] sm:$0xff]  ;;  %p4342_p8 = scmp.ne.s32.totalorder %s2640_s9, %s4341_s2  ;;  %p4347_p10 = scmp.lt.s32.totalorder %s4341_s2, %s4341_s2 }
  0x99   :  { %3091 = vmatpush1.bf16.msra.mxu0 %v4539_v9  ;;  %v4548_v16 = vpack.c.bf16 %v143_v14, %v140_v13  ;;  %v149_v20 = vld [vmem:[#allocation5 + $0xb0] sm:$0xff]  ;;  %v4551_v21 = vpack.c.bf16 %v142_v18, %v139_v17  ;;  %v148_v24 = vld [vmem:[#allocation5 + $0xa8] sm:$0xff]  ;;  %v155_v28 = vld [vmem:[#allocation5 + $0xe0] sm:$0xff] }
  0x9a   :  { %3093 = vmatprep.subr.bf16.mxu0 %v4541_v10  ;;  %v145_v22 = vld [vmem:[#allocation5 + $0x90] sm:$0xff]  ;;  %v4554_v23 = vpack.c.bf16 %v149_v20, %v146_v19  ;;  %v132_v26 = vld [vmem:[#allocation5 + $0x28] sm:$0xff]  ;;  %v135_v30 = vld [vmem:[#allocation5 + $0x40] sm:$0xff]  ;;  %p4348_p11 = por %p4347_p10, %p4346_p9 }
  0x9b   :  { %v129_v25 = vld [vmem:[#allocation5 + $0x10] sm:$0xff]  ;;  %v152_v27 = vld [vmem:[#allocation5 + $0xc8] sm:$0xff]  ;;  %v138_v31 = vld [vmem:[#allocation5 + $0x58] sm:$0xff]  ;;  %v4559_v32 = vpack.c.bf16 %v148_v24, %v145_v22 }
  0x9c   :  { %v4556_v29 = vpack.c.bf16 %v132_v26, %v129_v25  ;;  %v151_v33 = vld [vmem:[#allocation5 + $0xc0] sm:$0xff]  ;;  %v4562_v34 = vpack.c.bf16 %v138_v31, %v135_v30  ;;  %v4565_v35 = vpack.c.bf16 %v155_v28, %v152_v27  ;;  %v154_v36 = vld [vmem:[#allocation5 + $0xd8] sm:$0xff]  ;;  %v141_v37 = vld [vmem:[#allocation5 + $0x70] sm:$0xff]  ;;  %p4349_p12 = pnand %p4348_p11, %p4342_p8 }
  0x9d   :  { %3095 = vmatpush1.bf16.msra.mxu0 %v4545_v15  ;;  %v144_v38 = vld [vmem:[#allocation5 + $0x88] sm:$0xff]  ;;  %v158_v39 = vld [vmem:[#allocation5 + $0xf8] sm:$0xff]  ;;  %v161_v40 = vld [vmem:[#allocation5 + $0x110] sm:$0xff]  ;;  %v4569_v41 = vpack.c.bf16 %v154_v36, %v151_v33 }
  0x9e   :  { %3097 = vmatprep.subr.bf16.mxu0 %v4548_v16  ;;  %3122 = vmatpush3.bf16.msra.mxu1 %v4556_v29  ;;  %v157_v42 = vld [vmem:[#allocation5 + $0xf0] sm:$0xff]  ;;  %v4572_v43 = vpack.c.bf16 %v144_v38, %v141_v37  ;;  %v4575_v44 = vpack.c.bf16 %v161_v40, %v158_v39  ;;  %v160_v45 = vld [vmem:[#allocation5 + $0x108] sm:$0xff]  ;;  %v147_v46 = vld [vmem:[#allocation5 + $0xa0] sm:$0xff] }
  0x9f   :  { %3123 = vmatprep.subr.bf16.mxu1 %v4387_v0  ;;  %v150_v47 = vld [vmem:[#allocation5 + $0xb8] sm:$0xff]  ;;  %v164_v48 = vld [vmem:[#allocation5 + $0x128] sm:$0xff]  ;;  %v167_v49 = vld [vmem:[#allocation5 + $0x140] sm:$0xff]  ;;  %v4579_v50 = vpack.c.bf16 %v160_v45, %v157_v42 }
  0xa0   :  { %v163_v51 = vld [vmem:[#allocation5 + $0x120] sm:$0xff]  ;;  %v4582_v52 = vpack.c.bf16 %v150_v47, %v147_v46  ;;  %v4585_v53 = vpack.c.bf16 %v167_v49, %v164_v48  ;;  %v166_v54 = vld [vmem:[#allocation5 + $0x138] sm:$0xff]  ;;  %v153_v55 = vld [vmem:[#allocation5 + $0xd0] sm:$0xff] }
  0xa1   :  { %3099 = vmatpush1.bf16.msra.mxu0 %v4551_v21  ;;  %v156_v56 = vld [vmem:[#allocation5 + $0xe8] sm:$0xff]  ;;  %v170_v57 = vld [vmem:[#allocation5 + $0x158] sm:$0xff]  ;;  %v173_v58 = vld [vmem:[#allocation5 + $0x170] sm:$0xff]  ;;  %v4589_v59 = vpack.c.bf16 %v166_v54, %v163_v51 }
  0xa2   :  { %3101 = vmatprep.subr.bf16.mxu0 %v4554_v23  ;;  %3125 = vmatpush3.bf16.msra.mxu1 %v4562_v34  ;;  %v169_v60 = vld [vmem:[#allocation5 + $0x150] sm:$0xff]  ;;  %v4592_v61 = vpack.c.bf16 %v156_v56, %v153_v55  ;;  %v4595_v62 = vpack.c.bf16 %v173_v58, %v170_v57  ;;  %v172_v63 = vld [vmem:[#allocation5 + $0x168] sm:$0xff]  ;;  %v159_v2 = vld [vmem:[#allocation5 + $0x100] sm:$0xff] }
  0xa3   :  { %3126 = vmatprep.subr.bf16.mxu1 %v4387_v0  ;;  %v162_v3 = vld [vmem:[#allocation5 + $0x118] sm:$0xff]  ;;  %v4599_v4 = vpack.c.bf16 %v172_v63, %v169_v60  ;;  %v165_v7 = vld [vmem:[#allocation5 + $0x130] sm:$0xff]  ;;  %v168_v8 = vld [vmem:[#allocation5 + $0x148] sm:$0xff] }
  0xa4   :  { %v4602_v6 = vpack.c.bf16 %v162_v3, %v159_v2  ;;  %v4607_v11 = vld [vmem:[#allocation2] sm:$0x3]  ;;  %v4610_v12 = vpack.c.bf16 %v168_v8, %v165_v7  ;;  %v171_v13 = vld [vmem:[#allocation5 + $0x160] sm:$0xff] }
  0xa5   :  { %3103 = vmatpush1.bf16.msra.mxu0 %v4559_v32  ;;  %v174_v14 = vld [vmem:[#allocation5 + $0x178] sm:$0xff]  ;;  %v4657_v18 = vld [vmem:[#allocation7] ss:$0 sm:$0xff]  ;;  %v4660_v22 = vld [vmem:[#allocation8] ss:$0 sm:$0xff] }
  0xa6   :  { %3105 = vmatprep.subr.bf16.mxu0 %v4565_v35  ;;  %3128 = vmatpush3.bf16.msra.mxu1 %v4572_v43  ;;  %v4616_v17 = vpack.c.bf16 %v174_v14, %v171_v13  ;;  %v4663_v37 = vld [vmem:[#allocation11] ss:$0 sm:$0xff]  ;;  %v4666_v42 = vld [vmem:[#allocation10] ss:$0 sm:$0xff] }
  0xa7   :  { %3129 = vmatprep.subr.bf16.mxu1 %v4387_v0 }
  0xa9   :  { %3107 = vmatpush1.bf16.msra.mxu0 %v4569_v41 }
  0xaa   :  { %3109 = vmatprep.subr.bf16.mxu0 %v4575_v44  ;;  %3131 = vmatpush3.bf16.msra.mxu1 %v4582_v52 }
  0xab   :  { %3132 = vmatprep.subr.bf16.mxu1 %v4387_v0 }
  0xad   :  { %3111 = vmatpush1.bf16.msra.mxu0 %v4579_v50 }
  0xae   :  { %3113 = vmatprep.subr.bf16.mxu0 %v4585_v53  ;;  %3134 = vmatpush3.bf16.msra.mxu1 %v4592_v61 }
  0xaf   :  { %3135 = vmatprep.subr.bf16.mxu1 %v4387_v0 }
  0xb1   :  { %3115 = vmatpush1.bf16.msra.mxu0 %v4589_v59 }
  0xb2   :  { %3117 = vmatprep.subr.bf16.mxu0 %v4595_v62  ;;  %3137 = vmatpush3.bf16.msra.mxu1 %v4602_v6 }
  0xb3   :  { %3138 = vmatprep.subr.bf16.mxu1 %v4387_v0 }
  0xb5   :  { %3119 = vmatpush1.bf16.msra.mxu0 %v4599_v4 }
  0xb6   :  { %3145 = vmatprep.subr.bf16.mxu0 %v4537_v5  ;;  %3140 = vmatpush3.bf16.msra.mxu1 %v4610_v12 }
  0xb7   :  { %3141 = vmatprep.subr.bf16.mxu1 %v4387_v0 }
  0xb8   :  { %245 = vmatmul.mubr.f32.vlgmr.msra.gmra.mrb[0].mxu0 %v4607_v11 }
  0xb9   :  { %3147 = vmatpush1.bf16.msra.mxu0 %v4539_v9  ;;  %431 = vmatprep.mubr.f32.mxu0 %v4388_v1 }
  0xba   :  { %3149 = vmatprep.subr.bf16.mxu0 %v4541_v10  ;;  %3143 = vmatpush3.bf16.msra.mxu1 %v4616_v17 }
  0xbb   :  { %3176 = vmatprep.subr.bf16.mxu1 %v4387_v0 }
  0xbd   :  { %3151 = vmatpush1.bf16.msra.mxu0 %v4545_v15  ;;  %2841 = vmatmul.mubr.f32.vlgmr.msra.gmra.mrb[0].mxu1 %v4607_v11 }
  0xbe   :  { %3153 = vmatprep.subr.bf16.mxu0 %v4548_v16  ;;  %3178 = vmatpush3.bf16.msra.mxu1 %v4556_v29 }
  0xbf   :  { %3179 = vmatprep.subr.bf16.mxu1 %v4387_v0  ;;  %2875 = vmatprep.mubr.msk.f32.mxu1 %vm4389_vm0, %v4388_v1 }
  0xc1   :  { %3155 = vmatpush1.bf16.msra.mxu0 %v4551_v21 }
  0xc2   :  { %3157 = vmatprep.subr.bf16.mxu0 %v4554_v23  ;;  %3181 = vmatpush3.bf16.msra.mxu1 %v4562_v34 }
  0xc3   :  { %3182 = vmatprep.subr.bf16.mxu1 %v4387_v0 }
  0xc5   :  { %3159 = vmatpush1.bf16.msra.mxu0 %v4559_v32 }
  0xc6   :  { %3161 = vmatprep.subr.bf16.mxu0 %v4565_v35  ;;  %3184 = vmatpush3.bf16.msra.mxu1 %v4572_v43 }
  0xc7   :  { %3185 = vmatprep.subr.bf16.mxu1 %v4387_v0 }
  0xc9   :  { %3163 = vmatpush1.bf16.msra.mxu0 %v4569_v41 }
  0xca   :  { %3165 = vmatprep.subr.bf16.mxu0 %v4575_v44  ;;  %3187 = vmatpush3.bf16.msra.mxu1 %v4582_v52 }
  0xcb   :  { %3188 = vmatprep.subr.bf16.mxu1 %v4387_v0 }
  0xcd   :  { %3167 = vmatpush1.bf16.msra.mxu0 %v4579_v50 }
  0xce   :  { %3169 = vmatprep.subr.bf16.mxu0 %v4585_v53  ;;  %3190 = vmatpush3.bf16.msra.mxu1 %v4592_v61 }
  0xcf   :  { %3191 = vmatprep.subr.bf16.mxu1 %v4387_v0 }
  0xd1   :  { %3171 = vmatpush1.bf16.msra.mxu0 %v4589_v59 }
  0xd2   :  { %3173 = vmatprep.subr.bf16.mxu0 %v4595_v62  ;;  %3193 = vmatpush3.bf16.msra.mxu1 %v4602_v6 }
  0xd3   :  { %3194 = vmatprep.subr.bf16.mxu1 %v4387_v0 }
  0xd5   :  { %3175 = vmatpush1.bf16.msra.mxu0 %v4599_v4 }
  0xd6   :  { %3201 = vmatprep.subr.bf16.mxu0 %v4537_v5  ;;  %3196 = vmatpush3.bf16.msra.mxu1 %v4610_v12 }
  0xd7   :  { %3197 = vmatprep.subr.bf16.mxu1 %v4387_v0 }
  0xda   :  { %3199 = vmatpush3.bf16.msra.mxu1 %v4616_v17 }
  0xdb   :  { %3232 = vmatprep.subr.bf16.mxu1 %v4387_v0 }
 0x18b   :  { %v246_v19 = vpop.f32.mrb[0].mxu0 }
 0x18c   :  { %v327_v20 = vadd.f32 %v4657_v18, %v246_v19  ;;  %v248_v24 = vpop.f32.mrb[1].mxu0 }
 0x18d   :  { %v340_v26 = vadd.f32 %v4660_v22, %v248_v24 }
 0x18e   :  { %v2653_v25 = vmul.f32 -1.442695, %v327_v20 }
 0x18f   :  { %v2655_v27 = vmul.f32 -1.442695, %v340_v26 }
 0x190   :  { %4081 = vpow2.f32 %v2653_v25  ;;  %v317_v28 = vpop.f32.mrb[0].mxu1 }
 0x191   :  { %v2842_v30 = vpop.f32.mrb[1].mxu1  ;;  %4083 = vpow2.f32 %v2655_v27  ;;  %v353_v39 = vadd.f32 %v4663_v37, %v317_v28 }
 0x19a   :  { %v4082_v31 = vpop.eup %4081 }
 0x19b   :  { %v331_v33 = vadd.f32 1.0, %v4082_v31  ;;  %v4084_v36 = vpop.eup %4083 }
 0x19c   :  { %v344_v38 = vadd.f32 1.0, %v4084_v36 }
 0x19d   :  { %4085 = vrcp.f32 %v331_v33 }
 0x19e   :  { %4087 = vrcp.f32 %v344_v38 }
 0x1a7   :  { %v4086_v40 = vpop.eup %4085 }
 0x1a8   :  { %v354_v45 = vmul.f32 %v4086_v40, %v353_v39  ;;  %v4088_v47 = vpop.eup %4087 }
 0x1a9   :  { %v363_v48 = vsub.f32 1.0, %v4088_v47  ;;  %v365_v54 = vmul.f32 %v4088_v47, %v4607_v11 }
 0x1aa   :  { %v361_v46 = vadd.f32 %v4666_v42, %v354_v45 }
 0x1ac   :  { %4089 = vtanh.f32 %v361_v46 }
 0x1b6   :  { %v4090_v49 = vpop.eup %4089 }
 0x1b7   :  { %v364_v51 = vmul.f32 %v4090_v49, %v363_v48 }
 0x1b9   :  { %v4670_v55 = vadd.f32 %v365_v54, %v364_v51 }
 0x1bb   :  { %432 = vmatmul.mubr.f32.vlgmr.msra.gmra.mrb[2].mxu0 %v4670_v55  ;;  %2876 = vmatmul.mubr.f32.vlgmr.msra.gmra.mrb[2].mxu1 %v4670_v55 }
 0x1bc   :  { %3203 = vmatpush1.bf16.msra.mxu0 %v4539_v9  ;;  %3234 = vmatpush3.bf16.msra.mxu1 %v4556_v29 }
 0x1bd   :  { %3205 = vmatprep.subr.bf16.mxu0 %v4541_v10  ;;  %3235 = vmatprep.subr.bf16.mxu1 %v4387_v0 }
 0x1be   :  { %594 = vmatprep.mubr.f32.mxu0 %v4388_v1  ;;  %2910 = vmatprep.mubr.msk.f32.mxu1 %vm4389_vm0, %v4388_v1 }
 0x1c0   :  { %3207 = vmatpush1.bf16.msra.mxu0 %v4545_v15  ;;  %3237 = vmatpush3.bf16.msra.mxu1 %v4562_v34 }
 0x1c1   :  { %3209 = vmatprep.subr.bf16.mxu0 %v4548_v16  ;;  %3238 = vmatprep.subr.bf16.mxu1 %v4387_v0 }
 0x1c4   :  { %3211 = vmatpush1.bf16.msra.mxu0 %v4551_v21  ;;  %3240 = vmatpush3.bf16.msra.mxu1 %v4572_v43 }
 0x1c5   :  { %3213 = vmatprep.subr.bf16.mxu0 %v4554_v23  ;;  %3241 = vmatprep.subr.bf16.mxu1 %v4387_v0 }
 0x1c8   :  { %3215 = vmatpush1.bf16.msra.mxu0 %v4559_v32  ;;  %3243 = vmatpush3.bf16.msra.mxu1 %v4582_v52 }
 0x1c9   :  { %3217 = vmatprep.subr.bf16.mxu0 %v4565_v35  ;;  %3244 = vmatprep.subr.bf16.mxu1 %v4387_v0 }
 0x1cc   :  { %3219 = vmatpush1.bf16.msra.mxu0 %v4569_v41  ;;  %3246 = vmatpush3.bf16.msra.mxu1 %v4592_v61 }
 0x1cd   :  { %3221 = vmatprep.subr.bf16.mxu0 %v4575_v44  ;;  %3247 = vmatprep.subr.bf16.mxu1 %v4387_v0 }
 0x1d0   :  { %3223 = vmatpush1.bf16.msra.mxu0 %v4579_v50  ;;  %3249 = vmatpush3.bf16.msra.mxu1 %v4602_v6 }
 0x1d1   :  { %3225 = vmatprep.subr.bf16.mxu0 %v4585_v53  ;;  %3250 = vmatprep.subr.bf16.mxu1 %v4387_v0 }
 0x1d4   :  { %3227 = vmatpush1.bf16.msra.mxu0 %v4589_v59  ;;  %3252 = vmatpush3.bf16.msra.mxu1 %v4610_v12 }
 0x1d5   :  { %3229 = vmatprep.subr.bf16.mxu0 %v4595_v62  ;;  %3253 = vmatprep.subr.bf16.mxu1 %v4387_v0 }
 0x1d8   :  { %3231 = vmatpush1.bf16.msra.mxu0 %v4599_v4  ;;  %3255 = vmatpush3.bf16.msra.mxu1 %v4616_v17 }
 0x1d9   :  { %3257 = vmatprep.subr.bf16.mxu0 %v4537_v5  ;;  %3288 = vmatprep.subr.bf16.mxu1 %v4387_v0 }
 0x28e   :  { %v433_v56 = vpop.f32.mrb[2].mxu0  ;;  %v504_v57 = vpop.f32.mrb[2].mxu1 }
 0x28f   :  { %v508_v58 = vadd.f32 %v4657_v18, %v433_v56  ;;  %v435_v60 = vpop.f32.mrb[3].mxu0  ;;  %v2877_v63 = vpop.f32.mrb[3].mxu1  ;;  %v522_v19 = vadd.f32 %v4663_v37, %v504_v57 }
 0x290   :  { %v515_v3 = vadd.f32 %v4660_v22, %v435_v60 }
 0x291   :  { %v2658_v2 = vmul.f32 -1.442695, %v508_v58 }
 0x292   :  { %v2659_v7 = vmul.f32 -1.442695, %v515_v3 }
 0x293   :  { %4091 = vpow2.f32 %v2658_v2 }
 0x294   :  { %4093 = vpow2.f32 %v2659_v7 }
 0x29d   :  { %v4092_v8 = vpop.eup %4091 }
 0x29e   :  { %v512_v11 = vadd.f32 1.0, %v4092_v8  ;;  %v4094_v13 = vpop.eup %4093 }
 0x29f   :  { %v519_v14 = vadd.f32 1.0, %v4094_v13 }
 0x2a0   :  { %4095 = vrcp.f32 %v512_v11 }
 0x2a1   :  { %4097 = vrcp.f32 %v519_v14 }
 0x2aa   :  { %v4096_v20 = vpop.eup %4095 }
 0x2ab   :  { %v523_v24 = vmul.f32 %v4096_v20, %v522_v19  ;;  %v4098_v26 = vpop.eup %4097 }
 0x2ac   :  { %v526_v27 = vsub.f32 1.0, %v4098_v26  ;;  %v528_v31 = vmul.f32 %v4098_v26, %v4670_v55 }
 0x2ad   :  { %v524_v25 = vadd.f32 %v4666_v42, %v523_v24 }
 0x2af   :  { %4099 = vtanh.f32 %v524_v25 }
 0x2b9   :  { %v4100_v28 = vpop.eup %4099 }
 0x2ba   :  { %v527_v30 = vmul.f32 %v4100_v28, %v526_v27 }
 0x2bc   :  { %v4714_v33 = vadd.f32 %v528_v31, %v527_v30 }
 0x2be   :  { %595 = vmatmul.mubr.f32.vlgmr.msra.gmra.mrb[4].mxu0 %v4714_v33  ;;  %2911 = vmatmul.mubr.f32.vlgmr.msra.gmra.mrb[4].mxu1 %v4714_v33 }
 0x2bf   :  { %3259 = vmatpush1.bf16.msra.mxu0 %v4539_v9  ;;  %3290 = vmatpush3.bf16.msra.mxu1 %v4556_v29 }
 0x2c0   :  { %3261 = vmatprep.subr.bf16.mxu0 %v4541_v10  ;;  %3291 = vmatprep.subr.bf16.mxu1 %v4387_v0 }
 0x2c1   :  { %757 = vmatprep.mubr.f32.mxu0 %v4388_v1  ;;  %2945 = vmatprep.mubr.msk.f32.mxu1 %vm4389_vm0, %v4388_v1 }
 0x2c3   :  { %3263 = vmatpush1.bf16.msra.mxu0 %v4545_v15  ;;  %3293 = vmatpush3.bf16.msra.mxu1 %v4562_v34 }
 0x2c4   :  { %3265 = vmatprep.subr.bf16.mxu0 %v4548_v16  ;;  %3294 = vmatprep.subr.bf16.mxu1 %v4387_v0 }
 0x2c7   :  { %3267 = vmatpush1.bf16.msra.mxu0 %v4551_v21  ;;  %3296 = vmatpush3.bf16.msra.mxu1 %v4572_v43 }
 0x2c8   :  { %3269 = vmatprep.subr.bf16.mxu0 %v4554_v23  ;;  %3297 = vmatprep.subr.bf16.mxu1 %v4387_v0 }
 0x2cb   :  { %3271 = vmatpush1.bf16.msra.mxu0 %v4559_v32  ;;  %3299 = vmatpush3.bf16.msra.mxu1 %v4582_v52 }
 0x2cc   :  { %3273 = vmatprep.subr.bf16.mxu0 %v4565_v35  ;;  %3300 = vmatprep.subr.bf16.mxu1 %v4387_v0 }
 0x2cf   :  { %3275 = vmatpush1.bf16.msra.mxu0 %v4569_v41  ;;  %3302 = vmatpush3.bf16.msra.mxu1 %v4592_v61 }
 0x2d0   :  { %3277 = vmatprep.subr.bf16.mxu0 %v4575_v44  ;;  %3303 = vmatprep.subr.bf16.mxu1 %v4387_v0 }
 0x2d3   :  { %3279 = vmatpush1.bf16.msra.mxu0 %v4579_v50  ;;  %3305 = vmatpush3.bf16.msra.mxu1 %v4602_v6 }
 0x2d4   :  { %3281 = vmatprep.subr.bf16.mxu0 %v4585_v53  ;;  %3306 = vmatprep.subr.bf16.mxu1 %v4387_v0 }
 0x2d7   :  { %3283 = vmatpush1.bf16.msra.mxu0 %v4589_v59  ;;  %3308 = vmatpush3.bf16.msra.mxu1 %v4610_v12 }
 0x2d8   :  { %3285 = vmatprep.subr.bf16.mxu0 %v4595_v62  ;;  %3309 = vmatprep.subr.bf16.mxu1 %v4387_v0 }
 0x2db   :  { %3287 = vmatpush1.bf16.msra.mxu0 %v4599_v4  ;;  %3311 = vmatpush3.bf16.msra.mxu1 %v4616_v17 }
 0x2dc   :  { %3313 = vmatprep.subr.bf16.mxu0 %v4537_v5  ;;  %3344 = vmatprep.subr.bf16.mxu1 %v4387_v0 }
 0x391   :  { %v596_v36 = vpop.f32.mrb[4].mxu0  ;;  %v667_v38 = vpop.f32.mrb[4].mxu1 }
 0x392   :  { %v671_v39 = vadd.f32 %v4657_v18, %v596_v36  ;;  %v598_v40 = vpop.f32.mrb[5].mxu0  ;;  %v2912_v45 = vpop.f32.mrb[5].mxu1  ;;  %v685_v57 = vadd.f32 %v4663_v37, %v667_v38 }
 0x393   :  { %v678_v47 = vadd.f32 %v4660_v22, %v598_v40 }
 0x394   :  { %v2660_v46 = vmul.f32 -1.442695, %v671_v39 }
 0x395   :  { %v2661_v48 = vmul.f32 -1.442695, %v678_v47 }
 0x396   :  { %4101 = vpow2.f32 %v2660_v46 }
 0x397   :  { %4103 = vpow2.f32 %v2661_v48 }
 0x3a0   :  { %v4102_v49 = vpop.eup %4101 }
 0x3a1   :  { %v675_v51 = vadd.f32 1.0, %v4102_v49  ;;  %v4104_v54 = vpop.eup %4103 }
 0x3a2   :  { %v682_v56 = vadd.f32 1.0, %v4104_v54 }
 0x3a3   :  { %4105 = vrcp.f32 %v675_v51 }
 0x3a4   :  { %4107 = vrcp.f32 %v682_v56 }
 0x3ad   :  { %v4106_v58 = vpop.eup %4105 }
 0x3ae   :  { %v686_v60 = vmul.f32 %v4106_v58, %v685_v57  ;;  %v4108_v2 = vpop.eup %4107 }
 0x3af   :  { %v689_v3 = vsub.f32 1.0, %v4108_v2  ;;  %v691_v11 = vmul.f32 %v4108_v2, %v4714_v33 }
 0x3b0   :  { %v687_v63 = vadd.f32 %v4666_v42, %v686_v60 }
 0x3b2   :  { %4109 = vtanh.f32 %v687_v63 }
 0x3bc   :  { %v4110_v7 = vpop.eup %4109 }
 0x3bd   :  { %v690_v8 = vmul.f32 %v4110_v7, %v689_v3 }
 0x3bf   :  { %v4758_v13 = vadd.f32 %v691_v11, %v690_v8 }
 0x3c1   :  { %758 = vmatmul.mubr.f32.vlgmr.msra.gmra.mrb[6].mxu0 %v4758_v13  ;;  %2946 = vmatmul.mubr.f32.vlgmr.msra.gmra.mrb[6].mxu1 %v4758_v13 }
 0x3c2   :  { %3315 = vmatpush1.bf16.msra.mxu0 %v4539_v9  ;;  %3346 = vmatpush3.bf16.msra.mxu1 %v4556_v29 }
 0x3c3   :  { %3317 = vmatprep.subr.bf16.mxu0 %v4541_v10  ;;  %3347 = vmatprep.subr.bf16.mxu1 %v4387_v0 }
 0x3c4   :  { %920 = vmatprep.mubr.f32.mxu0 %v4388_v1  ;;  %2980 = vmatprep.mubr.msk.f32.mxu1 %vm4389_vm0, %v4388_v1 }
 0x3c6   :  { %3319 = vmatpush1.bf16.msra.mxu0 %v4545_v15  ;;  %3349 = vmatpush3.bf16.msra.mxu1 %v4562_v34 }
 0x3c7   :  { %3321 = vmatprep.subr.bf16.mxu0 %v4548_v16  ;;  %3350 = vmatprep.subr.bf16.mxu1 %v4387_v0 }
 0x3ca   :  { %3323 = vmatpush1.bf16.msra.mxu0 %v4551_v21  ;;  %3352 = vmatpush3.bf16.msra.mxu1 %v4572_v43 }
 0x3cb   :  { %3325 = vmatprep.subr.bf16.mxu0 %v4554_v23  ;;  %3353 = vmatprep.subr.bf16.mxu1 %v4387_v0 }
 0x3ce   :  { %3327 = vmatpush1.bf16.msra.mxu0 %v4559_v32  ;;  %3355 = vmatpush3.bf16.msra.mxu1 %v4582_v52 }
 0x3cf   :  { %3329 = vmatprep.subr.bf16.mxu0 %v4565_v35  ;;  %3356 = vmatprep.subr.bf16.mxu1 %v4387_v0 }
 0x3d2   :  { %3331 = vmatpush1.bf16.msra.mxu0 %v4569_v41  ;;  %3358 = vmatpush3.bf16.msra.mxu1 %v4592_v61 }
 0x3d3   :  { %3333 = vmatprep.subr.bf16.mxu0 %v4575_v44  ;;  %3359 = vmatprep.subr.bf16.mxu1 %v4387_v0 }
 0x3d6   :  { %3335 = vmatpush1.bf16.msra.mxu0 %v4579_v50  ;;  %3361 = vmatpush3.bf16.msra.mxu1 %v4602_v6 }
 0x3d7   :  { %3337 = vmatprep.subr.bf16.mxu0 %v4585_v53  ;;  %3362 = vmatprep.subr.bf16.mxu1 %v4387_v0 }
 0x3da   :  { %3339 = vmatpush1.bf16.msra.mxu0 %v4589_v59  ;;  %3364 = vmatpush3.bf16.msra.mxu1 %v4610_v12 }
 0x3db   :  { %3341 = vmatprep.subr.bf16.mxu0 %v4595_v62  ;;  %3365 = vmatprep.subr.bf16.mxu1 %v4387_v0 }
 0x3de   :  { %3343 = vmatpush1.bf16.msra.mxu0 %v4599_v4  ;;  %3367 = vmatpush3.bf16.msra.mxu1 %v4616_v17 }
 0x3df   :  { %3369 = vmatprep.subr.bf16.mxu0 %v4537_v5  ;;  %3400 = vmatprep.subr.bf16.mxu1 %v4387_v0 }
 0x494   :  { %v759_v14 = vpop.f32.mrb[6].mxu0  ;;  %v830_v19 = vpop.f32.mrb[6].mxu1 }
 0x495   :  { %v834_v20 = vadd.f32 %v4657_v18, %v759_v14  ;;  %v761_v24 = vpop.f32.mrb[7].mxu0  ;;  %v2947_v25 = vpop.f32.mrb[7].mxu1  ;;  %v848_v39 = vadd.f32 %v4663_v37, %v830_v19 }
 0x496   :  { %v841_v27 = vadd.f32 %v4660_v22, %v761_v24 }
 0x497   :  { %v2662_v26 = vmul.f32 -1.442695, %v834_v20 }
 0x498   :  { %v2663_v28 = vmul.f32 -1.442695, %v841_v27 }
 0x499   :  { %4111 = vpow2.f32 %v2662_v26 }
 0x49a   :  { %4113 = vpow2.f32 %v2663_v28 }
 0x4a3   :  { %v4112_v30 = vpop.eup %4111 }
 0x4a4   :  { %v838_v31 = vadd.f32 1.0, %v4112_v30  ;;  %v4114_v36 = vpop.eup %4113 }
 0x4a5   :  { %v845_v38 = vadd.f32 1.0, %v4114_v36 }
 0x4a6   :  { %4115 = vrcp.f32 %v838_v31 }
 0x4a7   :  { %4117 = vrcp.f32 %v845_v38 }
 0x4b0   :  { %v4116_v40 = vpop.eup %4115 }
 0x4b1   :  { %v849_v45 = vmul.f32 %v4116_v40, %v848_v39  ;;  %v4118_v47 = vpop.eup %4117 }
 0x4b2   :  { %v852_v48 = vsub.f32 1.0, %v4118_v47  ;;  %v854_v54 = vmul.f32 %v4118_v47, %v4758_v13 }
 0x4b3   :  { %v850_v46 = vadd.f32 %v4666_v42, %v849_v45 }
 0x4b5   :  { %4119 = vtanh.f32 %v850_v46 }
 0x4bf   :  { %v4120_v49 = vpop.eup %4119 }
 0x4c0   :  { %v853_v51 = vmul.f32 %v4120_v49, %v852_v48 }
 0x4c2   :  { %v4802_v56 = vadd.f32 %v854_v54, %v853_v51 }
 0x4c4   :  { %921 = vmatmul.mubr.f32.vlgmr.msra.gmra.mrb[8].mxu0 %v4802_v56  ;;  %2981 = vmatmul.mubr.f32.vlgmr.msra.gmra.mrb[8].mxu1 %v4802_v56 }
 0x4c5   :  { %3371 = vmatpush1.bf16.msra.mxu0 %v4539_v9  ;;  %3402 = vmatpush3.bf16.msra.mxu1 %v4556_v29 }
 0x4c6   :  { %3373 = vmatprep.subr.bf16.mxu0 %v4541_v10  ;;  %3403 = vmatprep.subr.bf16.mxu1 %v4387_v0 }
 0x4c7   :  { %1083 = vmatprep.mubr.f32.mxu0 %v4388_v1  ;;  %3015 = vmatprep.mubr.msk.f32.mxu1 %vm4389_vm0, %v4388_v1 }
 0x4c9   :  { %3375 = vmatpush1.bf16.msra.mxu0 %v4545_v15  ;;  %3405 = vmatpush3.bf16.msra.mxu1 %v4562_v34 }
 0x4ca   :  { %3377 = vmatprep.subr.bf16.mxu0 %v4548_v16  ;;  %3406 = vmatprep.subr.bf16.mxu1 %v4387_v0 }
 0x4cd   :  { %3379 = vmatpush1.bf16.msra.mxu0 %v4551_v21  ;;  %3408 = vmatpush3.bf16.msra.mxu1 %v4572_v43 }
 0x4ce   :  { %3381 = vmatprep.subr.bf16.mxu0 %v4554_v23  ;;  %3409 = vmatprep.subr.bf16.mxu1 %v4387_v0 }
 0x4d1   :  { %3383 = vmatpush1.bf16.msra.mxu0 %v4559_v32  ;;  %3411 = vmatpush3.bf16.msra.mxu1 %v4582_v52 }
 0x4d2   :  { %3385 = vmatprep.subr.bf16.mxu0 %v4565_v35  ;;  %3412 = vmatprep.subr.bf16.mxu1 %v4387_v0 }
 0x4d5   :  { %3387 = vmatpush1.bf16.msra.mxu0 %v4569_v41  ;;  %3414 = vmatpush3.bf16.msra.mxu1 %v4592_v61 }
 0x4d6   :  { %3389 = vmatprep.subr.bf16.mxu0 %v4575_v44  ;;  %3415 = vmatprep.subr.bf16.mxu1 %v4387_v0 }
 0x4d9   :  { %3391 = vmatpush1.bf16.msra.mxu0 %v4579_v50  ;;  %3417 = vmatpush3.bf16.msra.mxu1 %v4602_v6 }
 0x4da   :  { %3393 = vmatprep.subr.bf16.mxu0 %v4585_v53  ;;  %3418 = vmatprep.subr.bf16.mxu1 %v4387_v0 }
 0x4dd   :  { %3395 = vmatpush1.bf16.msra.mxu0 %v4589_v59  ;;  %3420 = vmatpush3.bf16.msra.mxu1 %v4610_v12 }
 0x4de   :  { %3397 = vmatprep.subr.bf16.mxu0 %v4595_v62  ;;  %3421 = vmatprep.subr.bf16.mxu1 %v4387_v0 }
 0x4e1   :  { %3399 = vmatpush1.bf16.msra.mxu0 %v4599_v4  ;;  %3423 = vmatpush3.bf16.msra.mxu1 %v4616_v17 }
 0x4e2   :  { %3425 = vmatprep.subr.bf16.mxu0 %v4537_v5  ;;  %3456 = vmatprep.subr.bf16.mxu1 %v4387_v0 }
 0x597   :  { %v922_v57 = vpop.f32.mrb[8].mxu0  ;;  %v993_v58 = vpop.f32.mrb[8].mxu1 }
 0x598   :  { %v997_v60 = vadd.f32 %v4657_v18, %v922_v57  ;;  %v924_v63 = vpop.f32.mrb[9].mxu0  ;;  %v2982_v2 = vpop.f32.mrb[9].mxu1  ;;  %v1011_v24 = vadd.f32 %v4663_v37, %v993_v58 }
 0x599   :  { %v1004_v7 = vadd.f32 %v4660_v22, %v924_v63 }
 0x59a   :  { %v2664_v3 = vmul.f32 -1.442695, %v997_v60 }
 0x59b   :  { %v2665_v8 = vmul.f32 -1.442695, %v1004_v7 }
 0x59c   :  { %4121 = vpow2.f32 %v2664_v3 }
 0x59d   :  { %4123 = vpow2.f32 %v2665_v8 }
 0x5a6   :  { %v4122_v11 = vpop.eup %4121 }
 0x5a7   :  { %v1001_v14 = vadd.f32 1.0, %v4122_v11  ;;  %v4124_v19 = vpop.eup %4123 }
 0x5a8   :  { %v1008_v20 = vadd.f32 1.0, %v4124_v19 }
 0x5a9   :  { %4125 = vrcp.f32 %v1001_v14 }
 0x5aa   :  { %4127 = vrcp.f32 %v1008_v20 }
 0x5b3   :  { %v4126_v25 = vpop.eup %4125 }
 0x5b4   :  { %v1012_v26 = vmul.f32 %v4126_v25, %v1011_v24  ;;  %v4128_v28 = vpop.eup %4127  ;;  %v1514_v25 = vld [vmem:[#allocation13 + $0x30] sm:$0xff] }
 0x5b5   :  { %v1015_v30 = vsub.f32 1.0, %v4128_v28  ;;  %v1017_v38 = vmul.f32 %v4128_v28, %v4802_v56 }
 0x5b6   :  { %v1013_v27 = vadd.f32 %v4666_v42, %v1012_v26 }
 0x5b8   :  { %4129 = vtanh.f32 %v1013_v27  ;;  %v1517_v27 = vld [vmem:[#allocation13 + $0x48] sm:$0xff] }
 0x5c2   :  { %v4130_v31 = vpop.eup %4129 }
 0x5c3   :  { %v1016_v36 = vmul.f32 %v4130_v31, %v1015_v30  ;;  %v1521_v31 = vld [vmem:[#allocation13 + $0x68] sm:$0xff] }
 0x5c5   :  { %v4846_v39 = vadd.f32 %v1017_v38, %v1016_v36  ;;  %v1519_v36 = vld [vmem:[#allocation13 + $0x58] sm:$0xff] }
 0x5c7   :  { %1084 = vmatmul.mubr.f32.vlgmr.msra.gmra.mrb[10].mxu0 %v4846_v39  ;;  %3016 = vmatmul.mubr.f32.vlgmr.msra.gmra.mrb[10].mxu1 %v4846_v39 }
 0x5c8   :  { %3427 = vmatpush1.bf16.msra.mxu0 %v4539_v9  ;;  %3458 = vmatpush3.bf16.msra.mxu1 %v4556_v29 }
 0x5c9   :  { %3429 = vmatprep.subr.bf16.mxu0 %v4541_v10  ;;  %3459 = vmatprep.subr.bf16.mxu1 %v4387_v0 }
 0x5ca   :  { %1246 = vmatprep.mubr.f32.mxu0 %v4388_v1  ;;  %3050 = vmatprep.mubr.msk.f32.mxu1 %vm4389_vm0, %v4388_v1 }
 0x5cc   :  { %3431 = vmatpush1.bf16.msra.mxu0 %v4545_v15  ;;  %3461 = vmatpush3.bf16.msra.mxu1 %v4562_v34 }
 0x5cd   :  { %3433 = vmatprep.subr.bf16.mxu0 %v4548_v16  ;;  %3462 = vmatprep.subr.bf16.mxu1 %v4387_v0 }
 0x5d0   :  { %3435 = vmatpush1.bf16.msra.mxu0 %v4551_v21  ;;  %3464 = vmatpush3.bf16.msra.mxu1 %v4572_v43 }
 0x5d1   :  { %3437 = vmatprep.subr.bf16.mxu0 %v4554_v23  ;;  %3465 = vmatprep.subr.bf16.mxu1 %v4387_v0 }
 0x5d4   :  { %3439 = vmatpush1.bf16.msra.mxu0 %v4559_v32  ;;  %3467 = vmatpush3.bf16.msra.mxu1 %v4582_v52 }
 0x5d5   :  { %3441 = vmatprep.subr.bf16.mxu0 %v4565_v35  ;;  %3468 = vmatprep.subr.bf16.mxu1 %v4387_v0 }
 0x5d8   :  { %3443 = vmatpush1.bf16.msra.mxu0 %v4569_v41  ;;  %3470 = vmatpush3.bf16.msra.mxu1 %v4592_v61 }
 0x5d9   :  { %3445 = vmatprep.subr.bf16.mxu0 %v4575_v44  ;;  %3471 = vmatprep.subr.bf16.mxu1 %v4387_v0 }
 0x5dc   :  { %3447 = vmatpush1.bf16.msra.mxu0 %v4579_v50  ;;  %3473 = vmatpush3.bf16.msra.mxu1 %v4602_v6 }
 0x5dd   :  { %3449 = vmatprep.subr.bf16.mxu0 %v4585_v53  ;;  %3474 = vmatprep.subr.bf16.mxu1 %v4387_v0 }
 0x5e0   :  { %3451 = vmatpush1.bf16.msra.mxu0 %v4589_v59  ;;  %3476 = vmatpush3.bf16.msra.mxu1 %v4610_v12 }
 0x5e1   :  { %3453 = vmatprep.subr.bf16.mxu0 %v4595_v62  ;;  %3477 = vmatprep.subr.bf16.mxu1 %v4387_v0 }
 0x5e4   :  { %3455 = vmatpush1.bf16.msra.mxu0 %v4599_v4  ;;  %3479 = vmatpush3.bf16.msra.mxu1 %v4616_v17 }
 0x5e5   :  { %3481 = vmatprep.subr.bf16.mxu0 %v4537_v5  ;;  %3512 = vmatprep.subr.bf16.mxu1 %v4387_v0 }
 0x69a   :  { %v1085_v40 = vpop.f32.mrb[10].mxu0  ;;  %v1156_v45 = vpop.f32.mrb[10].mxu1 }
 0x69b   :  { %v1160_v46 = vadd.f32 %v4657_v18, %v1085_v40  ;;  %v1087_v47 = vpop.f32.mrb[11].mxu0  ;;  %v3017_v48 = vpop.f32.mrb[11].mxu1  ;;  %v1174_v5 = vadd.f32 %v4663_v37, %v1156_v45  ;;  %v1516_v45 = vld [vmem:[#allocation13 + $0x40] sm:$0xff] }
 0x69c   :  { %v1167_v51 = vadd.f32 %v4660_v22, %v1087_v47  ;;  %v1518_v47 = vld [vmem:[#allocation13 + $0x50] sm:$0xff] }
 0x69d   :  { %v2666_v49 = vmul.f32 -1.442695, %v1160_v46  ;;  %v1520_v46 = vld [vmem:[#allocation13 + $0x60] sm:$0xff]  ;;  %v1522_v48 = vld [vmem:[#allocation13 + $0x70] sm:$0xff] }
 0x69e   :  { %v2667_v54 = vmul.f32 -1.442695, %v1167_v51  ;;  %v3540_v51 = vpack.c.bf16 %v1521_v31, %v1517_v27  ;;  %v1554_v31 = vld [vmem:[#allocation13 + $0x170] sm:$0xff] }
 0x69f   :  { %4131 = vpow2.f32 %v2666_v49  ;;  %v1525_v49 = vld [vmem:[#allocation13 + $0x88] sm:$0xff] }
 0x6a0   :  { %4133 = vpow2.f32 %v2667_v54 }
 0x6a9   :  { %v4132_v57 = vpop.eup %4131 }
 0x6aa   :  { %v1164_v58 = vadd.f32 1.0, %v4132_v57  ;;  %v4134_v60 = vpop.eup %4133  ;;  %v1529_v57 = vld [vmem:[#allocation13 + $0xa8] sm:$0xff] }
 0x6ab   :  { %v1171_v63 = vadd.f32 1.0, %v4134_v60  ;;  %v1531_v60 = vld [vmem:[#allocation13 + $0xb8] sm:$0xff] }
 0x6ac   :  { %4135 = vrcp.f32 %v1164_v58  ;;  %v1527_v58 = vld [vmem:[#allocation13 + $0x98] sm:$0xff] }
 0x6ad   :  { %4137 = vrcp.f32 %v1171_v63  ;;  %v3542_v63 = vpack.c.bf16 %v1520_v46, %v1516_v45 }
 0x6b6   :  { %v4136_v2 = vpop.eup %4135 }
 0x6b7   :  { %v1175_v3 = vmul.f32 %v4136_v2, %v1174_v5  ;;  %v4138_v8 = vpop.eup %4137  ;;  %v3798_v5 = vpack.c.bf16 %v1522_v48, %v1518_v47  ;;  %v1524_v2 = vld [vmem:[#allocation13 + $0x80] sm:$0xff] }
 0x6b8   :  { %v1178_v11 = vsub.f32 1.0, %v4138_v8  ;;  %v1180_v20 = vmul.f32 %v4138_v8, %v4846_v39  ;;  %v3800_v8 = vpack.c.bf16 %v1531_v60, %v1527_v58  ;;  %v1556_v47 = vld [vmem:[#allocation13 + $0x180] sm:$0xff]  ;;  %v1565_v58 = vld [vmem:[#allocation13 + $0x1c8] sm:$0xff] }
 0x6b9   :  { %v1176_v7 = vadd.f32 %v4666_v42, %v1175_v3  ;;  %v1528_v3 = vld [vmem:[#allocation13 + $0xa0] sm:$0xff]  ;;  %v1569_v60 = vld [vmem:[#allocation13 + $0x1e8] sm:$0xff] }
 0x6ba   :  { %v1560_v48 = vld [vmem:[#allocation13 + $0x1a0] sm:$0xff] }
 0x6bb   :  { %4139 = vtanh.f32 %v1176_v7  ;;  %v3544_v7 = vpack.c.bf16 %v1529_v57, %v1525_v49  ;;  %v1562_v57 = vld [vmem:[#allocation13 + $0x1b0] sm:$0xff] }
 0x6c5   :  { %v4140_v14 = vpop.eup %4139 }
 0x6c6   :  { %v1179_v19 = vmul.f32 %v4140_v14, %v1178_v11  ;;  %v1526_v11 = vld [vmem:[#allocation13 + $0x90] sm:$0xff] }
 0x6c7   :  { %v1530_v14 = vld [vmem:[#allocation13 + $0xb0] sm:$0xff] }
 0x6c8   :  { %v4890_v24 = vadd.f32 %v1180_v20, %v1179_v19  ;;  %v1533_v19 = vld [vmem:[#allocation13 + $0xc8] sm:$0xff] }
 0x6c9   :  { %v1537_v20 = vld [vmem:[#allocation13 + $0xe8] sm:$0xff] }
 0x6ca   :  { %1247 = vmatmul.mubr.f32.vlgmr.msra.gmra.mrb[12].mxu0 %v4890_v24  ;;  %3051 = vmatmul.mubr.f32.vlgmr.msra.gmra.mrb[12].mxu1 %v4890_v24 }
 0x6cb   :  { %3483 = vmatpush1.bf16.msra.mxu0 %v4539_v9  ;;  %3514 = vmatpush3.bf16.msra.mxu1 %v4556_v29  ;;  %v1513_v9 = vld [vmem:[#allocation13 + $0x28] sm:$0xff] }
 0x6cc   :  { %3485 = vmatprep.subr.bf16.mxu0 %v4541_v10  ;;  %3515 = vmatprep.subr.bf16.mxu1 %v4387_v0  ;;  %v1511_v10 = vld [vmem:[#allocation13 + $0x18] sm:$0xff] }
 0x6cd   :  { %1409 = vmatprep.mubr.f32.mxu0 %v4388_v1  ;;  %3085 = vmatprep.mubr.msk.f32.mxu1 %vm4389_vm0, %v4388_v1  ;;  %v1509_v1 = vld [vmem:[#allocation13 + $0x8] sm:$0xff] }
 0x6cf   :  { %3487 = vmatpush1.bf16.msra.mxu0 %v4545_v15  ;;  %3517 = vmatpush3.bf16.msra.mxu1 %v4562_v34  ;;  %v3536_v15 = vpack.c.bf16 %v1513_v9, %v1509_v1  ;;  %v1535_v1 = vld [vmem:[#allocation13 + $0xd8] sm:$0xff] }
 0x6d0   :  { %3489 = vmatprep.subr.bf16.mxu0 %v4548_v16  ;;  %3518 = vmatprep.subr.bf16.mxu1 %v4387_v0  ;;  %v1515_v16 = vld [vmem:[#allocation13 + $0x38] sm:$0xff] }
 0x6d1   :  { %v1539_v9 = vld [vmem:[#allocation13 + $0xf8] sm:$0xff] }
 0x6d3   :  { %3491 = vmatpush1.bf16.msra.mxu0 %v4551_v21  ;;  %3520 = vmatpush3.bf16.msra.mxu1 %v4572_v43  ;;  %v3792_v21 = vpack.c.bf16 %v1515_v16, %v1511_v10  ;;  %v3546_v10 = vpack.c.bf16 %v1528_v3, %v1524_v2  ;;  %v1532_v16 = vld [vmem:[#allocation13 + $0xc0] sm:$0xff]  ;;  %v3562_v2 = vpack.c.bf16 %v1560_v48, %v1556_v47 }
 0x6d4   :  { %3493 = vmatprep.subr.bf16.mxu0 %v4554_v23  ;;  %3521 = vmatprep.subr.bf16.mxu1 %v4387_v0 }
 0x6d7   :  { %3495 = vmatpush1.bf16.msra.mxu0 %v4559_v32  ;;  %3523 = vmatpush3.bf16.msra.mxu1 %v4582_v52 }
 0x6d8   :  { %3497 = vmatprep.subr.bf16.mxu0 %v4565_v35  ;;  %3524 = vmatprep.subr.bf16.mxu1 %v4387_v0 }
 0x6db   :  { %3499 = vmatpush1.bf16.msra.mxu0 %v4569_v41  ;;  %3526 = vmatpush3.bf16.msra.mxu1 %v4592_v61 }
 0x6dc   :  { %3501 = vmatprep.subr.bf16.mxu0 %v4575_v44  ;;  %3527 = vmatprep.subr.bf16.mxu1 %v4387_v0 }
 0x6df   :  { %3503 = vmatpush1.bf16.msra.mxu0 %v4579_v50  ;;  %3529 = vmatpush3.bf16.msra.mxu1 %v4602_v6 }
 0x6e0   :  { %3505 = vmatprep.subr.bf16.mxu0 %v4585_v53  ;;  %3530 = vmatprep.subr.bf16.mxu1 %v4387_v0 }
 0x6e3   :  { %3507 = vmatpush1.bf16.msra.mxu0 %v4589_v59  ;;  %3532 = vmatpush3.bf16.msra.mxu1 %v4610_v12  ;;  %v1508_v12 = vld [vmem:[#allocation13] sm:$0xff] }
 0x6e4   :  { %3509 = vmatprep.subr.bf16.mxu0 %v4595_v62  ;;  %3533 = vmatprep.subr.bf16.mxu1 %v4387_v0 }
 0x6e7   :  { %3511 = vmatpush1.bf16.msra.mxu0 %v4599_v4  ;;  %3535 = vmatpush3.bf16.msra.mxu1 %v4616_v17 }
 0x6e8   :  { %3537 = vmatprep.subr.bf16.mxu0 %v3536_v15  ;;  %3793 = vmatprep.subr.bf16.mxu1 %v3792_v21  ;;  %v3802_v15 = vpack.c.bf16 %v1530_v14, %v1526_v11  ;;  %v1536_v21 = vld [vmem:[#allocation13 + $0xe0] sm:$0xff]  ;;  %v3564_v11 = vpack.c.bf16 %v1569_v60, %v1565_v58  ;;  %v1598_v58 = vld [vmem:[#allocation13 + $0x2d0] sm:$0xff] }
 0x6e9   :  { %v1602_v60 = vld [vmem:[#allocation13 + $0x2f0] sm:$0xff] }
 0x79d   :  { %v1248_v23 = vpop.f32.mrb[12].mxu0  ;;  %v1319_v29 = vpop.f32.mrb[12].mxu1 }
 0x79e   :  { %v1323_v32 = vadd.f32 %v4657_v18, %v1248_v23  ;;  %v1250_v34 = vpop.f32.mrb[13].mxu0  ;;  %v3052_v35 = vpop.f32.mrb[13].mxu1  ;;  %v1337_v59 = vadd.f32 %v4663_v37, %v1319_v29  ;;  %v1512_v18 = vld [vmem:[#allocation13 + $0x20] sm:$0xff]  ;;  %v1523_v37 = vld [vmem:[#allocation13 + $0x78] sm:$0xff]  ;;  %v3548_v23 = vpack.c.bf16 %v1537_v20, %v1533_v19  ;;  %v1534_v29 = vld [vmem:[#allocation13 + $0xd0] sm:$0xff] }
 0x79f   :  { %v1330_v0 = vadd.f32 %v4660_v22, %v1250_v34  ;;  %v1510_v22 = vld [vmem:[#allocation13 + $0x10] sm:$0xff]  ;;  %v3538_v38 = vpack.c.bf16 %v1512_v18, %v1508_v12  ;;  %v3796_v54 = vpack.c.bf16 %v1523_v37, %v1519_v36  ;;  %v1541_v34 = vld [vmem:[#allocation13 + $0x108] sm:$0xff]  ;;  %v1551_v12 = vld [vmem:[#allocation13 + $0x158] sm:$0xff] }
 0x7a0   :  { %v2668_v41 = vmul.f32 -1.442695, %v1323_v32  ;;  %v3794_v40 = vpack.c.bf16 %v1514_v25, %v1510_v22  ;;  %v1538_v32 = vld [vmem:[#allocation13 + $0xf0] sm:$0xff]  ;;  %v1545_v35 = vld [vmem:[#allocation13 + $0x128] sm:$0xff]  ;;  %v1548_v25 = vld [vmem:[#allocation13 + $0x140] sm:$0xff] }
 0x7a1   :  { %v2669_v43 = vmul.f32 -1.442695, %v1330_v0  ;;  %v1547_v0 = vld [vmem:[#allocation13 + $0x138] sm:$0xff]  ;;  %v1557_v36 = vld [vmem:[#allocation13 + $0x188] sm:$0xff]  ;;  %v1566_v19 = vld [vmem:[#allocation13 + $0x1d0] sm:$0xff] }
 0x7a2   :  { %4141 = vpow2.f32 %v2668_v41  ;;  %v1543_v41 = vld [vmem:[#allocation13 + $0x118] sm:$0xff]  ;;  %v1561_v37 = vld [vmem:[#allocation13 + $0x1a8] sm:$0xff]  ;;  %v1570_v20 = vld [vmem:[#allocation13 + $0x1f0] sm:$0xff] }
 0x7a3   :  { %4143 = vpow2.f32 %v2669_v43  ;;  %v3550_v43 = vpack.c.bf16 %v1536_v21, %v1532_v16  ;;  %v3560_v49 = vpack.c.bf16 %v1561_v37, %v1557_v36  ;;  %v3822_v21 = vpack.c.bf16 %v1570_v20, %v1566_v19  ;;  %v1590_v36 = vld [vmem:[#allocation13 + $0x290] sm:$0xff] }
 0x7a4   :  { %v1594_v37 = vld [vmem:[#allocation13 + $0x2b0] sm:$0xff] }
 0x7a5   :  { %v3834_v48 = vpack.c.bf16 %v1594_v37, %v1590_v36 }
 0x7ac   :  { %v4142_v44 = vpop.eup %4141 }
 0x7ad   :  { %v1327_v50 = vadd.f32 1.0, %v4142_v44  ;;  %v4144_v52 = vpop.eup %4143  ;;  %v3806_v44 = vpack.c.bf16 %v1538_v32, %v1534_v29 }
 0x7ae   :  { %v1334_v53 = vadd.f32 1.0, %v4144_v52  ;;  %v1544_v52 = vld [vmem:[#allocation13 + $0x120] sm:$0xff] }
 0x7af   :  { %4145 = vrcp.f32 %v1327_v50  ;;  %v1540_v50 = vld [vmem:[#allocation13 + $0x100] sm:$0xff] }
 0x7b0   :  { %4147 = vrcp.f32 %v1334_v53  ;;  %v3552_v53 = vpack.c.bf16 %v1545_v35, %v1541_v34  ;;  %v3554_v18 = vpack.c.bf16 %v1544_v52, %v1540_v50  ;;  %v1574_v34 = vld [vmem:[#allocation13 + $0x210] sm:$0xff] }
 0x7b1   :  { %v1578_v35 = vld [vmem:[#allocation13 + $0x230] sm:$0xff] }
 0x7b2   :  { %v3826_v52 = vpack.c.bf16 %v1578_v35, %v1574_v34 }
 0x7b9   :  { %v4146_v61 = vpop.eup %4145 }
 0x7ba   :  { %v1338_v62 = vmul.f32 %v4146_v61, %v1337_v59  ;;  %v4148_v6 = vpop.eup %4147  ;;  %v3808_v59 = vpack.c.bf16 %v1547_v0, %v1543_v41  ;;  %v1542_v61 = vld [vmem:[#allocation13 + $0x110] sm:$0xff]  ;;  %v1581_v41 = vld [vmem:[#allocation13 + $0x248] sm:$0xff] }
 0x7bb   :  { %v1341_v17 = vsub.f32 1.0, %v4148_v6  ;;  %v1343_v30 = vmul.f32 %v4148_v6, %v4890_v24  ;;  %v1553_v6 = vld [vmem:[#allocation13 + $0x168] sm:$0xff] }
 0x7bc   :  { %v1339_v4 = vadd.f32 %v4666_v42, %v1338_v62  ;;  %v1546_v62 = vld [vmem:[#allocation13 + $0x130] sm:$0xff]  ;;  %v1585_v0 = vld [vmem:[#allocation13 + $0x268] sm:$0xff] }
 0x7bd   :  { %v3810_v22 = vpack.c.bf16 %v1546_v62, %v1542_v61  ;;  %v3572_v61 = vpack.c.bf16 %v1585_v0, %v1581_v41  ;;  %v1614_v41 = vld [vmem:[#allocation13 + $0x350] sm:$0xff] }
 0x7be   :  { %4149 = vtanh.f32 %v1339_v4  ;;  %v1549_v4 = vld [vmem:[#allocation13 + $0x148] sm:$0xff]  ;;  %v1618_v0 = vld [vmem:[#allocation13 + $0x370] sm:$0xff] }
 0x7bf   :  { %v3556_v27 = vpack.c.bf16 %v1553_v6, %v1549_v4  ;;  %v1582_v4 = vld [vmem:[#allocation13 + $0x250] sm:$0xff] }
 0x7c0   :  { %v1586_v6 = vld [vmem:[#allocation13 + $0x270] sm:$0xff] }
 0x7c8   :  { %v4150_v26 = vpop.eup %4149 }
 0x7c9   :  { %v1342_v28 = vmul.f32 %v4150_v26, %v1341_v17  ;;  %v1555_v17 = vld [vmem:[#allocation13 + $0x178] sm:$0xff]  ;;  %v1552_v26 = vld [vmem:[#allocation13 + $0x160] sm:$0xff] }
 0x7ca   :  { %v3558_v45 = vpack.c.bf16 %v1552_v26, %v1548_v25  ;;  %v3830_v26 = vpack.c.bf16 %v1586_v6, %v1582_v4 }
 0x7cb   :  { %v4932_v42 = vadd.f32 %v1343_v30, %v1342_v28  ;;  %v3812_v28 = vpack.c.bf16 %v1555_v17, %v1551_v12  ;;  %v1550_v30 = vld [vmem:[#allocation13 + $0x150] sm:$0xff]  ;;  %v1589_v12 = vld [vmem:[#allocation13 + $0x288] sm:$0xff] }
 0x7cc   :  { %v3814_v46 = vpack.c.bf16 %v1554_v31, %v1550_v30  ;;  %v1593_v17 = vld [vmem:[#allocation13 + $0x2a8] sm:$0xff] }
 0x7cd   :  { %1410 = vmatmul.mubr.f32.vlgmr.msra.gmra.mrb[14].mxu0 %v4932_v42  ;;  %3086 = vmatmul.mubr.f32.vlgmr.msra.gmra.mrb[14].mxu1 %v4932_v42  ;;  %v3576_v30 = vpack.c.bf16 %v1593_v17, %v1589_v12  ;;  %v1622_v12 = vld [vmem:[#allocation13 + $0x390] sm:$0xff] }
 0x7ce   :  { %3539 = vmatpush1.bf16.msra.mxu0 %v3538_v38  ;;  %3795 = vmatpush1.bf16.msra.mxu1 %v3794_v40  ;;  %v1559_v38 = vld [vmem:[#allocation13 + $0x198] sm:$0xff]  ;;  %v1626_v17 = vld [vmem:[#allocation13 + $0x3b0] sm:$0xff] }
 0x7cf   :  { %2106 = vmatprep.mubr.f32.mxu0 %v4714_v33  ;;  %2390 = vmatprep.mubr.f32.mxu1 %v4714_v33  ;;  %v3804_v33 = vpack.c.bf16 %v1539_v9, %v1535_v1  ;;  %v1563_v40 = vld [vmem:[#allocation13 + $0x1b8] sm:$0xff]  ;;  %v1573_v1 = vld [vmem:[#allocation13 + $0x208] sm:$0xff] }
 0x7d0   :  { %3541 = vmatprep.subr.bf16.mxu0 %v3540_v51  ;;  %3797 = vmatprep.subr.bf16.mxu1 %v3796_v54  ;;  %v3816_v51 = vpack.c.bf16 %v1563_v40, %v1559_v38  ;;  %v1558_v54 = vld [vmem:[#allocation13 + $0x190] sm:$0xff]  ;;  %v1577_v9 = vld [vmem:[#allocation13 + $0x228] sm:$0xff] }
 0x7d1   :  { %v3818_v3 = vpack.c.bf16 %v1562_v57, %v1558_v54  ;;  %v3568_v29 = vpack.c.bf16 %v1577_v9, %v1573_v1  ;;  %v1597_v38 = vld [vmem:[#allocation13 + $0x2c8] sm:$0xff]  ;;  %v1606_v1 = vld [vmem:[#allocation13 + $0x310] sm:$0xff] }
 0x7d2   :  { %3543 = vmatpush1.bf16.msra.mxu0 %v3542_v63  ;;  %3799 = vmatpush1.bf16.msra.mxu1 %v3798_v5  ;;  %v1567_v63 = vld [vmem:[#allocation13 + $0x1d8] sm:$0xff]  ;;  %v1601_v40 = vld [vmem:[#allocation13 + $0x2e8] sm:$0xff]  ;;  %v1610_v9 = vld [vmem:[#allocation13 + $0x330] sm:$0xff] }
 0x7d3   :  { %3545 = vmatprep.subr.bf16.mxu0 %v3544_v7  ;;  %3801 = vmatprep.subr.bf16.mxu1 %v3800_v8  ;;  %v1571_v5 = vld [vmem:[#allocation13 + $0x1f8] sm:$0xff]  ;;  %v1564_v7 = vld [vmem:[#allocation13 + $0x1c0] sm:$0xff]  ;;  %v3580_v54 = vpack.c.bf16 %v1601_v40, %v1597_v38  ;;  %v1630_v38 = vld [vmem:[#allocation13 + $0x3d0] sm:$0xff] }
 0x7d4   :  { %v1568_v8 = vld [vmem:[#allocation13 + $0x1e0] sm:$0xff]  ;;  %v3820_v14 = vpack.c.bf16 %v1571_v5, %v1567_v63  ;;  %v1605_v63 = vld [vmem:[#allocation13 + $0x308] sm:$0xff]  ;;  %v1634_v40 = vld [vmem:[#allocation13 + $0x3f0] sm:$0xff] }
 0x7d5   :  { %v3566_v16 = vpack.c.bf16 %v1568_v8, %v1564_v7  ;;  %v1609_v5 = vld [vmem:[#allocation13 + $0x328] sm:$0xff]  ;;  %v3838_v8 = vpack.c.bf16 %v1602_v60, %v1598_v58  ;;  %v1636_v58 = vld [vmem:[#allocation13 + $0x400] sm:$0xff] }
 0x7d6   :  { %3547 = vmatpush1.bf16.msra.mxu0 %v3546_v10  ;;  %3803 = vmatpush1.bf16.msra.mxu1 %v3802_v15  ;;  %v1575_v10 = vld [vmem:[#allocation13 + $0x218] sm:$0xff]  ;;  %v3584_v19 = vpack.c.bf16 %v1609_v5, %v1605_v63  ;;  %v1640_v60 = vld [vmem:[#allocation13 + $0x420] sm:$0xff]  ;;  %v1638_v63 = vld [vmem:[#allocation13 + $0x410] sm:$0xff] }
 0x7d7   :  { %3549 = vmatprep.subr.bf16.mxu0 %v3548_v23  ;;  %3805 = vmatprep.subr.bf16.mxu1 %v3804_v33  ;;  %v1579_v15 = vld [vmem:[#allocation13 + $0x238] sm:$0xff]  ;;  %v1572_v23 = vld [vmem:[#allocation13 + $0x200] sm:$0xff]  ;;  %v1642_v5 = vld [vmem:[#allocation13 + $0x430] sm:$0xff] }
 0x7d8   :  { %v1576_v33 = vld [vmem:[#allocation13 + $0x220] sm:$0xff]  ;;  %v3824_v32 = vpack.c.bf16 %v1579_v15, %v1575_v10  ;;  %v1613_v10 = vld [vmem:[#allocation13 + $0x348] sm:$0xff] }
 0x7d9   :  { %v3570_v50 = vpack.c.bf16 %v1576_v33, %v1572_v23  ;;  %v1617_v15 = vld [vmem:[#allocation13 + $0x368] sm:$0xff]  ;;  %v3842_v33 = vpack.c.bf16 %v1610_v9, %v1606_v1  ;;  %v1646_v1 = vld [vmem:[#allocation13 + $0x450] sm:$0xff] }
 0x7da   :  { %3551 = vmatpush1.bf16.msra.mxu0 %v3550_v43  ;;  %3807 = vmatpush1.bf16.msra.mxu1 %v3806_v44  ;;  %v1583_v43 = vld [vmem:[#allocation13 + $0x258] sm:$0xff]  ;;  %v3588_v34 = vpack.c.bf16 %v1617_v15, %v1613_v10  ;;  %v1650_v15 = vld [vmem:[#allocation13 + $0x470] sm:$0xff] }
 0x7db   :  { %3553 = vmatprep.subr.bf16.mxu0 %v3552_v53  ;;  %3809 = vmatprep.subr.bf16.mxu1 %v3808_v59  ;;  %v1587_v44 = vld [vmem:[#allocation13 + $0x278] sm:$0xff]  ;;  %v1580_v53 = vld [vmem:[#allocation13 + $0x240] sm:$0xff] }
 0x7dc   :  { %v1584_v59 = vld [vmem:[#allocation13 + $0x260] sm:$0xff]  ;;  %v3828_v62 = vpack.c.bf16 %v1587_v44, %v1583_v43  ;;  %v1621_v43 = vld [vmem:[#allocation13 + $0x388] sm:$0xff] }
 0x7dd   :  { %v3574_v25 = vpack.c.bf16 %v1584_v59, %v1580_v53  ;;  %v1625_v44 = vld [vmem:[#allocation13 + $0x3a8] sm:$0xff]  ;;  %v3846_v59 = vpack.c.bf16 %v1618_v0, %v1614_v41  ;;  %v1656_v41 = vld [vmem:[#allocation13 + $0x4a0] sm:$0xff]  ;;  %v1654_v0 = vld [vmem:[#allocation13 + $0x490] sm:$0xff] }
 0x7de   :  { %3555 = vmatpush1.bf16.msra.mxu0 %v3554_v18  ;;  %3811 = vmatpush1.bf16.msra.mxu1 %v3810_v22  ;;  %v1591_v18 = vld [vmem:[#allocation13 + $0x298] sm:$0xff]  ;;  %v3592_v4 = vpack.c.bf16 %v1625_v44, %v1621_v43  ;;  %v1658_v44 = vld [vmem:[#allocation13 + $0x4b0] sm:$0xff] }
 0x7df   :  { %3557 = vmatprep.subr.bf16.mxu0 %v3556_v27  ;;  %3813 = vmatprep.subr.bf16.mxu1 %v3812_v28  ;;  %v1595_v22 = vld [vmem:[#allocation13 + $0x2b8] sm:$0xff]  ;;  %v1588_v27 = vld [vmem:[#allocation13 + $0x280] sm:$0xff] }
 0x7e0   :  { %v1592_v28 = vld [vmem:[#allocation13 + $0x2a0] sm:$0xff]  ;;  %v3832_v31 = vpack.c.bf16 %v1595_v22, %v1591_v18  ;;  %v1629_v18 = vld [vmem:[#allocation13 + $0x3c8] sm:$0xff] }
 0x7e1   :  { %v3578_v47 = vpack.c.bf16 %v1592_v28, %v1588_v27  ;;  %v1633_v22 = vld [vmem:[#allocation13 + $0x3e8] sm:$0xff]  ;;  %v3850_v28 = vpack.c.bf16 %v1626_v17, %v1622_v12  ;;  %v1666_v17 = vld [vmem:[#allocation13 + $0x4f0] sm:$0xff] }
 0x7e2   :  { %3559 = vmatpush1.bf16.msra.mxu0 %v3558_v45  ;;  %3815 = vmatpush1.bf16.msra.mxu1 %v3814_v46  ;;  %v1599_v45 = vld [vmem:[#allocation13 + $0x2d8] sm:$0xff]  ;;  %v3596_v36 = vpack.c.bf16 %v1633_v22, %v1629_v18  ;;  %v1669_v18 = vld [vmem:[#allocation13 + $0x508] sm:$0xff] }
 0x7e3   :  { %3561 = vmatprep.subr.bf16.mxu0 %v3560_v49  ;;  %3817 = vmatprep.subr.bf16.mxu1 %v3816_v51  ;;  %v1603_v46 = vld [vmem:[#allocation13 + $0x2f8] sm:$0xff]  ;;  %v1596_v49 = vld [vmem:[#allocation13 + $0x2c0] sm:$0xff]  ;;  %v1673_v22 = vld [vmem:[#allocation13 + $0x528] sm:$0xff] }
 0x7e4   :  { %v1600_v51 = vld [vmem:[#allocation13 + $0x2e0] sm:$0xff]  ;;  %v3836_v57 = vpack.c.bf16 %v1603_v46, %v1599_v45  ;;  %v1637_v45 = vld [vmem:[#allocation13 + $0x408] sm:$0xff] }
 0x7e5   :  { %v3582_v7 = vpack.c.bf16 %v1600_v51, %v1596_v49  ;;  %v1641_v46 = vld [vmem:[#allocation13 + $0x428] sm:$0xff]  ;;  %v3854_v51 = vpack.c.bf16 %v1634_v40, %v1630_v38  ;;  %v1674_v40 = vld [vmem:[#allocation13 + $0x530] sm:$0xff] }
 0x7e6   :  { %3563 = vmatpush1.bf16.msra.mxu0 %v3562_v2  ;;  %3819 = vmatpush1.bf16.msra.mxu1 %v3818_v3  ;;  %v1607_v2 = vld [vmem:[#allocation13 + $0x318] sm:$0xff] }
 0x7e7   :  { %3565 = vmatprep.subr.bf16.mxu0 %v3564_v11  ;;  %3821 = vmatprep.subr.bf16.mxu1 %v3820_v14  ;;  %v1611_v3 = vld [vmem:[#allocation13 + $0x338] sm:$0xff]  ;;  %v1604_v11 = vld [vmem:[#allocation13 + $0x300] sm:$0xff] }
 0x7e8   :  { %v1608_v14 = vld [vmem:[#allocation13 + $0x320] sm:$0xff]  ;;  %v3840_v20 = vpack.c.bf16 %v1611_v3, %v1607_v2  ;;  %v1645_v2 = vld [vmem:[#allocation13 + $0x448] sm:$0xff] }
 0x7e9   :  { %v3586_v23 = vpack.c.bf16 %v1608_v14, %v1604_v11  ;;  %v1649_v3 = vld [vmem:[#allocation13 + $0x468] sm:$0xff]  ;;  %v3602_v11 = vpack.c.bf16 %v1640_v60, %v1636_v58  ;;  %v3858_v14 = vpack.c.bf16 %v1642_v5, %v1638_v63  ;;  %v1680_v58 = vld [vmem:[#allocation13 + $0x560] sm:$0xff]  ;;  %v1678_v60 = vld [vmem:[#allocation13 + $0x550] sm:$0xff] }
 0x7ea   :  { %3567 = vmatpush1.bf16.msra.mxu0 %v3566_v16  ;;  %3823 = vmatpush1.bf16.msra.mxu1 %v3822_v21  ;;  %v1615_v16 = vld [vmem:[#allocation13 + $0x358] sm:$0xff]  ;;  %v3604_v9 = vpack.c.bf16 %v1649_v3, %v1645_v2  ;;  %v1682_v5 = vld [vmem:[#allocation13 + $0x570] sm:$0xff]  ;;  %v1685_v2 = vld [vmem:[#allocation13 + $0x588] sm:$0xff] }
 0x7eb   :  { %3569 = vmatprep.subr.bf16.mxu0 %v3568_v29  ;;  %3825 = vmatprep.subr.bf16.mxu1 %v3824_v32  ;;  %v1619_v21 = vld [vmem:[#allocation13 + $0x378] sm:$0xff]  ;;  %v1612_v29 = vld [vmem:[#allocation13 + $0x340] sm:$0xff]  ;;  %v1689_v3 = vld [vmem:[#allocation13 + $0x5a8] sm:$0xff] }
 0x7ec   :  { %v1616_v32 = vld [vmem:[#allocation13 + $0x360] sm:$0xff]  ;;  %v3844_v35 = vpack.c.bf16 %v1619_v21, %v1615_v16  ;;  %v1653_v16 = vld [vmem:[#allocation13 + $0x488] sm:$0xff] }
 0x7ed   :  { %v3590_v53 = vpack.c.bf16 %v1616_v32, %v1612_v29  ;;  %v1657_v21 = vld [vmem:[#allocation13 + $0x4a8] sm:$0xff]  ;;  %v3862_v32 = vpack.c.bf16 %v1650_v15, %v1646_v1  ;;  %v1688_v1 = vld [vmem:[#allocation13 + $0x5a0] sm:$0xff]  ;;  %v1690_v15 = vld [vmem:[#allocation13 + $0x5b0] sm:$0xff] }
 0x7ee   :  { %3571 = vmatpush1.bf16.msra.mxu0 %v3570_v50  ;;  %3827 = vmatpush1.bf16.msra.mxu1 %v3826_v52  ;;  %v1623_v50 = vld [vmem:[#allocation13 + $0x398] sm:$0xff] }
 0x7ef   :  { %3573 = vmatprep.subr.bf16.mxu0 %v3572_v61  ;;  %3829 = vmatprep.subr.bf16.mxu1 %v3828_v62  ;;  %v1627_v52 = vld [vmem:[#allocation13 + $0x3b8] sm:$0xff]  ;;  %v1620_v61 = vld [vmem:[#allocation13 + $0x380] sm:$0xff] }
 0x7f0   :  { %v1624_v62 = vld [vmem:[#allocation13 + $0x3a0] sm:$0xff]  ;;  %v3848_v6 = vpack.c.bf16 %v1627_v52, %v1623_v50  ;;  %v1661_v50 = vld [vmem:[#allocation13 + $0x4c8] sm:$0xff]  ;;  %v1663_v52 = vld [vmem:[#allocation13 + $0x4d8] sm:$0xff] }
 0x7f1   :  { %v3594_v27 = vpack.c.bf16 %v1624_v62, %v1620_v61  ;;  %v3866_v61 = vpack.c.bf16 %v1658_v44, %v1654_v0  ;;  %v1694_v0 = vld [vmem:[#allocation13 + $0x5d0] sm:$0xff] }
 0x7f2   :  { %3575 = vmatpush1.bf16.msra.mxu0 %v3574_v25  ;;  %3831 = vmatpush1.bf16.msra.mxu1 %v3830_v26  ;;  %v1631_v25 = vld [vmem:[#allocation13 + $0x3d8] sm:$0xff]  ;;  %v1698_v44 = vld [vmem:[#allocation13 + $0x5f0] sm:$0xff] }
 0x7f3   :  { %3577 = vmatprep.subr.bf16.mxu0 %v3576_v30  ;;  %3833 = vmatprep.subr.bf16.mxu1 %v3832_v31  ;;  %v1635_v26 = vld [vmem:[#allocation13 + $0x3f8] sm:$0xff]  ;;  %v1628_v30 = vld [vmem:[#allocation13 + $0x3c0] sm:$0xff] }
 0x7f4   :  { %v1632_v31 = vld [vmem:[#allocation13 + $0x3e0] sm:$0xff]  ;;  %v3852_v37 = vpack.c.bf16 %v1635_v26, %v1631_v25  ;;  %v1671_v25 = vld [vmem:[#allocation13 + $0x518] sm:$0xff] }
 0x7f5   :  { %v3598_v49 = vpack.c.bf16 %v1632_v31, %v1628_v30  ;;  %v1675_v26 = vld [vmem:[#allocation13 + $0x538] sm:$0xff]  ;;  %v3616_v30 = vpack.c.bf16 %v1673_v22, %v1669_v18  ;;  %v1668_v31 = vld [vmem:[#allocation13 + $0x500] sm:$0xff]  ;;  %v1709_v18 = vld [vmem:[#allocation13 + $0x648] sm:$0xff] }
 0x7f6   :  { %3579 = vmatpush1.bf16.msra.mxu0 %v3578_v47  ;;  %3835 = vmatpush1.bf16.msra.mxu1 %v3834_v48  ;;  %v1639_v47 = vld [vmem:[#allocation13 + $0x418] sm:$0xff]  ;;  %v3872_v38 = vpack.c.bf16 %v1675_v26, %v1671_v25  ;;  %v1713_v22 = vld [vmem:[#allocation13 + $0x668] sm:$0xff] }
 0x7f7   :  { %3581 = vmatprep.subr.bf16.mxu0 %v3580_v54  ;;  %3837 = vmatprep.subr.bf16.mxu1 %v3836_v57  ;;  %v1643_v48 = vld [vmem:[#allocation13 + $0x438] sm:$0xff]  ;;  %v3600_v54 = vpack.c.bf16 %v1641_v46, %v1637_v45  ;;  %v1677_v45 = vld [vmem:[#allocation13 + $0x548] sm:$0xff] }
 0x7f8   :  { %v3856_v57 = vpack.c.bf16 %v1643_v48, %v1639_v47  ;;  %v1681_v46 = vld [vmem:[#allocation13 + $0x568] sm:$0xff]  ;;  %v1679_v47 = vld [vmem:[#allocation13 + $0x558] sm:$0xff] }
 0x7f9   :  { %v1683_v48 = vld [vmem:[#allocation13 + $0x578] sm:$0xff] }
 0x7fa   :  { %3583 = vmatpush1.bf16.msra.mxu0 %v3582_v7  ;;  %3839 = vmatpush1.bf16.msra.mxu1 %v3838_v8  ;;  %v1647_v7 = vld [vmem:[#allocation13 + $0x458] sm:$0xff]  ;;  %v3876_v63 = vpack.c.bf16 %v1683_v48, %v1679_v47 }
 0x7fb   :  { %3585 = vmatprep.subr.bf16.mxu0 %v3584_v19  ;;  %3841 = vmatprep.subr.bf16.mxu1 %v3840_v20  ;;  %v1651_v8 = vld [vmem:[#allocation13 + $0x478] sm:$0xff]  ;;  %v1644_v19 = vld [vmem:[#allocation13 + $0x440] sm:$0xff] }
 0x7fc   :  { %v1648_v20 = vld [vmem:[#allocation13 + $0x460] sm:$0xff]  ;;  %v3860_v10 = vpack.c.bf16 %v1651_v8, %v1647_v7  ;;  %v1687_v7 = vld [vmem:[#allocation13 + $0x598] sm:$0xff] }
 0x7fd   :  { %v3606_v29 = vpack.c.bf16 %v1648_v20, %v1644_v19  ;;  %v1691_v8 = vld [vmem:[#allocation13 + $0x5b8] sm:$0xff]  ;;  %v3624_v19 = vpack.c.bf16 %v1689_v3, %v1685_v2  ;;  %v1684_v20 = vld [vmem:[#allocation13 + $0x580] sm:$0xff]  ;;  %v1725_v2 = vld [vmem:[#allocation13 + $0x6c8] sm:$0xff] }
 0x7fe   :  { %3587 = vmatpush1.bf16.msra.mxu0 %v3586_v23  ;;  %3843 = vmatpush1.bf16.msra.mxu1 %v3842_v33  ;;  %v1655_v23 = vld [vmem:[#allocation13 + $0x498] sm:$0xff]  ;;  %v1729_v3 = vld [vmem:[#allocation13 + $0x6e8] sm:$0xff] }
 0x7ff   :  { %3589 = vmatprep.subr.bf16.mxu0 %v3588_v34  ;;  %3845 = vmatprep.subr.bf16.mxu1 %v3844_v35  ;;  %v1659_v33 = vld [vmem:[#allocation13 + $0x4b8] sm:$0xff]  ;;  %v3608_v34 = vpack.c.bf16 %v1657_v21, %v1653_v16  ;;  %v1652_v35 = vld [vmem:[#allocation13 + $0x480] sm:$0xff]  ;;  %v1693_v16 = vld [vmem:[#allocation13 + $0x5c8] sm:$0xff] }
 0x800   :  { %v3864_v43 = vpack.c.bf16 %v1659_v33, %v1655_v23  ;;  %v1697_v21 = vld [vmem:[#allocation13 + $0x5e8] sm:$0xff]  ;;  %v1695_v23 = vld [vmem:[#allocation13 + $0x5d8] sm:$0xff] }
 0x801   :  { %v1699_v33 = vld [vmem:[#allocation13 + $0x5f8] sm:$0xff] }
 0x802   :  { %3591 = vmatpush1.bf16.msra.mxu0 %v3590_v53  ;;  %3847 = vmatpush1.bf16.msra.mxu1 %v3846_v59  ;;  %v1667_v53 = vld [vmem:[#allocation13 + $0x4f8] sm:$0xff]  ;;  %v3610_v59 = vpack.c.bf16 %v1656_v41, %v1652_v35  ;;  %v1692_v35 = vld [vmem:[#allocation13 + $0x5c0] sm:$0xff] }
 0x803   :  { %3593 = vmatprep.subr.bf16.mxu0 %v3592_v4  ;;  %3849 = vmatprep.subr.bf16.mxu1 %v3848_v6  ;;  %v1664_v4 = vld [vmem:[#allocation13 + $0x4e0] sm:$0xff]  ;;  %v1662_v6 = vld [vmem:[#allocation13 + $0x4d0] sm:$0xff]  ;;  %v3868_v12 = vpack.c.bf16 %v1667_v53, %v1663_v52  ;;  %v1703_v52 = vld [vmem:[#allocation13 + $0x618] sm:$0xff] }
 0x804   :  { %v1696_v41 = vld [vmem:[#allocation13 + $0x5e0] sm:$0xff]  ;;  %v1707_v53 = vld [vmem:[#allocation13 + $0x638] sm:$0xff] }
 0x805   :  { %v1711_v25 = vld [vmem:[#allocation13 + $0x658] sm:$0xff] }
 0x806   :  { %3595 = vmatpush1.bf16.msra.mxu0 %v3594_v27  ;;  %3851 = vmatpush1.bf16.msra.mxu1 %v3850_v28  ;;  %v3870_v28 = vpack.c.bf16 %v1666_v17, %v1662_v6  ;;  %v1702_v6 = vld [vmem:[#allocation13 + $0x610] sm:$0xff]  ;;  %v1715_v26 = vld [vmem:[#allocation13 + $0x678] sm:$0xff] }
 0x807   :  { %3597 = vmatprep.subr.bf16.mxu0 %v3596_v36  ;;  %3853 = vmatprep.subr.bf16.mxu1 %v3852_v37  ;;  %v1672_v36 = vld [vmem:[#allocation13 + $0x520] sm:$0xff]  ;;  %v1670_v37 = vld [vmem:[#allocation13 + $0x510] sm:$0xff]  ;;  %v1719_v47 = vld [vmem:[#allocation13 + $0x698] sm:$0xff] }
 0x808   :  { %v1706_v17 = vld [vmem:[#allocation13 + $0x630] sm:$0xff]  ;;  %v1723_v48 = vld [vmem:[#allocation13 + $0x6b8] sm:$0xff] }
 0x80a   :  { %3599 = vmatpush1.bf16.msra.mxu0 %v3598_v49  ;;  %3855 = vmatpush1.bf16.msra.mxu1 %v3854_v51  ;;  %v3618_v49 = vpack.c.bf16 %v1672_v36, %v1668_v31  ;;  %v3874_v51 = vpack.c.bf16 %v1674_v40, %v1670_v37  ;;  %v1708_v31 = vld [vmem:[#allocation13 + $0x640] sm:$0xff]  ;;  %v1710_v37 = vld [vmem:[#allocation13 + $0x650] sm:$0xff] }
 0x80b   :  { %3601 = vmatprep.subr.bf16.mxu0 %v3600_v54  ;;  %3857 = vmatprep.subr.bf16.mxu1 %v3856_v57  ;;  %v3620_v54 = vpack.c.bf16 %v1681_v46, %v1677_v45  ;;  %v1676_v57 = vld [vmem:[#allocation13 + $0x540] sm:$0xff]  ;;  %v1714_v40 = vld [vmem:[#allocation13 + $0x670] sm:$0xff]  ;;  %v1717_v45 = vld [vmem:[#allocation13 + $0x688] sm:$0xff] }
 0x80c   :  { %v1712_v36 = vld [vmem:[#allocation13 + $0x660] sm:$0xff]  ;;  %v1721_v46 = vld [vmem:[#allocation13 + $0x6a8] sm:$0xff] }
 0x80d   :  { %2107 = vmatmul.mubr.f32.vlgmr.msra.gmra.mrb[16].mxu0 %v4670_v55  ;;  %2391 = vmatmul.mubr.f32.vlgmr.msra.gmra.mrb[16].mxu1 %v4670_v55  ;;  %v1665_v55 = vld [vmem:[#allocation13 + $0x4e8] sm:$0xff] }
 0x80e   :  { %3603 = vmatpush1.bf16.msra.mxu0 %v3602_v11  ;;  %2177 = vmatprep.mubr.f32.mxu0 %v4802_v56  ;;  %v3612_v62 = vpack.c.bf16 %v1665_v55, %v1661_v50  ;;  %v3622_v11 = vpack.c.bf16 %v1680_v58, %v1676_v57  ;;  %v1701_v50 = vld [vmem:[#allocation13 + $0x608] sm:$0xff]  ;;  %v1716_v57 = vld [vmem:[#allocation13 + $0x680] sm:$0xff] }
 0x80f   :  { %3859 = vmatpush1.bf16.msra.mxu1 %v3858_v14  ;;  %2461 = vmatprep.mubr.f32.mxu1 %v4802_v56  ;;  %v1660_v56 = vld [vmem:[#allocation13 + $0x4c0] sm:$0xff]  ;;  %v3878_v14 = vpack.c.bf16 %v1682_v5, %v1678_v60  ;;  %v1705_v55 = vld [vmem:[#allocation13 + $0x628] sm:$0xff]  ;;  %v1718_v60 = vld [vmem:[#allocation13 + $0x690] sm:$0xff] }
 0x810   :  { %3605 = vmatprep.subr.bf16.mxu0 %v3604_v9  ;;  %3861 = vmatprep.subr.bf16.mxu1 %v3860_v10  ;;  %v3614_v27 = vpack.c.bf16 %v1664_v4, %v1660_v56  ;;  %v1686_v9 = vld [vmem:[#allocation13 + $0x590] sm:$0xff]  ;;  %v3880_v10 = vpack.c.bf16 %v1691_v8, %v1687_v7  ;;  %v1700_v56 = vld [vmem:[#allocation13 + $0x600] sm:$0xff]  ;;  %v1727_v7 = vld [vmem:[#allocation13 + $0x6d8] sm:$0xff] }
 0x811   :  { %v1704_v4 = vld [vmem:[#allocation13 + $0x620] sm:$0xff]  ;;  %v1722_v5 = vld [vmem:[#allocation13 + $0x6b0] sm:$0xff]  ;;  %v1731_v8 = vld [vmem:[#allocation13 + $0x6f8] sm:$0xff] }
 0x812   :  { %3607 = vmatpush1.bf16.msra.mxu0 %v3606_v29  ;;  %v3626_v29 = vpack.c.bf16 %v1688_v1, %v1684_v20  ;;  %v1720_v58 = vld [vmem:[#allocation13 + $0x6a0] sm:$0xff] }
 0x813   :  { %3863 = vmatpush1.bf16.msra.mxu1 %v3862_v32  ;;  %3609 = vmatprep.subr.bf16.mxu0 %v3608_v34  ;;  %v3882_v32 = vpack.c.bf16 %v1690_v15, %v1686_v9  ;;  %v3628_v34 = vpack.c.bf16 %v1697_v21, %v1693_v16  ;;  %v1724_v20 = vld [vmem:[#allocation13 + $0x6c0] sm:$0xff]  ;;  %v1726_v9 = vld [vmem:[#allocation13 + $0x6d0] sm:$0xff]  ;;  %v1733_v16 = vld [vmem:[#allocation13 + $0x708] sm:$0xff] }
 0x814   :  { %3865 = vmatprep.subr.bf16.mxu1 %v3864_v43  ;;  %v3884_v43 = vpack.c.bf16 %v1699_v33, %v1695_v23  ;;  %v1728_v1 = vld [vmem:[#allocation13 + $0x6e0] sm:$0xff]  ;;  %v1730_v15 = vld [vmem:[#allocation13 + $0x6f0] sm:$0xff]  ;;  %v1737_v21 = vld [vmem:[#allocation13 + $0x728] sm:$0xff] }
 0x815   :  { %v1735_v23 = vld [vmem:[#allocation13 + $0x718] sm:$0xff] }
 0x816   :  { %3611 = vmatpush1.bf16.msra.mxu0 %v3610_v59  ;;  %v3630_v59 = vpack.c.bf16 %v1696_v41, %v1692_v35  ;;  %v1739_v33 = vld [vmem:[#allocation13 + $0x738] sm:$0xff]  ;;  %v1732_v35 = vld [vmem:[#allocation13 + $0x700] sm:$0xff] }
 0x817   :  { %3867 = vmatpush1.bf16.msra.mxu1 %v3866_v61  ;;  %3613 = vmatprep.subr.bf16.mxu0 %v3612_v62  ;;  %v3886_v61 = vpack.c.bf16 %v1698_v44, %v1694_v0  ;;  %v3632_v62 = vpack.c.bf16 %v1705_v55, %v1701_v50  ;;  %v1736_v41 = vld [vmem:[#allocation13 + $0x720] sm:$0xff]  ;;  %v1734_v0 = vld [vmem:[#allocation13 + $0x710] sm:$0xff]  ;;  %v1741_v50 = vld [vmem:[#allocation13 + $0x748] sm:$0xff] }
 0x818   :  { %3869 = vmatprep.subr.bf16.mxu1 %v3868_v12  ;;  %v3888_v12 = vpack.c.bf16 %v1707_v53, %v1703_v52  ;;  %v1738_v44 = vld [vmem:[#allocation13 + $0x730] sm:$0xff]  ;;  %v1745_v55 = vld [vmem:[#allocation13 + $0x768] sm:$0xff]  ;;  %v1743_v52 = vld [vmem:[#allocation13 + $0x758] sm:$0xff] }
 0x819   :  { %v1747_v53 = vld [vmem:[#allocation13 + $0x778] sm:$0xff] }
 0x81a   :  { %3615 = vmatpush1.bf16.msra.mxu0 %v3614_v27  ;;  %v3634_v27 = vpack.c.bf16 %v1704_v4, %v1700_v56  ;;  %v1740_v56 = vld [vmem:[#allocation13 + $0x740] sm:$0xff] }
 0x81b   :  { %3871 = vmatpush1.bf16.msra.mxu1 %v3870_v28  ;;  %3617 = vmatprep.subr.bf16.mxu0 %v3616_v30  ;;  %v3890_v28 = vpack.c.bf16 %v1706_v17, %v1702_v6  ;;  %v3636_v30 = vpack.c.bf16 %v1713_v22, %v1709_v18  ;;  %v1744_v4 = vld [vmem:[#allocation13 + $0x760] sm:$0xff]  ;;  %v1742_v6 = vld [vmem:[#allocation13 + $0x750] sm:$0xff]  ;;  %v1749_v18 = vld [vmem:[#allocation13 + $0x788] sm:$0xff] }
 0x81c   :  { %3873 = vmatprep.subr.bf16.mxu1 %v3872_v38  ;;  %v3892_v38 = vpack.c.bf16 %v1715_v26, %v1711_v25  ;;  %v1746_v17 = vld [vmem:[#allocation13 + $0x770] sm:$0xff]  ;;  %v1753_v22 = vld [vmem:[#allocation13 + $0x7a8] sm:$0xff]  ;;  %v1751_v25 = vld [vmem:[#allocation13 + $0x798] sm:$0xff] }
 0x81d   :  { %v1755_v26 = vld [vmem:[#allocation13 + $0x7b8] sm:$0xff] }
 0x81e   :  { %3619 = vmatpush1.bf16.msra.mxu0 %v3618_v49  ;;  %v3638_v49 = vpack.c.bf16 %v1712_v36, %v1708_v31  ;;  %v1748_v31 = vld [vmem:[#allocation13 + $0x780] sm:$0xff] }
 0x81f   :  { %3875 = vmatpush1.bf16.msra.mxu1 %v3874_v51  ;;  %3621 = vmatprep.subr.bf16.mxu0 %v3620_v54  ;;  %v3894_v51 = vpack.c.bf16 %v1714_v40, %v1710_v37  ;;  %v3640_v54 = vpack.c.bf16 %v1721_v46, %v1717_v45  ;;  %v1752_v36 = vld [vmem:[#allocation13 + $0x7a0] sm:$0xff]  ;;  %v1750_v37 = vld [vmem:[#allocation13 + $0x790] sm:$0xff]  ;;  %v1757_v45 = vld [vmem:[#allocation13 + $0x7c8] sm:$0xff] }
 0x820   :  { %3877 = vmatprep.subr.bf16.mxu1 %v3876_v63  ;;  %v3896_v63 = vpack.c.bf16 %v1723_v48, %v1719_v47  ;;  %v1754_v40 = vld [vmem:[#allocation13 + $0x7b0] sm:$0xff]  ;;  %v1761_v46 = vld [vmem:[#allocation13 + $0x7e8] sm:$0xff]  ;;  %v1759_v47 = vld [vmem:[#allocation13 + $0x7d8] sm:$0xff] }
 0x821   :  { %v1763_v48 = vld [vmem:[#allocation13 + $0x7f8] sm:$0xff] }
 0x822   :  { %3623 = vmatpush1.bf16.msra.mxu0 %v3622_v11  ;;  %v3642_v11 = vpack.c.bf16 %v1720_v58, %v1716_v57  ;;  %v1756_v57 = vld [vmem:[#allocation13 + $0x7c0] sm:$0xff] }
 0x823   :  { %3879 = vmatpush1.bf16.msra.mxu1 %v3878_v14  ;;  %3625 = vmatprep.subr.bf16.mxu0 %v3624_v19  ;;  %v3898_v14 = vpack.c.bf16 %v1722_v5, %v1718_v60  ;;  %v3644_v19 = vpack.c.bf16 %v1729_v3, %v1725_v2  ;;  %v1760_v58 = vld [vmem:[#allocation13 + $0x7e0] sm:$0xff]  ;;  %v1758_v60 = vld [vmem:[#allocation13 + $0x7d0] sm:$0xff]  ;;  %v1765_v2 = vld [vmem:[#allocation13 + $0x808] sm:$0xff] }
 0x824   :  { %3881 = vmatprep.subr.bf16.mxu1 %v3880_v10  ;;  %v3900_v10 = vpack.c.bf16 %v1731_v8, %v1727_v7  ;;  %v1762_v5 = vld [vmem:[#allocation13 + $0x7f0] sm:$0xff]  ;;  %v1769_v3 = vld [vmem:[#allocation13 + $0x828] sm:$0xff]  ;;  %v1767_v7 = vld [vmem:[#allocation13 + $0x818] sm:$0xff] }
 0x825   :  { %v1771_v8 = vld [vmem:[#allocation13 + $0x838] sm:$0xff] }
 0x826   :  { %3627 = vmatpush1.bf16.msra.mxu0 %v3626_v29  ;;  %v3646_v29 = vpack.c.bf16 %v1728_v1, %v1724_v20  ;;  %v1764_v20 = vld [vmem:[#allocation13 + $0x800] sm:$0xff] }
 0x827   :  { %3883 = vmatpush1.bf16.msra.mxu1 %v3882_v32  ;;  %3629 = vmatprep.subr.bf16.mxu0 %v3628_v34  ;;  %v3902_v32 = vpack.c.bf16 %v1730_v15, %v1726_v9  ;;  %v3648_v34 = vpack.c.bf16 %v1737_v21, %v1733_v16  ;;  %v1768_v1 = vld [vmem:[#allocation13 + $0x820] sm:$0xff]  ;;  %v3920_v9 = vpack.c.bf16 %v1771_v8, %v1767_v7  ;;  %v1770_v15 = vld [vmem:[#allocation13 + $0x830] sm:$0xff]  ;;  %v1773_v16 = vld [vmem:[#allocation13 + $0x848] sm:$0xff] }
 0x828   :  { %3885 = vmatprep.subr.bf16.mxu1 %v3884_v43  ;;  %v3904_v43 = vpack.c.bf16 %v1739_v33, %v1735_v23  ;;  %v1777_v21 = vld [vmem:[#allocation13 + $0x868] sm:$0xff]  ;;  %v3666_v23 = vpack.c.bf16 %v1768_v1, %v1764_v20  ;;  %v1775_v33 = vld [vmem:[#allocation13 + $0x858] sm:$0xff]  ;;  %v1806_v20 = vld [vmem:[#allocation13 + $0x950] sm:$0xff] }
 0x82a   :  { %3631 = vmatpush1.bf16.msra.mxu0 %v3630_v59  ;;  %v3650_v59 = vpack.c.bf16 %v1736_v41, %v1732_v35  ;;  %v1776_v35 = vld [vmem:[#allocation13 + $0x860] sm:$0xff]  ;;  %v1774_v41 = vld [vmem:[#allocation13 + $0x850] sm:$0xff] }
 0x82b   :  { %3887 = vmatpush1.bf16.msra.mxu1 %v3886_v61  ;;  %3633 = vmatprep.subr.bf16.mxu0 %v3632_v62  ;;  %v3906_v61 = vpack.c.bf16 %v1738_v44, %v1734_v0  ;;  %v3652_v62 = vpack.c.bf16 %v1745_v55, %v1741_v50  ;;  %v3668_v0 = vpack.c.bf16 %v1777_v21, %v1773_v16  ;;  %v1781_v44 = vld [vmem:[#allocation13 + $0x888] sm:$0xff]  ;;  %v1815_v16 = vld [vmem:[#allocation13 + $0x998] sm:$0xff] }
 0x82c   :  { %3889 = vmatprep.subr.bf16.mxu1 %v3888_v12  ;;  %v3908_v12 = vpack.c.bf16 %v1747_v53, %v1743_v52  ;;  %v1785_v50 = vld [vmem:[#allocation13 + $0x8a8] sm:$0xff]  ;;  %v1783_v52 = vld [vmem:[#allocation13 + $0x898] sm:$0xff] }
 0x82d   :  { %v1787_v53 = vld [vmem:[#allocation13 + $0x8b8] sm:$0xff] }
 0x82e   :  { %3635 = vmatpush1.bf16.msra.mxu0 %v3634_v27  ;;  %v3654_v27 = vpack.c.bf16 %v1744_v4, %v1740_v56  ;;  %v1780_v56 = vld [vmem:[#allocation13 + $0x880] sm:$0xff]  ;;  %v1819_v21 = vld [vmem:[#allocation13 + $0x9b8] sm:$0xff] }
 0x82f   :  { %3891 = vmatpush1.bf16.msra.mxu1 %v3890_v28  ;;  %3637 = vmatprep.subr.bf16.mxu0 %v3636_v30  ;;  %v3910_v28 = vpack.c.bf16 %v1746_v17, %v1742_v6  ;;  %v3656_v30 = vpack.c.bf16 %v1753_v22, %v1749_v18  ;;  %v1784_v4 = vld [vmem:[#allocation13 + $0x8a0] sm:$0xff]  ;;  %v1782_v6 = vld [vmem:[#allocation13 + $0x890] sm:$0xff]  ;;  %v1789_v18 = vld [vmem:[#allocation13 + $0x8c8] sm:$0xff] }
 0x830   :  { %3893 = vmatprep.subr.bf16.mxu1 %v3892_v38  ;;  %v3912_v38 = vpack.c.bf16 %v1755_v26, %v1751_v25  ;;  %v1786_v17 = vld [vmem:[#allocation13 + $0x8b0] sm:$0xff]  ;;  %v1793_v22 = vld [vmem:[#allocation13 + $0x8e8] sm:$0xff]  ;;  %v1791_v25 = vld [vmem:[#allocation13 + $0x8d8] sm:$0xff]  ;;  %v3674_v26 = vpack.c.bf16 %v1784_v4, %v1780_v56 }
 0x831   :  { %v1822_v56 = vld [vmem:[#allocation13 + $0x9d0] sm:$0xff] }
 0x832   :  { %3639 = vmatpush1.bf16.msra.mxu0 %v3638_v49  ;;  %v3658_v49 = vpack.c.bf16 %v1752_v36, %v1748_v31  ;;  %v1792_v31 = vld [vmem:[#allocation13 + $0x8e0] sm:$0xff]  ;;  %v1790_v36 = vld [vmem:[#allocation13 + $0x8d0] sm:$0xff] }
 0x833   :  { %3895 = vmatpush1.bf16.msra.mxu1 %v3894_v51  ;;  %3641 = vmatprep.subr.bf16.mxu0 %v3640_v54  ;;  %v3914_v51 = vpack.c.bf16 %v1754_v40, %v1750_v37  ;;  %v3660_v54 = vpack.c.bf16 %v1761_v46, %v1757_v45  ;;  %v1801_v40 = vld [vmem:[#allocation13 + $0x928] sm:$0xff]  ;;  %v1799_v45 = vld [vmem:[#allocation13 + $0x918] sm:$0xff] }
 0x834   :  { %3897 = vmatprep.subr.bf16.mxu1 %v3896_v63  ;;  %v3916_v63 = vpack.c.bf16 %v1763_v48, %v1759_v47  ;;  %v1803_v46 = vld [vmem:[#allocation13 + $0x938] sm:$0xff] }
 0x836   :  { %3643 = vmatpush1.bf16.msra.mxu0 %v3642_v11  ;;  %v3662_v11 = vpack.c.bf16 %v1760_v58, %v1756_v57  ;;  %v1798_v57 = vld [vmem:[#allocation13 + $0x910] sm:$0xff]  ;;  %v3936_v58 = vpack.c.bf16 %v1803_v46, %v1799_v45 }
 0x837   :  { %3899 = vmatpush1.bf16.msra.mxu1 %v3898_v14  ;;  %3645 = vmatprep.subr.bf16.mxu0 %v3644_v19  ;;  %v3918_v14 = vpack.c.bf16 %v1762_v5, %v1758_v60  ;;  %v3664_v19 = vpack.c.bf16 %v1769_v3, %v1765_v2  ;;  %v1802_v60 = vld [vmem:[#allocation13 + $0x930] sm:$0xff]  ;;  %v1809_v5 = vld [vmem:[#allocation13 + $0x968] sm:$0xff]  ;;  %v1807_v2 = vld [vmem:[#allocation13 + $0x958] sm:$0xff] }
 0x838   :  { %3901 = vmatprep.subr.bf16.mxu1 %v3900_v10  ;;  %v1766_v10 = vld [vmem:[#allocation13 + $0x810] sm:$0xff]  ;;  %v1811_v3 = vld [vmem:[#allocation13 + $0x978] sm:$0xff]  ;;  %v3938_v8 = vpack.c.bf16 %v1802_v60, %v1798_v57  ;;  %v1849_v60 = vld [vmem:[#allocation13 + $0xaa8] sm:$0xff] }
 0x839   :  { %v3940_v1 = vpack.c.bf16 %v1811_v3, %v1807_v2  ;;  %v1842_v57 = vld [vmem:[#allocation13 + $0xa70] sm:$0xff] }
 0x83a   :  { %3647 = vmatpush1.bf16.msra.mxu0 %v3646_v29  ;;  %v1779_v29 = vld [vmem:[#allocation13 + $0x878] sm:$0xff] }
 0x83b   :  { %3903 = vmatpush1.bf16.msra.mxu1 %v3902_v32  ;;  %3649 = vmatprep.subr.bf16.mxu0 %v3648_v34  ;;  %v3922_v32 = vpack.c.bf16 %v1770_v15, %v1766_v10  ;;  %v1772_v34 = vld [vmem:[#allocation13 + $0x840] sm:$0xff]  ;;  %v3924_v55 = vpack.c.bf16 %v1779_v29, %v1775_v33  ;;  %v1813_v10 = vld [vmem:[#allocation13 + $0x988] sm:$0xff] }
 0x83c   :  { %3905 = vmatprep.subr.bf16.mxu1 %v3904_v43  ;;  %v1778_v43 = vld [vmem:[#allocation13 + $0x870] sm:$0xff]  ;;  %v1817_v15 = vld [vmem:[#allocation13 + $0x9a8] sm:$0xff] }
 0x83d   :  { %v3688_v29 = vpack.c.bf16 %v1817_v15, %v1813_v10  ;;  %v1855_v10 = vld [vmem:[#allocation13 + $0xad8] sm:$0xff] }
 0x83e   :  { %3651 = vmatpush1.bf16.msra.mxu0 %v3650_v59  ;;  %v3670_v59 = vpack.c.bf16 %v1776_v35, %v1772_v34  ;;  %v1816_v34 = vld [vmem:[#allocation13 + $0x9a0] sm:$0xff]  ;;  %v1814_v35 = vld [vmem:[#allocation13 + $0x990] sm:$0xff]  ;;  %v1859_v15 = vld [vmem:[#allocation13 + $0xaf8] sm:$0xff] }
 0x83f   :  { %3907 = vmatpush1.bf16.msra.mxu1 %v3906_v61  ;;  %3653 = vmatprep.subr.bf16.mxu0 %v3652_v62  ;;  %v3926_v61 = vpack.c.bf16 %v1778_v43, %v1774_v41  ;;  %v3672_v62 = vpack.c.bf16 %v1785_v50, %v1781_v44  ;;  %v3944_v41 = vpack.c.bf16 %v1819_v21, %v1815_v16  ;;  %v1821_v43 = vld [vmem:[#allocation13 + $0x9c8] sm:$0xff]  ;;  %v1823_v50 = vld [vmem:[#allocation13 + $0x9d8] sm:$0xff] }
 0x840   :  { %3909 = vmatprep.subr.bf16.mxu1 %v3908_v12  ;;  %v3928_v12 = vpack.c.bf16 %v1787_v53, %v1783_v52  ;;  %v1825_v44 = vld [vmem:[#allocation13 + $0x9e8] sm:$0xff] }
 0x842   :  { %3655 = vmatpush1.bf16.msra.mxu0 %v3654_v27  ;;  %v3930_v27 = vpack.c.bf16 %v1786_v17, %v1782_v6  ;;  %v1826_v6 = vld [vmem:[#allocation13 + $0x9f0] sm:$0xff]  ;;  %v1833_v17 = vld [vmem:[#allocation13 + $0xa28] sm:$0xff] }
 0x843   :  { %3911 = vmatpush1.bf16.msra.mxu1 %v3910_v28  ;;  %3657 = vmatprep.subr.bf16.mxu0 %v3656_v30  ;;  %v3676_v28 = vpack.c.bf16 %v1793_v22, %v1789_v18  ;;  %v1788_v30 = vld [vmem:[#allocation13 + $0x8c0] sm:$0xff]  ;;  %v1831_v18 = vld [vmem:[#allocation13 + $0xa18] sm:$0xff] }
 0x844   :  { %3913 = vmatprep.subr.bf16.mxu1 %v3912_v38  ;;  %v1797_v38 = vld [vmem:[#allocation13 + $0x908] sm:$0xff]  ;;  %v3678_v47 = vpack.c.bf16 %v1792_v31, %v1788_v30  ;;  %v1835_v22 = vld [vmem:[#allocation13 + $0xa38] sm:$0xff]  ;;  %v1830_v30 = vld [vmem:[#allocation13 + $0xa10] sm:$0xff] }
 0x845   :  { %v3952_v31 = vpack.c.bf16 %v1835_v22, %v1831_v18 }
 0x846   :  { %3659 = vmatpush1.bf16.msra.mxu0 %v3658_v49  ;;  %v3680_v49 = vpack.c.bf16 %v1801_v40, %v1797_v38  ;;  %v1839_v38 = vld [vmem:[#allocation13 + $0xa58] sm:$0xff] }
 0x847   :  { %3915 = vmatpush1.bf16.msra.mxu1 %v3914_v51  ;;  %3661 = vmatprep.subr.bf16.mxu0 %v3660_v54  ;;  %v1796_v51 = vld [vmem:[#allocation13 + $0x900] sm:$0xff]  ;;  %v1843_v40 = vld [vmem:[#allocation13 + $0xa78] sm:$0xff] }
 0x848   :  { %3917 = vmatprep.subr.bf16.mxu1 %v3916_v63  ;;  %v1800_v54 = vld [vmem:[#allocation13 + $0x920] sm:$0xff]  ;;  %v1805_v63 = vld [vmem:[#allocation13 + $0x948] sm:$0xff] }
 0x849   :  { %v3682_v7 = vpack.c.bf16 %v1800_v54, %v1796_v51  ;;  %v1838_v51 = vld [vmem:[#allocation13 + $0xa50] sm:$0xff]  ;;  %v3956_v54 = vpack.c.bf16 %v1843_v40, %v1839_v38 }
 0x84a   :  { %3663 = vmatpush1.bf16.msra.mxu0 %v3662_v11  ;;  %v3684_v11 = vpack.c.bf16 %v1809_v5, %v1805_v63  ;;  %v1847_v63 = vld [vmem:[#allocation13 + $0xa98] sm:$0xff]  ;;  %v3958_v3 = vpack.c.bf16 %v1842_v57, %v1838_v51  ;;  %v1882_v51 = vld [vmem:[#allocation13 + $0xbb0] sm:$0xff]  ;;  %v1889_v57 = vld [vmem:[#allocation13 + $0xbe8] sm:$0xff] }
 0x84b   :  { %3919 = vmatpush1.bf16.msra.mxu1 %v3918_v14  ;;  %3665 = vmatprep.subr.bf16.mxu0 %v3664_v19  ;;  %v1804_v14 = vld [vmem:[#allocation13 + $0x940] sm:$0xff]  ;;  %v1851_v5 = vld [vmem:[#allocation13 + $0xab8] sm:$0xff] }
 0x84c   :  { %3921 = vmatprep.subr.bf16.mxu1 %v3920_v9  ;;  %v1808_v19 = vld [vmem:[#allocation13 + $0x960] sm:$0xff]  ;;  %v1810_v9 = vld [vmem:[#allocation13 + $0x970] sm:$0xff] }
 0x84d   :  { %2178 = vmatmul.mubr.f32.vlgmr.msra.gmra.mrb[16].mxu0 %v4758_v13  ;;  %v3942_v33 = vpack.c.bf16 %v1810_v9, %v1806_v20  ;;  %v1850_v20 = vld [vmem:[#allocation13 + $0xab0] sm:$0xff]  ;;  %v1857_v9 = vld [vmem:[#allocation13 + $0xae8] sm:$0xff] }
 0x84e   :  { %2462 = vmatmul.mubr.f32.vlgmr.msra.gmra.mrb[16].mxu1 %v4758_v13  ;;  %3667 = vmatpush1.bf16.msra.mxu0 %v3666_v23  ;;  %v1795_v13 = vld [vmem:[#allocation13 + $0x8f8] sm:$0xff]  ;;  %v3686_v23 = vpack.c.bf16 %v1808_v19, %v1804_v14  ;;  %v1846_v14 = vld [vmem:[#allocation13 + $0xa90] sm:$0xff]  ;;  %v3960_v19 = vpack.c.bf16 %v1851_v5, %v1847_v63 }
 0x84f   :  { %2248 = vmatprep.mubr.f32.mxu0 %v4890_v24  ;;  %3923 = vmatpush1.bf16.msra.mxu1 %v3922_v32  ;;  %v3932_v37 = vpack.c.bf16 %v1795_v13, %v1791_v25  ;;  %v1812_v32 = vld [vmem:[#allocation13 + $0x980] sm:$0xff]  ;;  %v3950_v13 = vpack.c.bf16 %v1826_v6, %v1822_v56  ;;  %v3962_v21 = vpack.c.bf16 %v1850_v20, %v1846_v14  ;;  %v1866_v56 = vld [vmem:[#allocation13 + $0xb30] sm:$0xff]  ;;  %v1873_v6 = vld [vmem:[#allocation13 + $0xb68] sm:$0xff] }
 0x850   :  { %2532 = vmatprep.mubr.f32.mxu1 %v4890_v24  ;;  %3669 = vmatprep.subr.bf16.mxu0 %v3668_v0  ;;  %v1794_v24 = vld [vmem:[#allocation13 + $0x8f0] sm:$0xff]  ;;  %v3690_v52 = vpack.c.bf16 %v1816_v34, %v1812_v32  ;;  %v3964_v34 = vpack.c.bf16 %v1859_v15, %v1855_v10  ;;  %v1897_v20 = vld [vmem:[#allocation13 + $0xc28] sm:$0xff] }
 0x851   :  { %3925 = vmatprep.subr.bf16.mxu1 %v3924_v55  ;;  %v3934_v48 = vpack.c.bf16 %v1794_v24, %v1790_v36  ;;  %v1818_v0 = vld [vmem:[#allocation13 + $0x9b0] sm:$0xff]  ;;  %v1827_v55 = vld [vmem:[#allocation13 + $0x9f8] sm:$0xff]  ;;  %v1841_v24 = vld [vmem:[#allocation13 + $0xa68] sm:$0xff] }
 0x852   :  { %3671 = vmatpush1.bf16.msra.mxu0 %v3670_v59  ;;  %v3946_v53 = vpack.c.bf16 %v1818_v0, %v1814_v35  ;;  %v3692_v59 = vpack.c.bf16 %v1825_v44, %v1821_v43  ;;  %v3948_v4 = vpack.c.bf16 %v1827_v55, %v1823_v50  ;;  %v1834_v36 = vld [vmem:[#allocation13 + $0xa30] sm:$0xff]  ;;  %v1865_v0 = vld [vmem:[#allocation13 + $0xb28] sm:$0xff]  ;;  %v1863_v43 = vld [vmem:[#allocation13 + $0xb18] sm:$0xff] }
 0x853   :  { %3927 = vmatpush1.bf16.msra.mxu1 %v3926_v61  ;;  %3673 = vmatprep.subr.bf16.mxu0 %v3672_v62  ;;  %v1820_v61 = vld [vmem:[#allocation13 + $0x9c0] sm:$0xff]  ;;  %v3954_v46 = vpack.c.bf16 %v1834_v36, %v1830_v30  ;;  %v1854_v32 = vld [vmem:[#allocation13 + $0xad0] sm:$0xff]  ;;  %v1867_v44 = vld [vmem:[#allocation13 + $0xb38] sm:$0xff] }
 0x854   :  { %3929 = vmatprep.subr.bf16.mxu1 %v3928_v12  ;;  %v1824_v62 = vld [vmem:[#allocation13 + $0x9e0] sm:$0xff]  ;;  %v1829_v12 = vld [vmem:[#allocation13 + $0xa08] sm:$0xff]  ;;  %v1858_v35 = vld [vmem:[#allocation13 + $0xaf0] sm:$0xff] }
 0x855   :  { %v3694_v25 = vpack.c.bf16 %v1824_v62, %v1820_v61  ;;  %v3966_v55 = vpack.c.bf16 %v1858_v35, %v1854_v32  ;;  %v1862_v61 = vld [vmem:[#allocation13 + $0xb10] sm:$0xff]  ;;  %v3968_v62 = vpack.c.bf16 %v1867_v44, %v1863_v43  ;;  %v1881_v36 = vld [vmem:[#allocation13 + $0xba8] sm:$0xff] }
 0x856   :  { %3675 = vmatpush1.bf16.msra.mxu0 %v3674_v26  ;;  %v3696_v26 = vpack.c.bf16 %v1833_v17, %v1829_v12  ;;  %v1871_v12 = vld [vmem:[#allocation13 + $0xb58] sm:$0xff]  ;;  %v3970_v22 = vpack.c.bf16 %v1866_v56, %v1862_v61  ;;  %v1874_v30 = vld [vmem:[#allocation13 + $0xb70] sm:$0xff]  ;;  %v1905_v35 = vld [vmem:[#allocation13 + $0xc68] sm:$0xff] }
 0x857   :  { %3931 = vmatpush1.bf16.msra.mxu1 %v3930_v27  ;;  %3677 = vmatprep.subr.bf16.mxu0 %v3676_v28  ;;  %v1828_v27 = vld [vmem:[#allocation13 + $0xa00] sm:$0xff]  ;;  %v1875_v17 = vld [vmem:[#allocation13 + $0xb78] sm:$0xff]  ;;  %v1890_v14 = vld [vmem:[#allocation13 + $0xbf0] sm:$0xff] }
 0x858   :  { %3933 = vmatprep.subr.bf16.mxu1 %v3932_v37  ;;  %v1832_v28 = vld [vmem:[#allocation13 + $0xa20] sm:$0xff]  ;;  %v1837_v37 = vld [vmem:[#allocation13 + $0xa48] sm:$0xff]  ;;  %v1898_v32 = vld [vmem:[#allocation13 + $0xc30] sm:$0xff] }
 0x859   :  { %v3698_v45 = vpack.c.bf16 %v1832_v28, %v1828_v27  ;;  %v1870_v27 = vld [vmem:[#allocation13 + $0xb50] sm:$0xff]  ;;  %v3972_v28 = vpack.c.bf16 %v1875_v17, %v1871_v12  ;;  %v1913_v56 = vld [vmem:[#allocation13 + $0xca8] sm:$0xff] }
 0x85a   :  { %3679 = vmatpush1.bf16.msra.mxu0 %v3678_v47  ;;  %v3700_v47 = vpack.c.bf16 %v1841_v24, %v1837_v37  ;;  %v1879_v37 = vld [vmem:[#allocation13 + $0xb98] sm:$0xff]  ;;  %v3974_v40 = vpack.c.bf16 %v1874_v30, %v1870_v27  ;;  %v1906_v61 = vld [vmem:[#allocation13 + $0xc70] sm:$0xff]  ;;  %v1921_v30 = vld [vmem:[#allocation13 + $0xce8] sm:$0xff] }
 0x85b   :  { %3935 = vmatpush1.bf16.msra.mxu1 %v3934_v48  ;;  %3681 = vmatprep.subr.bf16.mxu0 %v3680_v49  ;;  %v1836_v48 = vld [vmem:[#allocation13 + $0xa40] sm:$0xff]  ;;  %v1883_v24 = vld [vmem:[#allocation13 + $0xbb8] sm:$0xff]  ;;  %v1914_v27 = vld [vmem:[#allocation13 + $0xcb0] sm:$0xff] }
 0x85c   :  { %3937 = vmatprep.subr.bf16.mxu1 %v3936_v58  ;;  %v1840_v49 = vld [vmem:[#allocation13 + $0xa60] sm:$0xff]  ;;  %v1845_v58 = vld [vmem:[#allocation13 + $0xa88] sm:$0xff] }
 0x85d   :  { %v3702_v2 = vpack.c.bf16 %v1840_v49, %v1836_v48  ;;  %v1878_v48 = vld [vmem:[#allocation13 + $0xb90] sm:$0xff]  ;;  %v3976_v49 = vpack.c.bf16 %v1883_v24, %v1879_v37 }
 0x85e   :  { %3683 = vmatpush1.bf16.msra.mxu0 %v3682_v7  ;;  %v3704_v7 = vpack.c.bf16 %v1849_v60, %v1845_v58  ;;  %v1887_v58 = vld [vmem:[#allocation13 + $0xbd8] sm:$0xff]  ;;  %v3978_v5 = vpack.c.bf16 %v1882_v51, %v1878_v48  ;;  %v1925_v48 = vld [vmem:[#allocation13 + $0xd08] sm:$0xff] }
 0x85f   :  { %3939 = vmatpush1.bf16.msra.mxu1 %v3938_v8  ;;  %3685 = vmatprep.subr.bf16.mxu0 %v3684_v11  ;;  %v1844_v8 = vld [vmem:[#allocation13 + $0xa80] sm:$0xff]  ;;  %v1891_v60 = vld [vmem:[#allocation13 + $0xbf8] sm:$0xff] }
 0x860   :  { %3941 = vmatprep.subr.bf16.mxu1 %v3940_v1  ;;  %v1848_v11 = vld [vmem:[#allocation13 + $0xaa0] sm:$0xff]  ;;  %v1853_v1 = vld [vmem:[#allocation13 + $0xac8] sm:$0xff]  ;;  %v1927_v51 = vld [vmem:[#allocation13 + $0xd18] sm:$0xff] }
 0x861   :  { %v3706_v16 = vpack.c.bf16 %v1848_v11, %v1844_v8  ;;  %v1886_v8 = vld [vmem:[#allocation13 + $0xbd0] sm:$0xff]  ;;  %v3980_v11 = vpack.c.bf16 %v1891_v60, %v1887_v58 }
 0x862   :  { %3687 = vmatpush1.bf16.msra.mxu0 %v3686_v23  ;;  %v3708_v23 = vpack.c.bf16 %v1857_v9, %v1853_v1  ;;  %v1895_v1 = vld [vmem:[#allocation13 + $0xc18] sm:$0xff]  ;;  %v3982_v15 = vpack.c.bf16 %v1890_v14, %v1886_v8  ;;  %v1933_v8 = vld [vmem:[#allocation13 + $0xd48] sm:$0xff] }
 0x863   :  { %3943 = vmatpush1.bf16.msra.mxu1 %v3942_v33  ;;  %3689 = vmatprep.subr.bf16.mxu0 %v3688_v29  ;;  %v1852_v33 = vld [vmem:[#allocation13 + $0xac0] sm:$0xff]  ;;  %v1899_v9 = vld [vmem:[#allocation13 + $0xc38] sm:$0xff] }
 0x864   :  { %3945 = vmatprep.subr.bf16.mxu1 %v3944_v41  ;;  %v1856_v29 = vld [vmem:[#allocation13 + $0xae0] sm:$0xff]  ;;  %v1861_v41 = vld [vmem:[#allocation13 + $0xb08] sm:$0xff]  ;;  %v1935_v14 = vld [vmem:[#allocation13 + $0xd58] sm:$0xff] }
 0x865   :  { %v3710_v50 = vpack.c.bf16 %v1856_v29, %v1852_v33  ;;  %v1894_v33 = vld [vmem:[#allocation13 + $0xc10] sm:$0xff]  ;;  %v3984_v29 = vpack.c.bf16 %v1899_v9, %v1895_v1 }
 0x866   :  { %3691 = vmatpush1.bf16.msra.mxu0 %v3690_v52  ;;  %v3712_v52 = vpack.c.bf16 %v1865_v0, %v1861_v41  ;;  %v1903_v41 = vld [vmem:[#allocation13 + $0xc58] sm:$0xff]  ;;  %v3986_v44 = vpack.c.bf16 %v1898_v32, %v1894_v33  ;;  %v1941_v33 = vld [vmem:[#allocation13 + $0xd88] sm:$0xff] }
 0x867   :  { %3947 = vmatpush1.bf16.msra.mxu1 %v3946_v53  ;;  %3693 = vmatprep.subr.bf16.mxu0 %v3692_v59  ;;  %v1860_v53 = vld [vmem:[#allocation13 + $0xb00] sm:$0xff]  ;;  %v1907_v0 = vld [vmem:[#allocation13 + $0xc78] sm:$0xff] }
 0x868   :  { %3949 = vmatprep.subr.bf16.mxu1 %v3948_v4  ;;  %v1864_v59 = vld [vmem:[#allocation13 + $0xb20] sm:$0xff]  ;;  %v1869_v4 = vld [vmem:[#allocation13 + $0xb48] sm:$0xff]  ;;  %v1943_v32 = vld [vmem:[#allocation13 + $0xd98] sm:$0xff] }
 0x869   :  { %v3714_v18 = vpack.c.bf16 %v1864_v59, %v1860_v53  ;;  %v1902_v53 = vld [vmem:[#allocation13 + $0xc50] sm:$0xff]  ;;  %v3988_v59 = vpack.c.bf16 %v1907_v0, %v1903_v41 }
 0x86a   :  { %3695 = vmatpush1.bf16.msra.mxu0 %v3694_v25  ;;  %v3716_v25 = vpack.c.bf16 %v1873_v6, %v1869_v4  ;;  %v1911_v4 = vld [vmem:[#allocation13 + $0xc98] sm:$0xff]  ;;  %v3990_v17 = vpack.c.bf16 %v1906_v61, %v1902_v53  ;;  %v1949_v61 = vld [vmem:[#allocation13 + $0xdc8] sm:$0xff] }
 0x86b   :  { %3951 = vmatpush1.bf16.msra.mxu1 %v3950_v13  ;;  %3697 = vmatprep.subr.bf16.mxu0 %v3696_v26  ;;  %v1868_v13 = vld [vmem:[#allocation13 + $0xb40] sm:$0xff]  ;;  %v1915_v6 = vld [vmem:[#allocation13 + $0xcb8] sm:$0xff] }
 0x86c   :  { %3953 = vmatprep.subr.bf16.mxu1 %v3952_v31  ;;  %v1872_v26 = vld [vmem:[#allocation13 + $0xb60] sm:$0xff]  ;;  %v1877_v31 = vld [vmem:[#allocation13 + $0xb88] sm:$0xff] }
 0x86d   :  { %v3718_v38 = vpack.c.bf16 %v1872_v26, %v1868_v13  ;;  %v1910_v13 = vld [vmem:[#allocation13 + $0xc90] sm:$0xff]  ;;  %v3992_v26 = vpack.c.bf16 %v1915_v6, %v1911_v4 }
 0x86e   :  { %3699 = vmatpush1.bf16.msra.mxu0 %v3698_v45  ;;  %v3720_v45 = vpack.c.bf16 %v1881_v36, %v1877_v31  ;;  %v1919_v31 = vld [vmem:[#allocation13 + $0xcd8] sm:$0xff] }
 0x86f   :  { %3955 = vmatpush1.bf16.msra.mxu1 %v3954_v46  ;;  %3701 = vmatprep.subr.bf16.mxu0 %v3700_v47  ;;  %v1876_v46 = vld [vmem:[#allocation13 + $0xb80] sm:$0xff]  ;;  %v1923_v36 = vld [vmem:[#allocation13 + $0xcf8] sm:$0xff] }
 0x870   :  { %3957 = vmatprep.subr.bf16.mxu1 %v3956_v54  ;;  %v1880_v47 = vld [vmem:[#allocation13 + $0xba0] sm:$0xff]  ;;  %v1885_v54 = vld [vmem:[#allocation13 + $0xbc8] sm:$0xff] }
 0x871   :  { %v3722_v63 = vpack.c.bf16 %v1880_v47, %v1876_v46  ;;  %v3996_v46 = vpack.c.bf16 %v1923_v36, %v1919_v31  ;;  %v1922_v47 = vld [vmem:[#allocation13 + $0xcf0] sm:$0xff]  ;;  %v4162_v31 = vld [vmem:[#allocation8] ss:$0 sm:$0xff] }
 0x872   :  { %3703 = vmatpush1.bf16.msra.mxu0 %v3702_v2  ;;  %v3724_v2 = vpack.c.bf16 %v1889_v57, %v1885_v54  ;;  %v1931_v54 = vld [vmem:[#allocation13 + $0xd38] sm:$0xff] }
 0x873   :  { %3959 = vmatpush1.bf16.msra.mxu1 %v3958_v3  ;;  %3705 = vmatprep.subr.bf16.mxu0 %v3704_v7  ;;  %v1884_v3 = vld [vmem:[#allocation13 + $0xbc0] sm:$0xff] }
 0x874   :  { %3961 = vmatprep.subr.bf16.mxu1 %v3960_v19  ;;  %v1888_v7 = vld [vmem:[#allocation13 + $0xbe0] sm:$0xff]  ;;  %v1893_v19 = vld [vmem:[#allocation13 + $0xc08] sm:$0xff] }
 0x875   :  { %v3726_v10 = vpack.c.bf16 %v1888_v7, %v1884_v3  ;;  %v4000_v3 = vpack.c.bf16 %v1931_v54, %v1927_v51  ;;  %v1930_v7 = vld [vmem:[#allocation13 + $0xd30] sm:$0xff]  ;;  %v1960_v51 = vld [vmem:[#allocation13 + $0xe20] sm:$0xff] }
 0x876   :  { %3707 = vmatpush1.bf16.msra.mxu0 %v3706_v16  ;;  %v3728_v16 = vpack.c.bf16 %v1897_v20, %v1893_v19  ;;  %v1939_v19 = vld [vmem:[#allocation13 + $0xd78] sm:$0xff]  ;;  %v1958_v54 = vld [vmem:[#allocation13 + $0xe10] sm:$0xff] }
 0x877   :  { %3963 = vmatpush1.bf16.msra.mxu1 %v3962_v21  ;;  %3709 = vmatprep.subr.bf16.mxu0 %v3708_v23  ;;  %v1892_v21 = vld [vmem:[#allocation13 + $0xc00] sm:$0xff] }
 0x878   :  { %3965 = vmatprep.subr.bf16.mxu1 %v3964_v34  ;;  %v1896_v23 = vld [vmem:[#allocation13 + $0xc20] sm:$0xff]  ;;  %v1901_v34 = vld [vmem:[#allocation13 + $0xc48] sm:$0xff] }
 0x879   :  { %v3730_v43 = vpack.c.bf16 %v1896_v23, %v1892_v21  ;;  %v4004_v21 = vpack.c.bf16 %v1939_v19, %v1935_v14  ;;  %v1938_v23 = vld [vmem:[#allocation13 + $0xd70] sm:$0xff]  ;;  %v1964_v14 = vld [vmem:[#allocation13 + $0xe40] sm:$0xff] }
 0x87a   :  { %3711 = vmatpush1.bf16.msra.mxu0 %v3710_v50  ;;  %v3732_v50 = vpack.c.bf16 %v1905_v35, %v1901_v34  ;;  %v1947_v34 = vld [vmem:[#allocation13 + $0xdb8] sm:$0xff]  ;;  %v1968_v19 = vld [vmem:[#allocation13 + $0xe60] sm:$0xff] }
 0x87b   :  { %3967 = vmatpush1.bf16.msra.mxu1 %v3966_v55  ;;  %3713 = vmatprep.subr.bf16.mxu0 %v3712_v52  ;;  %v1900_v55 = vld [vmem:[#allocation13 + $0xc40] sm:$0xff]  ;;  %v4008_v53 = vpack.c.bf16 %v1947_v34, %v1943_v32 }
 0x87c   :  { %3969 = vmatprep.subr.bf16.mxu1 %v3968_v62  ;;  %v1904_v52 = vld [vmem:[#allocation13 + $0xc60] sm:$0xff]  ;;  %v1909_v62 = vld [vmem:[#allocation13 + $0xc88] sm:$0xff] }
 0x87d   :  { %v3734_v12 = vpack.c.bf16 %v1904_v52, %v1900_v55  ;;  %v1972_v34 = vld [vmem:[#allocation13 + $0xe80] sm:$0xff] }
 0x87e   :  { %3715 = vmatpush1.bf16.msra.mxu0 %v3714_v18  ;;  %v3736_v18 = vpack.c.bf16 %v1913_v56, %v1909_v62  ;;  %v1953_v62 = vld [vmem:[#allocation13 + $0xde8] sm:$0xff]  ;;  %v4161_v56 = vld [vmem:[#allocation7] ss:$0 sm:$0xff] }
 0x87f   :  { %3971 = vmatpush1.bf16.msra.mxu1 %v3970_v22  ;;  %3717 = vmatprep.subr.bf16.mxu0 %v3716_v25  ;;  %v1908_v22 = vld [vmem:[#allocation13 + $0xc80] sm:$0xff] }
 0x880   :  { %3973 = vmatprep.subr.bf16.mxu1 %v3972_v28  ;;  %v1912_v25 = vld [vmem:[#allocation13 + $0xca0] sm:$0xff]  ;;  %v1917_v28 = vld [vmem:[#allocation13 + $0xcc8] sm:$0xff] }
 0x881   :  { %v3738_v37 = vpack.c.bf16 %v1912_v25, %v1908_v22  ;;  %v3740_v24 = vpack.c.bf16 %v1921_v30, %v1917_v28  ;;  %v1952_v28 = vld [vmem:[#allocation13 + $0xde0] sm:$0xff]  ;;  %v1950_v30 = vld [vmem:[#allocation13 + $0xdd0] sm:$0xff] }
 0x882   :  { %3719 = vmatpush1.bf16.msra.mxu0 %v3718_v38  ;;  %v1916_v38 = vld [vmem:[#allocation13 + $0xcc0] sm:$0xff] }
 0x883   :  { %3975 = vmatpush1.bf16.msra.mxu1 %v3974_v40  ;;  %3721 = vmatprep.subr.bf16.mxu0 %v3720_v45  ;;  %v1920_v40 = vld [vmem:[#allocation13 + $0xce0] sm:$0xff]  ;;  %v1918_v45 = vld [vmem:[#allocation13 + $0xcd0] sm:$0xff] }
 0x884   :  { %3977 = vmatprep.subr.bf16.mxu1 %v3976_v49  ;;  %v1929_v49 = vld [vmem:[#allocation13 + $0xd28] sm:$0xff]  ;;  %v3742_v57 = vpack.c.bf16 %v1920_v40, %v1916_v38  ;;  %v3998_v58 = vpack.c.bf16 %v1922_v47, %v1918_v45  ;;  %v1959_v40 = vld [vmem:[#allocation13 + $0xe18] sm:$0xff] }
 0x885   :  { %v3744_v60 = vpack.c.bf16 %v1929_v49, %v1925_v48  ;;  %v1961_v38 = vld [vmem:[#allocation13 + $0xe28] sm:$0xff]  ;;  %v1963_v45 = vld [vmem:[#allocation13 + $0xe38] sm:$0xff]  ;;  %v1956_v49 = vld [vmem:[#allocation13 + $0xe00] sm:$0xff] }
 0x886   :  { %3723 = vmatpush1.bf16.msra.mxu0 %v3722_v63  ;;  %v1924_v63 = vld [vmem:[#allocation13 + $0xd00] sm:$0xff] }
 0x887   :  { %3979 = vmatpush1.bf16.msra.mxu1 %v3978_v5  ;;  %3725 = vmatprep.subr.bf16.mxu0 %v3724_v2  ;;  %v1928_v5 = vld [vmem:[#allocation13 + $0xd20] sm:$0xff]  ;;  %v1926_v2 = vld [vmem:[#allocation13 + $0xd10] sm:$0xff] }
 0x888   :  { %3981 = vmatprep.subr.bf16.mxu1 %v3980_v11  ;;  %v1937_v11 = vld [vmem:[#allocation13 + $0xd68] sm:$0xff]  ;;  %v3746_v20 = vpack.c.bf16 %v1928_v5, %v1924_v63  ;;  %v4002_v1 = vpack.c.bf16 %v1930_v7, %v1926_v2  ;;  %v1967_v2 = vld [vmem:[#allocation13 + $0xe58] sm:$0xff]  ;;  %v3762_v7 = vpack.c.bf16 %v1960_v51, %v1956_v49 }
 0x889   :  { %v3748_v9 = vpack.c.bf16 %v1937_v11, %v1933_v8  ;;  %v1965_v63 = vld [vmem:[#allocation13 + $0xe48] sm:$0xff]  ;;  %v4163_v51 = vld [vmem:[#allocation11] ss:$0 sm:$0xff] }
 0x88a   :  { %3727 = vmatpush1.bf16.msra.mxu0 %v3726_v10  ;;  %v1932_v10 = vld [vmem:[#allocation13 + $0xd40] sm:$0xff]  ;;  %v1969_v5 = vld [vmem:[#allocation13 + $0xe68] sm:$0xff] }
 0x88b   :  { %3983 = vmatpush1.bf16.msra.mxu1 %v3982_v15  ;;  %3729 = vmatprep.subr.bf16.mxu0 %v3728_v16  ;;  %v1936_v15 = vld [vmem:[#allocation13 + $0xd60] sm:$0xff]  ;;  %v1934_v16 = vld [vmem:[#allocation13 + $0xd50] sm:$0xff]  ;;  %v3764_v11 = vpack.c.bf16 %v1969_v5, %v1965_v63 }
 0x88c   :  { %3985 = vmatprep.subr.bf16.mxu1 %v3984_v29  ;;  %v1945_v29 = vld [vmem:[#allocation13 + $0xda8] sm:$0xff]  ;;  %v3750_v35 = vpack.c.bf16 %v1936_v15, %v1932_v10  ;;  %v4006_v41 = vpack.c.bf16 %v1938_v23, %v1934_v16  ;;  %v1975_v16 = vld [vmem:[#allocation13 + $0xe98] sm:$0xff]  ;;  %v3766_v23 = vpack.c.bf16 %v1968_v19, %v1964_v14  ;;  %v2000_v63 = vld [vmem:[#allocation13 + $0xf60] sm:$0xff] }
 0x88d   :  { %2249 = vmatmul.mubr.f32.vlgmr.msra.gmra.mrb[16].mxu0 %v4846_v39  ;;  %v3752_v0 = vpack.c.bf16 %v1945_v29, %v1941_v33  ;;  %v1973_v10 = vld [vmem:[#allocation13 + $0xe88] sm:$0xff]  ;;  %v1998_v5 = vld [vmem:[#allocation13 + $0xf50] sm:$0xff]  ;;  %v2007_v19 = vld [vmem:[#allocation13 + $0xf98] sm:$0xff] }
 0x88e   :  { %2533 = vmatmul.mubr.f32.vlgmr.msra.gmra.mrb[16].mxu1 %v4846_v39  ;;  %3731 = vmatpush1.bf16.msra.mxu0 %v3730_v43  ;;  %v3994_v39 = vpack.c.bf16 %v1914_v27, %v1910_v13  ;;  %v1940_v43 = vld [vmem:[#allocation13 + $0xd80] sm:$0xff]  ;;  %v1977_v15 = vld [vmem:[#allocation13 + $0xea8] sm:$0xff] }
 0x88f   :  { %3987 = vmatpush1.bf16.msra.mxu1 %v3986_v44  ;;  %3733 = vmatprep.subr.bf16.mxu0 %v3732_v50  ;;  %v1944_v44 = vld [vmem:[#allocation13 + $0xda0] sm:$0xff]  ;;  %v1942_v50 = vld [vmem:[#allocation13 + $0xd90] sm:$0xff]  ;;  %v3768_v32 = vpack.c.bf16 %v1977_v15, %v1973_v10 }
 0x890   :  { %3989 = vmatprep.subr.bf16.mxu1 %v3988_v59  ;;  %v1946_v59 = vld [vmem:[#allocation13 + $0xdb0] sm:$0xff]  ;;  %v3754_v22 = vpack.c.bf16 %v1944_v44, %v1940_v43  ;;  %v1948_v27 = vld [vmem:[#allocation13 + $0xdc0] sm:$0xff] }
 0x891   :  { %v4010_v13 = vpack.c.bf16 %v1946_v59, %v1942_v50  ;;  %v1978_v44 = vld [vmem:[#allocation13 + $0xeb0] sm:$0xff]  ;;  %v1981_v50 = vld [vmem:[#allocation13 + $0xec8] sm:$0xff]  ;;  %v1987_v59 = vld [vmem:[#allocation13 + $0xef8] sm:$0xff] }
 0x892   :  { %3735 = vmatpush1.bf16.msra.mxu0 %v3734_v12 }
 0x893   :  { %3991 = vmatpush1.bf16.msra.mxu1 %v3990_v17  ;;  %3737 = vmatprep.subr.bf16.mxu0 %v3736_v18  ;;  %v1951_v17 = vld [vmem:[#allocation13 + $0xdd8] sm:$0xff] }
 0x894   :  { %3993 = vmatprep.subr.bf16.mxu1 %v3992_v26  ;;  %v1955_v18 = vld [vmem:[#allocation13 + $0xdf8] sm:$0xff]  ;;  %v3756_v26 = vpack.c.bf16 %v1953_v62, %v1949_v61 }
 0x896   :  { %3739 = vmatpush1.bf16.msra.mxu0 %v3738_v37  ;;  %v4012_v37 = vpack.c.bf16 %v1955_v18, %v1951_v17  ;;  %v1986_v18 = vld [vmem:[#allocation13 + $0xef0] sm:$0xff] }
 0x897   :  { %3995 = vmatpush1.bf16.msra.mxu1 %v3994_v39  ;;  %3741 = vmatprep.subr.bf16.mxu0 %v3740_v24  ;;  %v1954_v39 = vld [vmem:[#allocation13 + $0xdf0] sm:$0xff]  ;;  %v1957_v24 = vld [vmem:[#allocation13 + $0xe08] sm:$0xff] }
 0x898   :  { %3997 = vmatprep.subr.bf16.mxu1 %v3996_v46  ;;  %v3758_v46 = vpack.c.bf16 %v1952_v28, %v1948_v27  ;;  %v4014_v47 = vpack.c.bf16 %v1954_v39, %v1950_v30  ;;  %v3760_v48 = vpack.c.bf16 %v1961_v38, %v1957_v24  ;;  %v1990_v39 = vld [vmem:[#allocation13 + $0xf10] sm:$0xff] }
 0x899   :  { %v1994_v38 = vld [vmem:[#allocation13 + $0xf30] sm:$0xff] }
 0x89a   :  { %3743 = vmatpush1.bf16.msra.mxu0 %v3742_v57 }
 0x89b   :  { %3999 = vmatpush1.bf16.msra.mxu1 %v3998_v58  ;;  %3745 = vmatprep.subr.bf16.mxu0 %v3744_v60  ;;  %v4016_v58 = vpack.c.bf16 %v1963_v45, %v1959_v40  ;;  %v1962_v60 = vld [vmem:[#allocation13 + $0xe30] sm:$0xff]  ;;  %v1997_v40 = vld [vmem:[#allocation13 + $0xf48] sm:$0xff] }
 0x89c   :  { %4001 = vmatprep.subr.bf16.mxu1 %v4000_v3  ;;  %v1971_v3 = vld [vmem:[#allocation13 + $0xe78] sm:$0xff]  ;;  %v4018_v8 = vpack.c.bf16 %v1962_v60, %v1958_v54  ;;  %v2001_v45 = vld [vmem:[#allocation13 + $0xf68] sm:$0xff]  ;;  %v1996_v60 = vld [vmem:[#allocation13 + $0xf40] sm:$0xff] }
 0x89e   :  { %3747 = vmatpush1.bf16.msra.mxu0 %v3746_v20  ;;  %v1966_v20 = vld [vmem:[#allocation13 + $0xe50] sm:$0xff] }
 0x89f   :  { %4003 = vmatpush1.bf16.msra.mxu1 %v4002_v1  ;;  %3749 = vmatprep.subr.bf16.mxu0 %v3748_v9  ;;  %v4020_v1 = vpack.c.bf16 %v1971_v3, %v1967_v2  ;;  %v1970_v9 = vld [vmem:[#allocation13 + $0xe70] sm:$0xff] }
 0x8a0   :  { %v1411_v55 = vpop.f32.mrb[14].mxu0  ;;  %v4948_v52 = vpop.f32.mrb[14].mxu1  ;;  %4005 = vmatprep.subr.bf16.mxu1 %v4004_v21  ;;  %v1979_v21 = vld [vmem:[#allocation13 + $0xeb8] sm:$0xff]  ;;  %v4022_v29 = vpack.c.bf16 %v1970_v9, %v1966_v20 }
 0x8a1   :  { %v1486_v4 = vadd.f32 %v4161_v56, %v1411_v55  ;;  %v1413_v6 = vpop.f32.mrb[15].mxu0  ;;  %v3087_v12 = vpop.f32.mrb[15].mxu1  ;;  %v4024_v43 = vpack.c.bf16 %v1979_v21, %v1975_v16  ;;  %v1985_v55 = vld [vmem:[#allocation13 + $0xee8] sm:$0xff]  ;;  %v1500_v54 = vadd.f32 %v4163_v51, %v4948_v52  ;;  %v2011_v20 = vld [vmem:[#allocation13 + $0xfb8] sm:$0xff]  ;;  %v2004_v16 = vld [vmem:[#allocation13 + $0xf80] sm:$0xff] }
 0x8a2   :  { %3751 = vmatpush1.bf16.msra.mxu0 %v3750_v35  ;;  %v1493_v36 = vadd.f32 %v4162_v31, %v1413_v6  ;;  %v1976_v35 = vld [vmem:[#allocation13 + $0xea0] sm:$0xff]  ;;  %v3772_v56 = vpack.c.bf16 %v1985_v55, %v1981_v50  ;;  %v1982_v12 = vld [vmem:[#allocation13 + $0xed0] sm:$0xff]  ;;  %v4164_v52 = vld [vmem:[#allocation10] ss:$0 sm:$0xff] }
 0x8a3   :  { %v2670_v25 = vmul.f32 -1.442695, %v1486_v4  ;;  %4007 = vmatpush1.bf16.msra.mxu1 %v4006_v41  ;;  %3753 = vmatprep.subr.bf16.mxu0 %v3752_v0  ;;  %v1974_v41 = vld [vmem:[#allocation13 + $0xe90] sm:$0xff]  ;;  %v3770_v61 = vpack.c.bf16 %v1976_v35, %v1972_v34  ;;  %v1980_v4 = vld [vmem:[#allocation13 + $0xec0] sm:$0xff]  ;;  %v4030_v30 = vpack.c.bf16 %v1986_v18, %v1982_v12  ;;  %v2017_v34 = vld [vmem:[#allocation13 + $0xfe8] sm:$0xff] }
 0x8a4   :  { %4009 = vmatprep.subr.bf16.mxu1 %v4008_v53  ;;  %v2671_v57 = vmul.f32 -1.442695, %v1493_v36  ;;  %v1983_v53 = vld [vmem:[#allocation13 + $0xed8] sm:$0xff]  ;;  %v4026_v62 = vpack.c.bf16 %v1978_v44, %v1974_v41  ;;  %v1984_v6 = vld [vmem:[#allocation13 + $0xee0] sm:$0xff] }
 0x8a5   :  { %4151 = vpow2.f32 %v2670_v25  ;;  %v4028_v17 = vpack.c.bf16 %v1987_v59, %v1983_v53  ;;  %v1993_v25 = vld [vmem:[#allocation13 + $0xf28] sm:$0xff]  ;;  %v3774_v28 = vpack.c.bf16 %v1984_v6, %v1980_v4  ;;  %v1988_v36 = vld [vmem:[#allocation13 + $0xf00] sm:$0xff]  ;;  %v2015_v35 = vld [vmem:[#allocation13 + $0xfd8] sm:$0xff] }
 0x8a6   :  { %3755 = vmatpush1.bf16.msra.mxu0 %v3754_v22  ;;  %4153 = vpow2.f32 %v2671_v57  ;;  %v1989_v22 = vld [vmem:[#allocation13 + $0xf08] sm:$0xff]  ;;  %v4034_v57 = vpack.c.bf16 %v1994_v38, %v1990_v39  ;;  %v2008_v21 = vld [vmem:[#allocation13 + $0xfa0] sm:$0xff]  ;;  %v2019_v41 = vld [vmem:[#allocation13 + $0xff8] sm:$0xff] }
 0x8a7   :  { %4011 = vmatpush1.bf16.msra.mxu1 %v4010_v13  ;;  %3757 = vmatprep.subr.bf16.mxu0 %v3756_v26  ;;  %v1991_v13 = vld [vmem:[#allocation13 + $0xf18] sm:$0xff]  ;;  %v3776_v31 = vpack.c.bf16 %v1993_v25, %v1989_v22  ;;  %v2012_v50 = vld [vmem:[#allocation13 + $0xfc0] sm:$0xff]  ;;  %v4044_v53 = vpack.c.bf16 %v2019_v41, %v2015_v35  ;;  %v2014_v59 = vld [vmem:[#allocation13 + $0xfd0] sm:$0xff]  ;;  %v2022_v25 = vlaneseq }
 0x8a8   :  { %4013 = vmatprep.subr.bf16.mxu1 %v4012_v37  ;;  %v1995_v26 = vld [vmem:[#allocation13 + $0xf38] sm:$0xff]  ;;  %v1992_v37 = vld [vmem:[#allocation13 + $0xf20] sm:$0xff] }
 0x8a9   :  { %v4032_v24 = vpack.c.bf16 %v1995_v26, %v1991_v13  ;;  %v3778_v49 = vpack.c.bf16 %v1992_v37, %v1988_v36  ;;  %v2016_v55 = vld [vmem:[#allocation13 + $0xfe0] sm:$0xff]  ;;  %v2023_v13 = vshrl.u32 %v2022_v25, 7 }
 0x8aa   :  { %3759 = vmatpush1.bf16.msra.mxu0 %v3758_v46 }
 0x8ab   :  { %4015 = vmatpush1.bf16.msra.mxu1 %v4014_v47  ;;  %3761 = vmatprep.subr.bf16.mxu0 %v3760_v48  ;;  %v1999_v47 = vld [vmem:[#allocation13 + $0xf58] sm:$0xff]  ;;  %v2024_v26 = vsub.s32 0, %v2023_v13  ;;  %v2036_v37 = vsub.s32 3, %v2023_v13 }
 0x8ac   :  { %4017 = vmatprep.subr.bf16.mxu1 %v4016_v58  ;;  %v2003_v48 = vld [vmem:[#allocation13 + $0xf78] sm:$0xff]  ;;  %v3780_v58 = vpack.c.bf16 %v2001_v45, %v1997_v40 }
 0x8ad   :  { %v4036_v3 = vpack.c.bf16 %v2003_v48, %v1999_v47 }
 0x8ae   :  { %3763 = vmatpush1.bf16.msra.mxu0 %v3762_v7  ;;  %v2002_v7 = vld [vmem:[#allocation13 + $0xf70] sm:$0xff] }
 0x8af   :  { %v4152_v33 = vpop.eup %4151  ;;  %4019 = vmatpush1.bf16.msra.mxu1 %v4018_v8  ;;  %3765 = vmatprep.subr.bf16.mxu0 %v3764_v11  ;;  %v2005_v8 = vld [vmem:[#allocation13 + $0xf88] sm:$0xff]  ;;  %v4038_v10 = vpack.c.bf16 %v2002_v7, %v1998_v5 }
 0x8b0   :  { %v1490_v0 = vadd.f32 1.0, %v4152_v33  ;;  %4021 = vmatprep.subr.bf16.mxu1 %v4020_v1  ;;  %v4154_v27 = vpop.eup %4153  ;;  %v2009_v11 = vld [vmem:[#allocation13 + $0xfa8] sm:$0xff]  ;;  %v3782_v1 = vpack.c.bf16 %v2000_v63, %v1996_v60  ;;  %v4040_v33 = vpack.c.bf16 %v2011_v20, %v2007_v19 }
 0x8b1   :  { %v1497_v46 = vadd.f32 1.0, %v4154_v27  ;;  %v3784_v15 = vpack.c.bf16 %v2009_v11, %v2005_v8  ;;  %v2032_v27 = vsub.s32 2, %v2023_v13 }
 0x8b2   :  { %4155 = vrcp.f32 %v1490_v0  ;;  %3767 = vmatpush1.bf16.msra.mxu0 %v3766_v23  ;;  %v2006_v23 = vld [vmem:[#allocation13 + $0xf90] sm:$0xff]  ;;  %v3786_v0 = vpack.c.bf16 %v2008_v21, %v2004_v16 }
 0x8b3   :  { %4023 = vmatpush1.bf16.msra.mxu1 %v4022_v29  ;;  %3769 = vmatprep.subr.bf16.mxu0 %v3768_v32  ;;  %4157 = vrcp.f32 %v1497_v46  ;;  %v2010_v29 = vld [vmem:[#allocation13 + $0xfb0] sm:$0xff]  ;;  %v2013_v32 = vld [vmem:[#allocation13 + $0xfc8] sm:$0xff] }
 0x8b4   :  { %4025 = vmatprep.subr.bf16.mxu1 %v4024_v43  ;;  %v4042_v43 = vpack.c.bf16 %v2010_v29, %v2006_v23  ;;  %v3788_v44 = vpack.c.bf16 %v2017_v34, %v2013_v32 }
 0x8b6   :  { %3771 = vmatpush1.bf16.msra.mxu0 %v3770_v61  ;;  %v2018_v61 = vld [vmem:[#allocation13 + $0xff0] sm:$0xff] }
 0x8b7   :  { %4027 = vmatpush1.bf16.msra.mxu1 %v4026_v62  ;;  %3773 = vmatprep.subr.bf16.mxu0 %v3772_v56  ;;  %v3790_v62 = vpack.c.bf16 %v2016_v55, %v2012_v50  ;;  %v4046_v4 = vpack.c.bf16 %v2018_v61, %v2014_v59 }
 0x8b8   :  { %4029 = vmatprep.subr.bf16.mxu1 %v4028_v17 }
 0x8ba   :  { %3775 = vmatpush1.bf16.msra.mxu0 %v3774_v28  ;;  %v2020_v28 = vld [vmem:[#allocation14] sm:$0xf] }
 0x8bb   :  { %4031 = vmatpush1.bf16.msra.mxu1 %v4030_v30  ;;  %3777 = vmatprep.subr.bf16.mxu0 %v3776_v31  ;;  %v2028_v30 = vsub.s32 1, %v2023_v13  ;;  %v4390_v31 = vmov 1983009808   ;;  %v2025_v39 = vrot.slane %v2020_v28, %v2024_v26  ;;  %v2037_v45 = vrot.slane %v2020_v28, %v2036_v37 }
 0x8bc   :  { %v4156_v2 = vpop.eup %4155  ;;  %4033 = vmatprep.subr.bf16.mxu1 %v4032_v24  ;;  %v2617_v36 = vunpack.c.l.s4 %v4390_v31  ;;  %v2033_v24 = vrot.slane %v2020_v28, %v2032_v27 }
 0x8bd   :  { %v1501_v14 = vmul.f32 %v4156_v2, %v1500_v54  ;;  %v4158_v56 = vpop.eup %4157  ;;  %v2029_v38 = vrot.slane %v2020_v28, %v2028_v30 }
 0x8be   :  { %3779 = vmatpush1.bf16.msra.mxu0 %v3778_v49  ;;  %v1504_v6 = vsub.f32 1.0, %v4158_v56  ;;  %v1506_v18 = vmul.f32 %v4158_v56, %v4932_v42  ;;  %v2618_v40 = vunpack.c.0.s8 %v2617_v36 }
 0x8bf   :  { %v1502_v9 = vadd.f32 %v4164_v52, %v1501_v14  ;;  %4035 = vmatpush1.bf16.msra.mxu1 %v4034_v57  ;;  %3781 = vmatprep.subr.bf16.mxu0 %v3780_v58 }
 0x8c0   :  { %4037 = vmatprep.subr.bf16.mxu1 %v4036_v3  ;;  %v2621_v57 = vsub.s32 %v2618_v40, %v2023_v13 }
 0x8c1   :  { %4159 = vtanh.f32 %v1502_v9 }
 0x8c2   :  { %3783 = vmatpush1.bf16.msra.mxu0 %v3782_v1 }
 0x8c3   :  { %4039 = vmatpush1.bf16.msra.mxu1 %v4038_v10  ;;  %3785 = vmatprep.subr.bf16.mxu0 %v3784_v15 }
 0x8c4   :  { %4041 = vmatprep.subr.bf16.mxu1 %v4040_v33 }
 0x8c6   :  { %3787 = vmatpush1.bf16.msra.mxu0 %v3786_v0 }
 0x8c7   :  { %4043 = vmatpush1.bf16.msra.mxu1 %v4042_v43  ;;  %3789 = vmatprep.subr.bf16.mxu0 %v3788_v44 }
 0x8c8   :  { %4045 = vmatprep.subr.bf16.mxu1 %v4044_v53 }
 0x8ca   :  { %3791 = vmatpush1.bf16.msra.mxu0 %v3790_v62 }
 0x8cb   :  { %v4160_v12 = vpop.eup %4159  ;;  %4047 = vmatpush1.bf16.msra.mxu1 %v4046_v4 }
 0x8cc   :  { %v1505_v17 = vmul.f32 %v4160_v12, %v1504_v6 }
 0x8ce   :  { %v1507_v22 = vadd.f32 %v1506_v18, %v1505_v17 }
 0x8d0   :  { %2319 = vmatprep.mubr.f32.mxu0 %v1507_v22  ;;  %2603 = vmatprep.mubr.f32.mxu1 %v1507_v22 }
 0x8d1   :  { %2320 = vmatmul.mubr.f32.vlgmr.msra.gmra.mrb[16].mxu0 %v4932_v42  ;;  %2604 = vmatmul.mubr.f32.vlgmr.msra.gmra.mrb[16].mxu1 %v4932_v42 }
 0x9a4   :  { %v2321_v46 = vpop.f32.mrb[16].mxu0  ;;  %v2605_v47 = vpop.f32.mrb[16].mxu1 }
 0x9a5   :  { %v4048_v48 = vadd.f32 %v2321_v46, %v2025_v39  ;;  %v4050_v49 = vadd.f32 %v2605_v47, %v2033_v24  ;;  %v2323_v51 = vpop.f32.mrb[17].mxu0  ;;  %v2607_v42 = vpop.f32.mrb[17].mxu1 }
 0x9a6   :  { %v4049_v54 = vadd.f32 %v2323_v51, %v2029_v38  ;;  %v4051_v58 = vadd.f32 %v2607_v42, %v2037_v45 }
 0x9a8   :  { %v2614_v60 = vcombine.low %v4048_v48, %v4049_v54  ;;  %v2615_v63 = vcombine.low %v4050_v49, %v4051_v58 }
 0x9aa   :  { %v2622_v5 = vrot.slane %v2614_v60, %v2621_v57  ;;  %v2629_v2 = vrot.slane %v2615_v63, %v2621_v57 }
 0x9ac   :  { %v2630_v3 = vcombine.low %v2622_v5, %v2629_v2 }
 0x9ae   :  { %2632 = vst [vmem:[#allocation16] sm:$0xff] %v2630_v3 }
 0x9af   :  { %4352 = shalt.err (!%p4349_p12)
}
 0x9b0   :  { %s4353_s22 = scalar_lea.hbm %s4974_s8, 128 }
 0x9b1   :  { %p4354_p13 = scmp.ne.s32.totalorder %s4974_s8, %s4353_s22  ;;  %p4357_p0 = scmp.lt.u32.totalorder %s4353_s22, %s4974_s8 }
 0x9b3   :  { %p4359_p1 = pnand %p4357_p0, %p4354_p13 }
 0x9b5   :  { %4362 = shalt.err (!%p4359_p1)
}
 0x9b6   :  { %2642 = dma.vmem_to_hbm [thread:$0]  %s2640_s9, 128, %s4974_s8, [#allocation4]  }
 0x9b7   :  { %4373 = dma.done.wait [#allocation4], 128  }
 0x9b8   :  { %4374 = vsyncadd [#allocation4], 4294967168 }
 0x9b9   :  { %2646 = vsyncpa [#allocation3], 1 }
 0x9ba   :  { %2647 = vsyncpa [#allocation6], 1 }
 0x9bb   :  { %2648 = vsyncpa [#allocation9], 1 }
 0x9bc   :  { %2649 = vsyncpa [#allocation12], 1 }
 0x9bd   :  { %2650 = vsyncpa [#allocation15], 1 }
 0x9be   :  { %2651 = vsyncpa [#allocation4], 1 }

</bundles_post_ra>
